<compile_context>
chip_gen: v5e
topology: v5e:2x2
jax: 0.10.0
libtpu: 0.0.40
codegen_flags: <defaults>
</compile_context>

<pallas_src>
import math
import functools
import numpy as np

import jax
import jax.numpy as jnp
from jax.experimental import pallas as pl
from jax.experimental.pallas import tpu as pltpu


ACT_DTYPE = jnp.bfloat16            # activation / weight storage dtype (MXU inputs)


def _tpu_vmem_capacity_bytes():
    try:
        info = pltpu.get_tpu_info()
        cap = int(getattr(info, "vmem_capacity_bytes", 0) or 0)
        if cap > 0:
            return cap
    except Exception:
        pass
    return 64 * 1024 * 1024         # conservative default (v7x per-TC VMEM)


_VMEM_CAP = _tpu_vmem_capacity_bytes()
_BIG_VMEM = _VMEM_CAP >= 96 * 1024 * 1024
VMEM_LIMIT = (100 * 1024 * 1024) if _BIG_VMEM else (48 * 1024 * 1024)
_ROW_TILES = (512, 256, 128, 64, 32, 16, 8) if _BIG_VMEM else (256, 128, 64, 32, 16, 8)
_COL_TILES = (1024, 512, 256, 128) if _BIG_VMEM else (512, 256, 128)
_K_TILES = (1024, 512, 256, 128) if _BIG_VMEM else (512, 256, 128)
_MIN_STEPS = 2 if _BIG_VMEM else 4   # v7x (2 TCs): want >=2 grid steps per core


def _cparams(*sems):
    return pltpu.CompilerParams(dimension_semantics=tuple(sems),
                                vmem_limit_bytes=VMEM_LIMIT)


# ------------------------------- tiling helpers ------------------------------ #

def _round_up(x, m):
    return ((x + m - 1) // m) * m


def _pad_rows(x2d):
    M = x2d.shape[0]
    Mp = _round_up(M, 8)
    if Mp == M:
        return x2d, M, False
    return jnp.pad(x2d, ((0, Mp - M), (0, 0))), M, True


def _pick_row_tile(M):
    for min_steps in (_MIN_STEPS, 2, 1):
        for t in _ROW_TILES:
            if M % t == 0 and M // t >= min_steps:
                return t
    return M


def _pick_col_tile(N):
    for t in _COL_TILES:
        if N % t == 0:
            return t
    return N


def _pick_k_tile(K):
    for t in _K_TILES:
        if K % t == 0:
            return t
    return K


def _pick_rows3d(R):
    for min_steps in (_MIN_STEPS, 2, 1):
        for rb in range(min(8, R), 0, -1):
            if R % rb == 0 and R // rb >= min_steps:
                return rb
    return R


def _pick_q_tile(T):
    for min_steps in (2, 1):
        for t in (256, 128, 64, 32, 16, 8):
            if T % t == 0 and T // t >= min_steps:
                return t
    return T


# ----------------------------- Pallas kernels ------------------------------ #

def _make_linear_kernel(act, nk):
    """Tiled matmul with f32 accumulator; optional activation epilogue."""
    def kernel(x_ref, w_ref, b_ref, o_ref, acc_ref):
        @pl.when(pl.program_id(2) == 0)
        def _():
            acc_ref[...] = jnp.zeros_like(acc_ref)

        acc_ref[...] += jnp.dot(x_ref[...], w_ref[...],
                                preferred_element_type=jnp.float32)

        @pl.when(pl.program_id(2) == nk - 1)
        def _():
            y = acc_ref[...] + b_ref[...]
            if act == "silu":
                y = y * jax.nn.sigmoid(y)
            elif act == "relu":
                y = jnp.maximum(y, 0.0)
            o_ref[...] = y.astype(o_ref.dtype)
    return kernel


def linear2d(x2d, w, b, act="none"):
    """x2d: (M, K) bf16, w: (K, N) bf16, b: (N,) f32 -> (M, N) bf16."""
    xp, M0, padded = _pad_rows(x2d)
    Mp, K = xp.shape
    N = w.shape[1]
    tm, tn, tk = _pick_row_tile(Mp), _pick_col_tile(N), _pick_k_tile(K)
    nk = K // tk
    out = pl.pallas_call(
        _make_linear_kernel(act, nk),
        out_shape=jax.ShapeDtypeStruct((Mp, N), ACT_DTYPE),
        grid=(Mp // tm, N // tn, nk),
        in_specs=[pl.BlockSpec((tm, tk), lambda i, j, k: (i, k)),
                  pl.BlockSpec((tk, tn), lambda i, j, k: (k, j)),
                  pl.BlockSpec((1, tn), lambda i, j, k: (0, j))],
        out_specs=pl.BlockSpec((tm, tn), lambda i, j, k: (i, j)),
        scratch_shapes=[pltpu.VMEM((tm, tn), jnp.float32)],
        compiler_params=_cparams("parallel", "parallel", "arbitrary"),
    )(xp, w, b.reshape(1, N))
    return out[:M0] if padded else out


def _make_ln_linear_kernel(act, has_mask):
    """Fused (optional mask) -> LayerNorm -> matmul (-> GLU / SiLU / ReLU)."""
    def kernel(*refs):
        if has_mask:
            x_ref, m_ref, g_ref, bln_ref, w_ref, b_ref, o_ref = refs
        else:
            x_ref, g_ref, bln_ref, w_ref, b_ref, o_ref = refs
        x = x_ref[...].astype(jnp.float32)
        if has_mask:
            x = x * m_ref[...]
        mean = jnp.mean(x, axis=-1, keepdims=True)
        c = x - mean
        var = jnp.mean(c * c, axis=-1, keepdims=True)
        h = (c * jax.lax.rsqrt(var + 1e-5)) * g_ref[...] + bln_ref[...]
        y = jnp.dot(h.astype(w_ref.dtype), w_ref[...],
                    preferred_element_type=jnp.float32) + b_ref[...]
        if act == "glu":
            half = y.shape[-1] // 2
            y = y[:, :half] * jax.nn.sigmoid(y[:, half:])
        elif act == "silu":
            y = y * jax.nn.sigmoid(y)
        elif act == "relu":
            y = jnp.maximum(y, 0.0)
        o_ref[...] = y.astype(o_ref.dtype)
    return kernel


def ln_linear(x2d, g, bln, w, b, act="none", mask2d=None):
    xp, M0, padded = _pad_rows(x2d)
    Mp, K = xp.shape
    N = w.shape[1]
    Nout = N // 2 if act == "glu" else N
    tm = _pick_row_tile(Mp)
    has_mask = mask2d is not None

    in_specs = [pl.BlockSpec((tm, K), lambda i: (i, 0))]
    args = [xp]
    if has_mask:
        mp, _, _ = _pad_rows(mask2d)
        in_specs.append(pl.BlockSpec((tm, 1), lambda i: (i, 0)))
        args.append(mp)
    # NOTE: constant-index full-weight block is double-buffered by default; for v7x-tight
    # VMEM the K-tiled linear2d path can be used instead (weights here are small enough).
    in_specs += [pl.BlockSpec((1, K), lambda i: (0, 0)),
                 pl.BlockSpec((1, K), lambda i: (0, 0)),
                 pl.BlockSpec((K, N), lambda i: (0, 0)),
                 pl.BlockSpec((1, N), lambda i: (0, 0))]
    args += [g.reshape(1, K), bln.reshape(1, K), w, b.reshape(1, N)]

    out = pl.pallas_call(
        _make_ln_linear_kernel(act, has_mask),
        out_shape=jax.ShapeDtypeStruct((Mp, Nout), ACT_DTYPE),
        grid=(Mp // tm,),
        in_specs=in_specs,
        out_specs=pl.BlockSpec((tm, Nout), lambda i: (i, 0)),
        compiler_params=_cparams("parallel"),
    )(*args)
    return out[:M0] if padded else out


def _make_ffn_kernel(nkf, res_scale, has_final_ln):
    """Fused LN -> W1 -> SiLU -> W2 (K-grid over d_ff) -> res_scale*() + residual (-> final LN).

    The LayerNorm'd activations are computed once per row tile (j == 0) and cached in a VMEM
    scratch for all d_ff tiles.
    """
    def kernel(x_ref, g_ref, bln_ref, w1_ref, b1_ref, w2_ref, b2_ref, *rest):
        if has_final_ln:
            fg_ref, fb_ref, o_ref, h_scr, acc_ref = rest
        else:
            o_ref, h_scr, acc_ref = rest
        j = pl.program_id(1)

        @pl.when(j == 0)
        def _():
            x = x_ref[...].astype(jnp.float32)
            mean = jnp.mean(x, axis=-1, keepdims=True)
            c = x - mean
            var = jnp.mean(c * c, axis=-1, keepdims=True)
            h = (c * jax.lax.rsqrt(var + 1e-5)) * g_ref[...] + bln_ref[...]
            h_scr[...] = h.astype(h_scr.dtype)
            acc_ref[...] = jnp.zeros_like(acc_ref)

        h1 = jnp.dot(h_scr[...], w1_ref[...],
                     preferred_element_type=jnp.float32) + b1_ref[...]
        h1 = h1 * jax.nn.sigmoid(h1)
        acc_ref[...] += jnp.dot(h1.astype(w2_ref.dtype), w2_ref[...],
                                preferred_element_type=jnp.float32)

        @pl.when(j == nkf - 1)
        def _():
            y = (acc_ref[...] + b2_ref[...]) * res_scale + x_ref[...].astype(jnp.float32)
            if has_final_ln:
                m2 = jnp.mean(y, axis=-1, keepdims=True)
                c2 = y - m2
                v2 = jnp.mean(c2 * c2, axis=-1, keepdims=True)
                y = (c2 * jax.lax.rsqrt(v2 + 1e-5)) * fg_ref[...] + fb_ref[...]
            o_ref[...] = y.astype(o_ref.dtype)
    return kernel


def ffn_fused(x2d, p, *, res_scale=0.5, final_ln=None):
    xp, M0, padded = _pad_rows(x2d)
    Mp, D = xp.shape
    Dff = p["W1"].shape[1]
    tm = _pick_row_tile(Mp)
    tf = _pick_col_tile(Dff)
    nkf = Dff // tf
    has_fln = final_ln is not None

    in_specs = [pl.BlockSpec((tm, D), lambda i, j: (i, 0)),
                pl.BlockSpec((1, D), lambda i, j: (0, 0)),
                pl.BlockSpec((1, D), lambda i, j: (0, 0)),
                pl.BlockSpec((D, tf), lambda i, j: (0, j)),
                pl.BlockSpec((1, tf), lambda i, j: (0, j)),
                pl.BlockSpec((tf, D), lambda i, j: (j, 0)),
                pl.BlockSpec((1, D), lambda i, j: (0, 0))]
    args = [xp, p["ln_g"].reshape(1, D), p["ln_b"].reshape(1, D),
            p["W1"], p["b1"].reshape(1, Dff), p["W2"], p["b2"].reshape(1, D)]
    if has_fln:
        fg, fb = final_ln
        in_specs += [pl.BlockSpec((1, D), lambda i, j: (0, 0)),
                     pl.BlockSpec((1, D), lambda i, j: (0, 0))]
        args += [fg.reshape(1, D), fb.reshape(1, D)]

    out = pl.pallas_call(
        _make_ffn_kernel(nkf, res_scale, has_fln),
        out_shape=jax.ShapeDtypeStruct((Mp, D), ACT_DTYPE),
        grid=(Mp // tm, nkf),
        in_specs=in_specs,
        out_specs=pl.BlockSpec((tm, D), lambda i, j: (i, 0)),
        scratch_shapes=[pltpu.VMEM((tm, D), ACT_DTYPE),     # cached LN(x)
                        pltpu.VMEM((tm, D), jnp.float32)],  # f32 accumulator
        compiler_params=_cparams("parallel", "arbitrary"),
    )(*args)
    return out[:M0] if padded else out


def _attn_kernel(qkv_ref, km_ref, rowc_ref, colc_ref, colok_ref, wout_ref,
                 bout_ref, xres_ref, on_ref, off_ref, *, num_heads):
    """Dual (online/offline) attention for one query tile of one batch element.

    Heads are batched in a single lax.dot_general; the online/offline biases are built
    in-kernel from a (1,T) key-validity row and tiny chunk-index vectors (no (T,T) HBM
    tensors); Wout + bias + residual are fused so each output is one lane-dense store.
    """
    T = qkv_ref.shape[1]
    tq = xres_ref.shape[1]
    D = xres_ref.shape[2]
    H = num_heads
    Dh = D // H
    scale = 1.0 / math.sqrt(Dh)
    q_start = pl.multiple_of(pl.program_id(1) * tq, tq)

    z = qkv_ref[0]                                       # (T, 3D) bf16: full K/V rows
    k = z[:, D:2 * D].reshape(T, H, Dh)
    v = z[:, 2 * D:3 * D].reshape(T, H, Dh)
    q = qkv_ref.at[0][pl.ds(q_start, tq), :][:, :D].reshape(tq, H, Dh)

    # Q.K^T batched over heads -> (H, tq, T) f32
    s = jax.lax.dot_general(q, k, (((2,), (2,)), ((1,), (1,))),
                            preferred_element_type=jnp.float32) * scale

    key_ok = km_ref[0]                                   # (1, T)  1 = valid key
    rc = rowc_ref[pl.ds(q_start, tq), :]                 # (tq, 1) query chunk index
    cc = colc_ref[...]                                   # (1, T)  key chunk index
    cok = colok_ref[...]                                 # (1, T)  1 = not a lookahead frame
    # chunk mask (== create_chunk_mask with carry_over_size=None): current chunk, or the
    # previous chunk excluding its lookahead frames.
    in_chunk = cc == rc
    in_prev = jnp.logical_and(cc == rc - 1.0, cok > 0.5)
    chunk_ok = jnp.logical_or(in_chunk, in_prev).astype(jnp.float32)   # (tq, T)

    neg = jnp.float32(-1e9)
    bias_off = (1.0 - key_ok) * neg                      # key padding only
    bias_on = (1.0 - key_ok * chunk_ok) * neg            # key padding + chunk mask

    def _softmax(sc):
        m = jnp.max(sc, axis=-1, keepdims=True)
        e = jnp.exp(sc - m)
        # approx reciprocal runs on the EUP slot; exact division only needed for strict parity
        return e * pl.reciprocal(jnp.sum(e, axis=-1, keepdims=True), approx=True)

    p_on = _softmax(s + bias_on[None])
    p_off = _softmax(s + bias_off[None])

    res = xres_ref[0].astype(jnp.float32)                # (tq, D) residual (post-ff1 x)
    wout = wout_ref[...]
    bout = bout_ref[...]

    def _project(p):
        o = jax.lax.dot_general(p.astype(v.dtype), v, (((2,), (0,)), ((0,), (1,))),
                                preferred_element_type=jnp.float32)        # (H, tq, Dh)
        o = jnp.transpose(o.astype(wout.dtype), (1, 0, 2)).reshape(tq, D)  # lane-dense (tq, D)
        y = jnp.dot(o, wout, preferred_element_type=jnp.float32)
        return y + bout + res

    on_ref[0] = _project(p_on).astype(on_ref.dtype)
    off_ref[0] = _project(p_off).astype(off_ref.dtype)


def mhsa_block(x, seq_mask_f, chunk_vecs, p, num_heads):
    """ConformerMHSAV3 + block-head residual: returns (online + x, offline + x)."""
    B, T, D = x.shape
    row_chunk, col_chunk, col_keep = chunk_vecs
    qkv = ln_linear(x.reshape(-1, D), p["ln_g"], p["ln_b"], p["Win"], p["bin"])
    qkv3 = qkv.reshape(B, T, 3 * D)
    tq = _pick_q_tile(T)
    out_spec = pl.BlockSpec((1, tq, D), lambda b, q: (b, q, 0))
    on, off = pl.pallas_call(
        functools.partial(_attn_kernel, num_heads=num_heads),
        out_shape=(jax.ShapeDtypeStruct((B, T, D), ACT_DTYPE),
                   jax.ShapeDtypeStruct((B, T, D), ACT_DTYPE)),
        grid=(B, T // tq),
        in_specs=[pl.BlockSpec((1, T, 3 * D), lambda b, q: (b, 0, 0)),
                  pl.BlockSpec((1, 1, T), lambda b, q: (b, 0, 0)),
                  pl.BlockSpec((T, 1), lambda b, q: (0, 0)),
                  pl.BlockSpec((1, T), lambda b, q: (0, 0)),
                  pl.BlockSpec((1, T), lambda b, q: (0, 0)),
                  pl.BlockSpec((D, D), lambda b, q: (0, 0)),
                  pl.BlockSpec((1, D), lambda b, q: (0, 0)),
                  pl.BlockSpec((1, tq, D), lambda b, q: (b, q, 0))],
        out_specs=(out_spec, out_spec),
        compiler_params=_cparams("parallel", "parallel"),
    )(qkv3, seq_mask_f, row_chunk, col_chunk, col_keep,
      p["Wout"], p["bout"].reshape(1, D), x)
    return on, off


def _dwconv_kernel(x_ref, w_ref, b_ref, o_ref, ps_ref, pq_ref, *, K, T, D):
    """Depthwise conv + bias; also emits per-block partial sum / sum-of-squares for BN."""
    x = x_ref[...].astype(jnp.float32)        # (rb, T + K - 1, D)
    w = w_ref[...].astype(jnp.float32)        # (K, D)
    acc = x[:, 0:T, :] * w[0]
    for k in range(1, K):
        # TODO(synk): replace the sublane-misaligned static slices with pltpu.roll on the
        # idle XLU slot once the rotate direction is validated against the reference.
        acc = acc + x[:, k:k + T, :] * w[k]
    y = acc + b_ref[...]                      # (rb, T, D) f32
    o_ref[...] = y.astype(o_ref.dtype)
    s = jnp.sum(y, axis=(0, 1))
    q = jnp.sum(y * y, axis=(0, 1))
    row = jax.lax.broadcasted_iota(jnp.int32, (8, D), 0)
    ps_ref[...] = jnp.where(row == 0, s[None, :], 0.0)
    pq_ref[...] = jnp.where(row == 0, q[None, :], 0.0)


def depthwise_conv1d(x3, w, b):
    """x3: (R, T, D) bf16, w: (K, D) f32, b: (D,) f32. 'same' padding (odd K), groups=D.

    Returns (y, partial_sum, partial_sumsq) where the partials are (8*num_blocks, D) f32
    with the real values in row 0 of each 8-row block (layout keeps blocks (8,128)-legal).
    """
    R, T, D = x3.shape
    K = w.shape[0]
    pad = (K - 1) // 2
    xp = jnp.pad(x3, ((0, 0), (pad, pad), (0, 0)))
    Tp = T + 2 * pad
    rb = _pick_rows3d(R)
    nblk = R // rb
    return pl.pallas_call(
        functools.partial(_dwconv_kernel, K=K, T=T, D=D),
        out_shape=(jax.ShapeDtypeStruct((R, T, D), ACT_DTYPE),
                   jax.ShapeDtypeStruct((nblk * 8, D), jnp.float32),
                   jax.ShapeDtypeStruct((nblk * 8, D), jnp.float32)),
        grid=(nblk,),
        in_specs=[pl.BlockSpec((rb, Tp, D), lambda r: (r, 0, 0)),
                  pl.BlockSpec((K, D), lambda r: (0, 0)),
                  pl.BlockSpec((1, D), lambda r: (0, 0))],
        out_specs=(pl.BlockSpec((rb, T, D), lambda r: (r, 0, 0)),
                   pl.BlockSpec((8, D), lambda r: (r, 0)),
                   pl.BlockSpec((8, D), lambda r: (r, 0))),
        compiler_params=_cparams("parallel"),
    )(xp, w, b.reshape(1, D))


def _make_bn_silu_linear_kernel(has_mask):
    """Fused BatchNorm-affine -> SiLU -> pointwise matmul -> + (masked) residual."""
    def kernel(*refs):
        if has_mask:
            h_ref, sc_ref, sh_ref, w_ref, b_ref, r_ref, m_ref, o_ref = refs
        else:
            h_ref, sc_ref, sh_ref, w_ref, b_ref, r_ref, o_ref = refs
        h = h_ref[...].astype(jnp.float32) * sc_ref[...] + sh_ref[...]
        h = h * jax.nn.sigmoid(h)
        y = jnp.dot(h.astype(w_ref.dtype), w_ref[...], preferred_element_type=jnp.float32)
        r = r_ref[...].astype(jnp.float32)
        if has_mask:
            r = r * m_ref[...]
        o_ref[...] = (y + b_ref[...] + r).astype(o_ref.dtype)
    return kernel


def bn_silu_linear(h2d, scale, shift, w, b, res2d, mask2d=None):
    hp, M0, padded = _pad_rows(h2d)
    rp, _, _ = _pad_rows(res2d)
    Mp, D = hp.shape
    N = w.shape[1]
    tm = _pick_row_tile(Mp)
    has_mask = mask2d is not None

    in_specs = [pl.BlockSpec((tm, D), lambda i: (i, 0)),
                pl.BlockSpec((1, D), lambda i: (0, 0)),
                pl.BlockSpec((1, D), lambda i: (0, 0)),
                pl.BlockSpec((D, N), lambda i: (0, 0)),
                pl.BlockSpec((1, N), lambda i: (0, 0)),
                pl.BlockSpec((tm, N), lambda i: (i, 0))]
    args = [hp, scale.reshape(1, D), shift.reshape(1, D), w, b.reshape(1, N), rp]
    if has_mask:
        mp, _, _ = _pad_rows(mask2d)
        in_specs.append(pl.BlockSpec((tm, 1), lambda i: (i, 0)))
        args.append(mp)

    out = pl.pallas_call(
        _make_bn_silu_linear_kernel(has_mask),
        out_shape=jax.ShapeDtypeStruct((Mp, N), ACT_DTYPE),
        grid=(Mp // tm,),
        in_specs=in_specs,
        out_specs=pl.BlockSpec((tm, N), lambda i: (i, 0)),
        compiler_params=_cparams("parallel"),
    )(*args)
    return out[:M0] if padded else out


def _vrnn_kernel(t_ref, s_ref, w_ref, b_ref, g_ref, bln_ref, o_ref):
    t = t_ref[...].astype(jnp.float32)
    z = t + s_ref[...].astype(jnp.float32)
    h = jnp.dot(z.astype(w_ref.dtype), w_ref[...], preferred_element_type=jnp.float32)
    h = jnp.maximum(h + b_ref[...], 0.0)
    y = h + t
    mean = jnp.mean(y, axis=-1, keepdims=True)
    c = y - mean
    var = jnp.mean(c * c, axis=-1, keepdims=True)
    y = (c * jax.lax.rsqrt(var + 1e-5)) * g_ref[...] + bln_ref[...]
    o_ref[...] = y.astype(o_ref.dtype)


def vrnn_fused(t2d, s2d, p):
    tp, M0, padded = _pad_rows(t2d)
    sp, _, _ = _pad_rows(s2d)
    Mp, D = tp.shape
    tm = _pick_row_tile(Mp)
    out = pl.pallas_call(
        _vrnn_kernel,
        out_shape=jax.ShapeDtypeStruct((Mp, D), ACT_DTYPE),
        grid=(Mp // tm,),
        in_specs=[pl.BlockSpec((tm, D), lambda i: (i, 0)),
                  pl.BlockSpec((tm, D), lambda i: (i, 0)),
                  pl.BlockSpec((D, D), lambda i: (0, 0)),
                  pl.BlockSpec((1, D), lambda i: (0, 0)),
                  pl.BlockSpec((1, D), lambda i: (0, 0)),
                  pl.BlockSpec((1, D), lambda i: (0, 0))],
        out_specs=pl.BlockSpec((tm, D), lambda i: (i, 0)),
        compiler_params=_cparams("parallel"),
    )(tp, sp, p["W"], p["b"].reshape(1, D), p["ln_g"].reshape(1, D), p["ln_b"].reshape(1, D))
    return out[:M0] if padded else out


# ------------------------------ Module forward ------------------------------ #

def block_head(x, seq_mask_f, chunk_vecs, lp, num_heads):
    # ConformerBlockHeadV1: x = 0.5*ff1(x) + x ; (on, off) = mhsa(x) + x (residual fused)
    B, T, D = x.shape
    x = ffn_fused(x.reshape(-1, D), lp["ff1"]).reshape(B, T, D)
    return mhsa_block(x, seq_mask_f, chunk_vecs, lp["mhsa"], num_heads)


def conformer_conv(x2d, mask2d, rows, t_local, p):
    # mask -> LN -> pointwise1 + GLU -> depthwise conv (+BN partials) -> BN -> SiLU ->
    # pointwise2 -> + masked residual
    D = x2d.shape[-1]
    M = x2d.shape[0]
    h = ln_linear(x2d, p["ln_g"], p["ln_b"], p["pw1_W"], p["pw1_b"],
                  act="glu", mask2d=mask2d)                                   # (M, D)
    h3, psum, psumsq = depthwise_conv1d(h.reshape(rows, t_local, D), p["dw_W"], p["dw_b"])
    h = h3.reshape(-1, D)
    # BatchNorm1d (training-mode biased batch stats over ALL frames, incl. zeroed/padded).
    cnt = jnp.float32(M)
    mean = jnp.sum(psum, axis=0) / cnt
    var = jnp.maximum(jnp.sum(psumsq, axis=0) / cnt - mean * mean, 0.0)
    scale = p["bn_g"] * jax.lax.rsqrt(var + 1e-5)
    shift = p["bn_b"] - mean * scale
    return bn_silu_linear(h, scale, shift, p["pw2_W"], p["pw2_b"], x2d, mask2d=mask2d)


def block_tail(x, sm_flat, lp, chunk_sz=None):
    # ConformerBlockTailV1: mask -> conv + x -> 0.5*ff2 + x -> final LN
    B, T, D = x.shape
    if chunk_sz is not None:
        rows, t_local = (B * T) // chunk_sz, chunk_sz
    else:
        rows, t_local = B, T
    mask2d = sm_flat.reshape(-1, 1).astype(jnp.float32)   # (B*T, 1), 1 = valid frame
    x2 = conformer_conv(x.reshape(-1, D), mask2d, rows, t_local, lp["conv"])
    x2 = ffn_fused(x2, lp["ff2"], final_ln=(lp["final_ln_g"], lp["final_ln_b"]))
    return x2.reshape(B, T, D)


def vrnn_step(tensor, state, p):
    # VRNNV1: LN(relu(Linear(tensor + state)) + tensor)
    B, T, D = tensor.shape
    return vrnn_fused(tensor.reshape(-1, D), state.reshape(-1, D), p).reshape(B, T, D)


def encoder_forward(params, data, sequence_mask, *, lookahead_size, num_heads):
    """ConformerVRNNEncoderV1.forward.

    data:          (B, N, C+R, F_in)
    sequence_mask: (B, N, C+R) bool, True = valid frame
    returns ((x_online, seq_mask), (y_offline, seq_mask))
    """
    B, N, CR, Fin = data.shape
    subs_la = math.ceil(lookahead_size / 6)

    # TODO(synk): cfg.frontend() is config-provided (e.g. VGG time-subsampling frontend);
    # deterministic per-frame Linear stand-in (no time subsampling) -- lookahead_size is
    # chosen so ceil(lookahead/6) equals the effective lookahead after this frontend.
    x2 = linear2d(data.reshape(B * N * CR, Fin).astype(ACT_DTYPE),
                  params["frontend"]["W"], params["frontend"]["b"])
    D = x2.shape[-1]
    ext_chunk = CR
    chunk_size = ext_chunk - subs_la
    T = N * ext_chunk
    x = x2.reshape(B, T, D)

    sm_flat = sequence_mask.reshape(B, T)
    seq_mask_f = sm_flat.astype(jnp.float32).reshape(B, 1, T)

    # Chunk-structure vectors (replace the (T,T) chunk-attention mask; equivalent to
    # create_chunk_mask(seq_len=T, chunk_size=ext-la, lookahead_size=la, carry_over=None)).
    pos = np.arange(T)
    chunk_id = (pos // ext_chunk).astype(np.float32)
    row_chunk = jnp.asarray(chunk_id).reshape(T, 1)
    col_chunk = jnp.asarray(chunk_id).reshape(1, T)
    col_keep = jnp.asarray(((pos % ext_chunk) < chunk_size).astype(np.float32)).reshape(1, T)
    chunk_vecs = (row_chunk, col_chunk, col_keep)

    y_state = x
    for lp in params["layers"]:
        x_on, y_off = block_head(x, seq_mask_f, chunk_vecs, lp, num_heads)
        x = block_tail(x_on, sm_flat, lp, chunk_sz=ext_chunk)      # chunked path (online)
        y = block_tail(y_off, sm_flat, lp, chunk_sz=None)          # full-sequence path (offline)
        y_state = vrnn_step(y, y_state, params["vrnn"])            # shared VRNN

    def merge_drop(t):
        Dd = t.shape[-1]
        t = t.reshape(-1, ext_chunk, Dd)
        t = t[:, :ext_chunk - subs_la].reshape(B, -1, Dd)
        return t

    seq_mask_out = merge_drop(sm_flat[..., None])[..., 0]
    x_out = merge_drop(x).astype(jnp.float32)
    y_out = merge_drop(y_state).astype(jnp.float32)
    return (x_out, seq_mask_out), (y_out, seq_mask_out)


# ------------------------------ Parameter init ------------------------------ #

def init_params(key, f_in, d_model, d_ff, conv_kernel, num_layers):
    def w(k, shape, dtype=ACT_DTYPE):
        return (0.05 * jax.random.normal(k, shape, dtype=jnp.float32)).astype(dtype)

    ones = lambda n: jnp.ones((n,), jnp.float32)
    zeros = lambda n: jnp.zeros((n,), jnp.float32)

    n_keys = 2 + 9 * num_layers
    keys = jax.random.split(key, n_keys)
    ki = iter(range(n_keys))

    params = {
        "frontend": {"W": w(keys[next(ki)], (f_in, d_model)), "b": zeros(d_model)},
        "vrnn": {"W": w(keys[next(ki)], (d_model, d_model)), "b": zeros(d_model),
                 "ln_g": ones(d_model), "ln_b": zeros(d_model)},
        "layers": [],
    }
    for _ in range(num_layers):
        layer = {
            "ff1": {"ln_g": ones(d_model), "ln_b": zeros(d_model),
                    "W1": w(keys[next(ki)], (d_model, d_ff)), "b1": zeros(d_ff),
                    "W2": w(keys[next(ki)], (d_ff, d_model)), "b2": zeros(d_model)},
            "mhsa": {"ln_g": ones(d_model), "ln_b": zeros(d_model),
                     "Win": w(keys[next(ki)], (d_model, 3 * d_model)), "bin": zeros(3 * d_model),
                     "Wout": w(keys[next(ki)], (d_model, d_model)), "bout": zeros(d_model)},
            "conv": {"ln_g": ones(d_model), "ln_b": zeros(d_model),
                     "pw1_W": w(keys[next(ki)], (d_model, 2 * d_model)), "pw1_b": zeros(2 * d_model),
                     "dw_W": w(keys[next(ki)], (conv_kernel, d_model), jnp.float32),
                     "dw_b": zeros(d_model),
                     "bn_g": ones(d_model), "bn_b": zeros(d_model),
                     "pw2_W": w(keys[next(ki)], (d_model, d_model)), "pw2_b": zeros(d_model)},
            "ff2": {"ln_g": ones(d_model), "ln_b": zeros(d_model),
                    "W1": w(keys[next(ki)], (d_model, d_ff)), "b1": zeros(d_ff),
                    "W2": w(keys[next(ki)], (d_ff, d_model)), "b2": zeros(d_model)},
            "final_ln_g": ones(d_model), "final_ln_b": zeros(d_model),
        }
        params["layers"].append(layer)
    return params


# ----------------------------------- main ----------------------------------- #

if __name__ == "__main__":
    # Small shapes: B=2 sequences, N=2 chunks, chunk C=7 + lookahead R=1 frames, F_in=16.
    B, N, C, R, F_IN = 2, 2, 7, 1, 16
    D_MODEL, D_FF, NUM_HEADS, CONV_K, NUM_LAYERS = 64, 128, 4, 7, 2
    LOOKAHEAD = R  # ceil(1/6) == 1 -> consistent with the stride-1 frontend stand-in

    key = jax.random.PRNGKey(0)
    k_par, k_data = jax.random.split(key)
    params = init_params(k_par, F_IN, D_MODEL, D_FF, CONV_K, NUM_LAYERS)

    data = jax.random.normal(k_data, (B, N, C + R, F_IN), dtype=jnp.float32)
    # per-chunk valid frame counts (last chunk of sequence 1 is partially padded)
    chunk_lens = jnp.array([[C + R, C + R], [C + R, 5]], dtype=jnp.int32)
    sequence_mask = jnp.arange(C + R)[None, None, :] < chunk_lens[..., None]   # (B, N, C+R) bool

    fwd = jax.jit(functools.partial(encoder_forward,
                                    lookahead_size=LOOKAHEAD, num_heads=NUM_HEADS))
    (x_online, seq_mask_out), (y_offline, seq_mask_out2) = fwd(params, data, sequence_mask)

    jax.block_until_ready((x_online, y_offline, seq_mask_out, seq_mask_out2))
    assert x_online.shape == (B, N * (C + R - 1), D_MODEL)
    assert y_offline.shape == (B, N * (C + R - 1), D_MODEL)
    assert seq_mask_out.shape == (B, N * (C + R - 1))
    assert not bool(jnp.any(jnp.isnan(x_online))) and not bool(jnp.any(jnp.isnan(y_offline)))
    print("KERNEL_OK")
</pallas_src>

<mosaic_0001>
module attributes {stable_mosaic.version = 11 : i64} {
  func.func @kernel(%arg0: i32, %arg1: i32, %arg2: memref<8x64xbf16, #tpu.memory_space<vmem>>, %arg3: memref<1x64xf32, #tpu.memory_space<vmem>>, %arg4: memref<1x64xf32, #tpu.memory_space<vmem>>, %arg5: memref<64x128xbf16, #tpu.memory_space<vmem>>, %arg6: memref<1x128xf32, #tpu.memory_space<vmem>>, %arg7: memref<128x64xbf16, #tpu.memory_space<vmem>>, %arg8: memref<1x64xf32, #tpu.memory_space<vmem>>, %arg9: memref<8x64xbf16, #tpu.memory_space<vmem>>, %arg10: memref<8x64xbf16, #tpu.memory_space<vmem>>, %arg11: memref<8x64xf32, #tpu.memory_space<vmem>>) attributes {dimension_semantics = [#tpu.dimension_semantics<parallel>, #tpu.dimension_semantics<arbitrary>], iteration_bounds = array<i64: 4, 1>, scalar_prefetch = 0 : i64, scratch_operands = 2 : i64, tpu.core_type = #tpu.core_type<tc>, window_params = [{transform_indices = @transform_0, window_bounds = array<i64: 8, 64>}, {pipeline_mode = #tpu.pipeline_mode<synchronous>, transform_indices = @transform_1, window_bounds = array<i64: 1, 64>}, {pipeline_mode = #tpu.pipeline_mode<synchronous>, transform_indices = @transform_2, window_bounds = array<i64: 1, 64>}, {transform_indices = @transform_3, window_bounds = array<i64: 64, 128>}, {transform_indices = @transform_4, window_bounds = array<i64: 1, 128>}, {transform_indices = @transform_5, window_bounds = array<i64: 128, 64>}, {pipeline_mode = #tpu.pipeline_mode<synchronous>, transform_indices = @transform_6, window_bounds = array<i64: 1, 64>}, {transform_indices = @transform_7, window_bounds = array<i64: 8, 64>}]} {
    %c0_i32 = arith.constant 0 : i32
    %0 = arith.cmpi eq, %arg1, %c0_i32 : i32
    %1 = arith.extui %0 : i1 to i32
    %c0_i32_0 = arith.constant 0 : i32
    %2 = arith.cmpi ne, %1, %c0_i32_0 : i32
    scf.if %2 {
      %c0_16 = arith.constant 0 : index
      %c0_17 = arith.constant 0 : index
      %24 = vector.load %arg2[%c0_16, %c0_17] : memref<8x64xbf16, #tpu.memory_space<vmem>>, vector<8x64xbf16>
      %25 = arith.extf %24 : vector<8x64xbf16> to vector<8x64xf32>
      %cst_18 = arith.constant dense<0.000000e+00> : vector<8xf32>
      %26 = vector.multi_reduction <add>, %25, %cst_18 [1] : vector<8x64xf32> to vector<8xf32>
      %27 = vector.shape_cast %26 : vector<8xf32> to vector<8x1xf32>
      %cst_19 = arith.constant 6.400000e+01 : f32
      %28 = vector.broadcast %cst_19 : f32 to vector<8x1xf32>
      %29 = arith.divf %27, %28 : vector<8x1xf32>
      %30 = vector.broadcast %29 : vector<8x1xf32> to vector<8x64xf32>
      %31 = arith.subf %25, %30 : vector<8x64xf32>
      %32 = arith.mulf %31, %31 : vector<8x64xf32>
      %cst_20 = arith.constant dense<0.000000e+00> : vector<8xf32>
      %33 = vector.multi_reduction <add>, %32, %cst_20 [1] : vector<8x64xf32> to vector<8xf32>
      %34 = vector.shape_cast %33 : vector<8xf32> to vector<8x1xf32>
      %cst_21 = arith.constant 6.400000e+01 : f32
      %35 = vector.broadcast %cst_21 : f32 to vector<8x1xf32>
      %36 = arith.divf %34, %35 : vector<8x1xf32>
      %cst_22 = arith.constant 9.99999974E-6 : f32
      %37 = vector.broadcast %cst_22 : f32 to vector<8x1xf32>
      %38 = arith.addf %36, %37 : vector<8x1xf32>
      %39 = math.rsqrt %38 : vector<8x1xf32>
      %40 = vector.broadcast %39 : vector<8x1xf32> to vector<8x64xf32>
      %41 = arith.mulf %31, %40 : vector<8x64xf32>
      %c0_23 = arith.constant 0 : index
      %c0_24 = arith.constant 0 : index
      %42 = vector.load %arg3[%c0_23, %c0_24] : memref<1x64xf32, #tpu.memory_space<vmem>>, vector<1x64xf32>
      %43 = vector.broadcast %42 : vector<1x64xf32> to vector<8x64xf32>
      %44 = arith.mulf %41, %43 : vector<8x64xf32>
      %c0_25 = arith.constant 0 : index
      %c0_26 = arith.constant 0 : index
      %45 = vector.load %arg4[%c0_25, %c0_26] : memref<1x64xf32, #tpu.memory_space<vmem>>, vector<1x64xf32>
      %46 = vector.broadcast %45 : vector<1x64xf32> to vector<8x64xf32>
      %47 = arith.addf %44, %46 : vector<8x64xf32>
      %48 = arith.truncf %47 : vector<8x64xf32> to vector<8x64xbf16>
      %c0_27 = arith.constant 0 : index
      %c0_28 = arith.constant 0 : index
      %49 = vector.load %arg10[%c0_27, %c0_28] : memref<8x64xbf16, #tpu.memory_space<vmem>>, vector<8x64xbf16>
      tpu.vector_store %arg10[%c0_27, %c0_28], %48 {strides = array<i32>} : memref<8x64xbf16, #tpu.memory_space<vmem>>, vector<8x64xbf16>,
      %cst_29 = arith.constant 0.000000e+00 : f32
      %50 = vector.broadcast %cst_29 : f32 to vector<8x64xf32>
      %c0_30 = arith.constant 0 : index
      %c0_31 = arith.constant 0 : index
      %51 = vector.load %arg11[%c0_30, %c0_31] : memref<8x64xf32, #tpu.memory_space<vmem>>, vector<8x64xf32>
      tpu.vector_store %arg11[%c0_30, %c0_31], %50 {strides = array<i32>} : memref<8x64xf32, #tpu.memory_space<vmem>>, vector<8x64xf32>,
    } else {
    }
    %c0 = arith.constant 0 : index
    %c0_1 = arith.constant 0 : index
    %3 = vector.load %arg10[%c0, %c0_1] : memref<8x64xbf16, #tpu.memory_space<vmem>>, vector<8x64xbf16>
    %c0_2 = arith.constant 0 : index
    %c0_3 = arith.constant 0 : index
    %4 = vector.load %arg5[%c0_2, %c0_3] : memref<64x128xbf16, #tpu.memory_space<vmem>>, vector<64x128xbf16>
    %cst = arith.constant dense<0.000000e+00> : vector<8x128xf32>
    %5 = tpu.matmul %3, %4, %cst {dimension_numbers = #tpu.dot_dimension_numbers<[1], [0], [0], [1], [0, 0, 1, 1], [], []>} : vector<8x64xbf16>, vector<64x128xbf16>, vector<8x128xf32> -> vector<8x128xf32>
    %c0_4 = arith.constant 0 : index
    %c0_5 = arith.constant 0 : index
    %6 = vector.load %arg6[%c0_4, %c0_5] : memref<1x128xf32, #tpu.memory_space<vmem>>, vector<1x128xf32>
    %7 = vector.broadcast %6 : vector<1x128xf32> to vector<8x128xf32>
    %8 = arith.addf %5, %7 : vector<8x128xf32>
    %9 = arith.negf %8 : vector<8x128xf32>
    %10 = math.exp %9 : vector<8x128xf32>
    %cst_6 = arith.constant 1.000000e+00 : f32
    %11 = vector.broadcast %cst_6 : f32 to vector<8x128xf32>
    %12 = arith.addf %11, %10 : vector<8x128xf32>
    %13 = arith.divf %11, %12 : vector<8x128xf32>
    %14 = arith.mulf %8, %13 : vector<8x128xf32>
    %c0_7 = arith.constant 0 : index
    %c0_8 = arith.constant 0 : index
    %15 = vector.load %arg11[%c0_7, %c0_8] : memref<8x64xf32, #tpu.memory_space<vmem>>, vector<8x64xf32>
    %16 = arith.truncf %14 : vector<8x128xf32> to vector<8x128xbf16>
    %c0_9 = arith.constant 0 : index
    %c0_10 = arith.constant 0 : index
    %17 = vector.load %arg7[%c0_9, %c0_10] : memref<128x64xbf16, #tpu.memory_space<vmem>>, vector<128x64xbf16>
    %cst_11 = arith.constant dense<0.000000e+00> : vector<8x64xf32>
    %18 = tpu.matmul %16, %17, %cst_11 {dimension_numbers = #tpu.dot_dimension_numbers<[1], [0], [0], [1], [0, 0, 1, 1], [], []>} : vector<8x128xbf16>, vector<128x64xbf16>, vector<8x64xf32> -> vector<8x64xf32>
    %19 = arith.addf %15, %18 : vector<8x64xf32>
    %c0_12 = arith.constant 0 : index
    %c0_13 = arith.constant 0 : index
    %20 = vector.load %arg11[%c0_12, %c0_13] : memref<8x64xf32, #tpu.memory_space<vmem>>, vector<8x64xf32>
    tpu.vector_store %arg11[%c0_12, %c0_13], %19 {strides = array<i32>} : memref<8x64xf32, #tpu.memory_space<vmem>>, vector<8x64xf32>,
    %c0_i32_14 = arith.constant 0 : i32
    %21 = arith.cmpi eq, %arg1, %c0_i32_14 : i32
    %22 = arith.extui %21 : i1 to i32
    %c0_i32_15 = arith.constant 0 : i32
    %23 = arith.cmpi ne, %22, %c0_i32_15 : i32
    scf.if %23 {
      %c0_16 = arith.constant 0 : index
      %c0_17 = arith.constant 0 : index
      %24 = vector.load %arg11[%c0_16, %c0_17] : memref<8x64xf32, #tpu.memory_space<vmem>>, vector<8x64xf32>
      %c0_18 = arith.constant 0 : index
      %c0_19 = arith.constant 0 : index
      %25 = vector.load %arg8[%c0_18, %c0_19] : memref<1x64xf32, #tpu.memory_space<vmem>>, vector<1x64xf32>
      %26 = vector.broadcast %25 : vector<1x64xf32> to vector<8x64xf32>
      %27 = arith.addf %24, %26 : vector<8x64xf32>
      %cst_20 = arith.constant 5.000000e-01 : f32
      %28 = vector.broadcast %cst_20 : f32 to vector<8x64xf32>
      %29 = arith.mulf %27, %28 : vector<8x64xf32>
      %c0_21 = arith.constant 0 : index
      %c0_22 = arith.constant 0 : index
      %30 = vector.load %arg2[%c0_21, %c0_22] : memref<8x64xbf16, #tpu.memory_space<vmem>>, vector<8x64xbf16>
      %31 = arith.extf %30 : vector<8x64xbf16> to vector<8x64xf32>
      %32 = arith.addf %29, %31 : vector<8x64xf32>
      %33 = arith.truncf %32 : vector<8x64xf32> to vector<8x64xbf16>
      %c0_23 = arith.constant 0 : index
      %c0_24 = arith.constant 0 : index
      %34 = vector.load %arg9[%c0_23, %c0_24] : memref<8x64xbf16, #tpu.memory_space<vmem>>, vector<8x64xbf16>
      tpu.vector_store %arg9[%c0_23, %c0_24], %33 {strides = array<i32>} : memref<8x64xbf16, #tpu.memory_space<vmem>>, vector<8x64xbf16>,
    } else {
    }
    return
  }
  func.func @transform_0(%arg0: i32, %arg1: i32) -> (i32, i32) {
    %c0_i32 = arith.constant 0 : i32
    %c0_i32_0 = arith.constant 0 : i32
    return %arg0, %c0_i32 : i32, i32
  }
  func.func @transform_1(%arg0: i32, %arg1: i32) -> (i32, i32) {
    %c0_i32 = arith.constant 0 : i32
    %c0_i32_0 = arith.constant 0 : i32
    %c0_i32_1 = arith.constant 0 : i32
    return %c0_i32, %c0_i32_0 : i32, i32
  }
  func.func @transform_2(%arg0: i32, %arg1: i32) -> (i32, i32) {
    %c0_i32 = arith.constant 0 : i32
    %c0_i32_0 = arith.constant 0 : i32
    %c0_i32_1 = arith.constant 0 : i32
    return %c0_i32, %c0_i32_0 : i32, i32
  }
  func.func @transform_3(%arg0: i32, %arg1: i32) -> (i32, i32) {
    %c0_i32 = arith.constant 0 : i32
    %c0_i32_0 = arith.constant 0 : i32
    return %c0_i32, %arg1 : i32, i32
  }
  func.func @transform_4(%arg0: i32, %arg1: i32) -> (i32, i32) {
    %c0_i32 = arith.constant 0 : i32
    %c0_i32_0 = arith.constant 0 : i32
    return %c0_i32, %arg1 : i32, i32
  }
  func.func @transform_5(%arg0: i32, %arg1: i32) -> (i32, i32) {
    %c0_i32 = arith.constant 0 : i32
    %c0_i32_0 = arith.constant 0 : i32
    return %arg1, %c0_i32 : i32, i32
  }
  func.func @transform_6(%arg0: i32, %arg1: i32) -> (i32, i32) {
    %c0_i32 = arith.constant 0 : i32
    %c0_i32_0 = arith.constant 0 : i32
    %c0_i32_1 = arith.constant 0 : i32
    return %c0_i32, %c0_i32_0 : i32, i32
  }
  func.func @transform_7(%arg0: i32, %arg1: i32) -> (i32, i32) {
    %c0_i32 = arith.constant 0 : i32
    %c0_i32_0 = arith.constant 0 : i32
    return %arg0, %c0_i32 : i32, i32
  }
}

module attributes {stable_mosaic.version = 11 : i64} {
  func.func @kernel(%arg0: i32, %arg1: i32, %arg2: i32, %arg3: memref<8x16xbf16, #tpu.memory_space<vmem>>, %arg4: memref<16x64xbf16, #tpu.memory_space<vmem>>, %arg5: memref<1x64xf32, #tpu.memory_space<vmem>>, %arg6: memref<8x64xbf16, #tpu.memory_space<vmem>>, %arg7: memref<8x64xf32, #tpu.memory_space<vmem>>) attributes {dimension_semantics = [#tpu.dimension_semantics<parallel>, #tpu.dimension_semantics<parallel>, #tpu.dimension_semantics<arbitrary>], iteration_bounds = array<i64: 4, 1, 1>, scalar_prefetch = 0 : i64, scratch_operands = 1 : i64, tpu.core_type = #tpu.core_type<tc>, window_params = [{transform_indices = @transform_0, window_bounds = array<i64: 8, 16>}, {transform_indices = @transform_1, window_bounds = array<i64: 16, 64>}, {transform_indices = @transform_2, window_bounds = array<i64: 1, 64>}, {transform_indices = @transform_3, window_bounds = array<i64: 8, 64>}]} {
    %c0_i32 = arith.constant 0 : i32
    %0 = arith.cmpi eq, %arg2, %c0_i32 : i32
    %1 = arith.extui %0 : i1 to i32
    %c0_i32_0 = arith.constant 0 : i32
    %2 = arith.cmpi ne, %1, %c0_i32_0 : i32
    scf.if %2 {
      %cst_10 = arith.constant 0.000000e+00 : f32
      %12 = vector.broadcast %cst_10 : f32 to vector<8x64xf32>
      %c0_11 = arith.constant 0 : index
      %c0_12 = arith.constant 0 : index
      %13 = vector.load %arg7[%c0_11, %c0_12] : memref<8x64xf32, #tpu.memory_space<vmem>>, vector<8x64xf32>
      tpu.vector_store %arg7[%c0_11, %c0_12], %12 {strides = array<i32>} : memref<8x64xf32, #tpu.memory_space<vmem>>, vector<8x64xf32>,
    } else {
    }
    %c0 = arith.constant 0 : index
    %c0_1 = arith.constant 0 : index
    %3 = vector.load %arg7[%c0, %c0_1] : memref<8x64xf32, #tpu.memory_space<vmem>>, vector<8x64xf32>
    %c0_2 = arith.constant 0 : index
    %c0_3 = arith.constant 0 : index
    %4 = vector.load %arg3[%c0_2, %c0_3] : memref<8x16xbf16, #tpu.memory_space<vmem>>, vector<8x16xbf16>
    %c0_4 = arith.constant 0 : index
    %c0_5 = arith.constant 0 : index
    %5 = vector.load %arg4[%c0_4, %c0_5] : memref<16x64xbf16, #tpu.memory_space<vmem>>, vector<16x64xbf16>
    %cst = arith.constant dense<0.000000e+00> : vector<8x64xf32>
    %6 = tpu.matmul %4, %5, %cst {dimension_numbers = #tpu.dot_dimension_numbers<[1], [0], [0], [1], [0, 0, 1, 1], [], []>} : vector<8x16xbf16>, vector<16x64xbf16>, vector<8x64xf32> -> vector<8x64xf32>
    %7 = arith.addf %3, %6 : vector<8x64xf32>
    %c0_6 = arith.constant 0 : index
    %c0_7 = arith.constant 0 : index
    %8 = vector.load %arg7[%c0_6, %c0_7] : memref<8x64xf32, #tpu.memory_space<vmem>>, vector<8x64xf32>
    tpu.vector_store %arg7[%c0_6, %c0_7], %7 {strides = array<i32>} : memref<8x64xf32, #tpu.memory_space<vmem>>, vector<8x64xf32>,
    %c0_i32_8 = arith.constant 0 : i32
    %9 = arith.cmpi eq, %arg2, %c0_i32_8 : i32
    %10 = arith.extui %9 : i1 to i32
    %c0_i32_9 = arith.constant 0 : i32
    %11 = arith.cmpi ne, %10, %c0_i32_9 : i32
    scf.if %11 {
      %c0_10 = arith.constant 0 : index
      %c0_11 = arith.constant 0 : index
      %12 = vector.load %arg7[%c0_10, %c0_11] : memref<8x64xf32, #tpu.memory_space<vmem>>, vector<8x64xf32>
      %c0_12 = arith.constant 0 : index
      %c0_13 = arith.constant 0 : index
      %13 = vector.load %arg5[%c0_12, %c0_13] : memref<1x64xf32, #tpu.memory_space<vmem>>, vector<1x64xf32>
      %14 = vector.broadcast %13 : vector<1x64xf32> to vector<8x64xf32>
      %15 = arith.addf %12, %14 : vector<8x64xf32>
      %16 = arith.truncf %15 : vector<8x64xf32> to vector<8x64xbf16>
      %c0_14 = arith.constant 0 : index
      %c0_15 = arith.constant 0 : index
      %17 = vector.load %arg6[%c0_14, %c0_15] : memref<8x64xbf16, #tpu.memory_space<vmem>>, vector<8x64xbf16>
      tpu.vector_store %arg6[%c0_14, %c0_15], %16 {strides = array<i32>} : memref<8x64xbf16, #tpu.memory_space<vmem>>, vector<8x64xbf16>,
    } else {
    }
    return
  }
  func.func @transform_0(%arg0: i32, %arg1: i32, %arg2: i32) -> (i32, i32) {
    %c0_i32 = arith.constant 0 : i32
    return %arg0, %arg2 : i32, i32
  }
  func.func @transform_1(%arg0: i32, %arg1: i32, %arg2: i32) -> (i32, i32) {
    %c0_i32 = arith.constant 0 : i32
    return %arg2, %arg1 : i32, i32
  }
  func.func @transform_2(%arg0: i32, %arg1: i32, %arg2: i32) -> (i32, i32) {
    %c0_i32 = arith.constant 0 : i32
    %c0_i32_0 = arith.constant 0 : i32
    return %c0_i32, %arg1 : i32, i32
  }
  func.func @transform_3(%arg0: i32, %arg1: i32, %arg2: i32) -> (i32, i32) {
    %c0_i32 = arith.constant 0 : i32
    return %arg0, %arg1 : i32, i32
  }
}

module attributes {stable_mosaic.version = 11 : i64} {
  func.func @kernel(%arg0: i32, %arg1: memref<8x64xbf16, #tpu.memory_space<vmem>>, %arg2: memref<1x64xf32, #tpu.memory_space<vmem>>, %arg3: memref<1x64xf32, #tpu.memory_space<vmem>>, %arg4: memref<64x192xbf16, #tpu.memory_space<vmem>>, %arg5: memref<1x192xf32, #tpu.memory_space<vmem>>, %arg6: memref<8x192xbf16, #tpu.memory_space<vmem>>) attributes {dimension_semantics = [#tpu.dimension_semantics<parallel>], iteration_bounds = array<i64: 4>, scalar_prefetch = 0 : i64, scratch_operands = 0 : i64, tpu.core_type = #tpu.core_type<tc>, window_params = [{transform_indices = @transform_0, window_bounds = array<i64: 8, 64>}, {pipeline_mode = #tpu.pipeline_mode<synchronous>, transform_indices = @transform_1, window_bounds = array<i64: 1, 64>}, {pipeline_mode = #tpu.pipeline_mode<synchronous>, transform_indices = @transform_2, window_bounds = array<i64: 1, 64>}, {pipeline_mode = #tpu.pipeline_mode<synchronous>, transform_indices = @transform_3, window_bounds = array<i64: 64, 192>}, {pipeline_mode = #tpu.pipeline_mode<synchronous>, transform_indices = @transform_4, window_bounds = array<i64: 1, 192>}, {transform_indices = @transform_5, window_bounds = array<i64: 8, 192>}]} {
    %c0 = arith.constant 0 : index
    %c0_0 = arith.constant 0 : index
    %0 = vector.load %arg1[%c0, %c0_0] : memref<8x64xbf16, #tpu.memory_space<vmem>>, vector<8x64xbf16>
    %1 = arith.extf %0 : vector<8x64xbf16> to vector<8x64xf32>
    %cst = arith.constant dense<0.000000e+00> : vector<8xf32>
    %2 = vector.multi_reduction <add>, %1, %cst [1] : vector<8x64xf32> to vector<8xf32>
    %3 = vector.shape_cast %2 : vector<8xf32> to vector<8x1xf32>
    %cst_1 = arith.constant 6.400000e+01 : f32
    %4 = vector.broadcast %cst_1 : f32 to vector<8x1xf32>
    %5 = arith.divf %3, %4 : vector<8x1xf32>
    %6 = vector.broadcast %5 : vector<8x1xf32> to vector<8x64xf32>
    %7 = arith.subf %1, %6 : vector<8x64xf32>
    %8 = arith.mulf %7, %7 : vector<8x64xf32>
    %cst_2 = arith.constant dense<0.000000e+00> : vector<8xf32>
    %9 = vector.multi_reduction <add>, %8, %cst_2 [1] : vector<8x64xf32> to vector<8xf32>
    %10 = vector.shape_cast %9 : vector<8xf32> to vector<8x1xf32>
    %cst_3 = arith.constant 6.400000e+01 : f32
    %11 = vector.broadcast %cst_3 : f32 to vector<8x1xf32>
    %12 = arith.divf %10, %11 : vector<8x1xf32>
    %cst_4 = arith.constant 9.99999974E-6 : f32
    %13 = vector.broadcast %cst_4 : f32 to vector<8x1xf32>
    %14 = arith.addf %12, %13 : vector<8x1xf32>
    %15 = math.rsqrt %14 : vector<8x1xf32>
    %16 = vector.broadcast %15 : vector<8x1xf32> to vector<8x64xf32>
    %17 = arith.mulf %7, %16 : vector<8x64xf32>
    %c0_5 = arith.constant 0 : index
    %c0_6 = arith.constant 0 : index
    %18 = vector.load %arg2[%c0_5, %c0_6] : memref<1x64xf32, #tpu.memory_space<vmem>>, vector<1x64xf32>
    %19 = vector.broadcast %18 : vector<1x64xf32> to vector<8x64xf32>
    %20 = arith.mulf %17, %19 : vector<8x64xf32>
    %c0_7 = arith.constant 0 : index
    %c0_8 = arith.constant 0 : index
    %21 = vector.load %arg3[%c0_7, %c0_8] : memref<1x64xf32, #tpu.memory_space<vmem>>, vector<1x64xf32>
    %22 = vector.broadcast %21 : vector<1x64xf32> to vector<8x64xf32>
    %23 = arith.addf %20, %22 : vector<8x64xf32>
    %24 = arith.truncf %23 : vector<8x64xf32> to vector<8x64xbf16>
    %c0_9 = arith.constant 0 : index
    %c0_10 = arith.constant 0 : index
    %25 = vector.load %arg4[%c0_9, %c0_10] : memref<64x192xbf16, #tpu.memory_space<vmem>>, vector<64x192xbf16>
    %cst_11 = arith.constant dense<0.000000e+00> : vector<8x192xf32>
    %26 = tpu.matmul %24, %25, %cst_11 {dimension_numbers = #tpu.dot_dimension_numbers<[1], [0], [0], [1], [0, 0, 1, 1], [], []>} : vector<8x64xbf16>, vector<64x192xbf16>, vector<8x192xf32> -> vector<8x192xf32>
    %c0_12 = arith.constant 0 : index
    %c0_13 = arith.constant 0 : index
    %27 = vector.load %arg5[%c0_12, %c0_13] : memref<1x192xf32, #tpu.memory_space<vmem>>, vector<1x192xf32>
    %28 = vector.broadcast %27 : vector<1x192xf32> to vector<8x192xf32>
    %29 = arith.addf %26, %28 : vector<8x192xf32>
    %30 = arith.truncf %29 : vector<8x192xf32> to vector<8x192xbf16>
    %c0_14 = arith.constant 0 : index
    %c0_15 = arith.constant 0 : index
    %31 = vector.load %arg6[%c0_14, %c0_15] : memref<8x192xbf16, #tpu.memory_space<vmem>>, vector<8x192xbf16>
    tpu.vector_store %arg6[%c0_14, %c0_15], %30 {strides = array<i32>} : memref<8x192xbf16, #tpu.memory_space<vmem>>, vector<8x192xbf16>,
    return
  }
  func.func @transform_0(%arg0: i32) -> (i32, i32) {
    %c0_i32 = arith.constant 0 : i32
    %c0_i32_0 = arith.constant 0 : i32
    return %arg0, %c0_i32 : i32, i32
  }
  func.func @transform_1(%arg0: i32) -> (i32, i32) {
    %c0_i32 = arith.constant 0 : i32
    %c0_i32_0 = arith.constant 0 : i32
    %c0_i32_1 = arith.constant 0 : i32
    return %c0_i32, %c0_i32_0 : i32, i32
  }
  func.func @transform_2(%arg0: i32) -> (i32, i32) {
    %c0_i32 = arith.constant 0 : i32
    %c0_i32_0 = arith.constant 0 : i32
    %c0_i32_1 = arith.constant 0 : i32
    return %c0_i32, %c0_i32_0 : i32, i32
  }
  func.func @transform_3(%arg0: i32) -> (i32, i32) {
    %c0_i32 = arith.constant 0 : i32
    %c0_i32_0 = arith.constant 0 : i32
    %c0_i32_1 = arith.constant 0 : i32
    return %c0_i32, %c0_i32_0 : i32, i32
  }
  func.func @transform_4(%arg0: i32) -> (i32, i32) {
    %c0_i32 = arith.constant 0 : i32
    %c0_i32_0 = arith.constant 0 : i32
    %c0_i32_1 = arith.constant 0 : i32
    return %c0_i32, %c0_i32_0 : i32, i32
  }
  func.func @transform_5(%arg0: i32) -> (i32, i32) {
    %c0_i32 = arith.constant 0 : i32
    %c0_i32_0 = arith.constant 0 : i32
    return %arg0, %c0_i32 : i32, i32
  }
}

module attributes {stable_mosaic.version = 11 : i64} {
  func.func @_attn_kernel(%arg0: i32, %arg1: i32, %arg2: memref<1x16x192xbf16, #tpu.memory_space<vmem>>, %arg3: memref<1x1x16xf32, #tpu.memory_space<vmem>>, %arg4: memref<16x1xf32, #tpu.memory_space<vmem>>, %arg5: memref<1x16xf32, #tpu.memory_space<vmem>>, %arg6: memref<1x16xf32, #tpu.memory_space<vmem>>, %arg7: memref<64x64xbf16, #tpu.memory_space<vmem>>, %arg8: memref<1x64xf32, #tpu.memory_space<vmem>>, %arg9: memref<1x8x64xbf16, #tpu.memory_space<vmem>>, %arg10: memref<1x8x64xbf16, #tpu.memory_space<vmem>>, %arg11: memref<1x8x64xbf16, #tpu.memory_space<vmem>>) attributes {dimension_semantics = [#tpu.dimension_semantics<parallel>, #tpu.dimension_semantics<parallel>], iteration_bounds = array<i64: 2, 2>, scalar_prefetch = 0 : i64, scratch_operands = 0 : i64, tpu.core_type = #tpu.core_type<tc>, window_params = [{transform_indices = @transform_0, window_bounds = array<i64: 1, 16, 192>}, {transform_indices = @transform_1, window_bounds = array<i64: 1, 1, 16>}, {pipeline_mode = #tpu.pipeline_mode<synchronous>, transform_indices = @transform_2, window_bounds = array<i64: 16, 1>}, {pipeline_mode = #tpu.pipeline_mode<synchronous>, transform_indices = @transform_3, window_bounds = array<i64: 1, 16>}, {pipeline_mode = #tpu.pipeline_mode<synchronous>, transform_indices = @transform_4, window_bounds = array<i64: 1, 16>}, {pipeline_mode = #tpu.pipeline_mode<synchronous>, transform_indices = @transform_5, window_bounds = array<i64: 64, 64>}, {pipeline_mode = #tpu.pipeline_mode<synchronous>, transform_indices = @transform_6, window_bounds = array<i64: 1, 64>}, {transform_indices = @transform_7, window_bounds = array<i64: 1, 8, 64>}, {transform_indices = @transform_8, window_bounds = array<i64: 1, 8, 64>}, {transform_indices = @transform_9, window_bounds = array<i64: 1, 8, 64>}]} {
    %c8_i32 = arith.constant 8 : i32
    %0 = arith.muli %arg1, %c8_i32 : i32
    %1 = tpu.assume_multiple %0, 8 : i32
    %c0 = arith.constant 0 : index
    %c0_0 = arith.constant 0 : index
    %c0_1 = arith.constant 0 : index
    %2 = vector.load %arg2[%c0, %c0_0, %c0_1] : memref<1x16x192xbf16, #tpu.memory_space<vmem>>, vector<1x16x192xbf16>
    %3 = vector.shape_cast %2 : vector<1x16x192xbf16> to vector<16x192xbf16>
    %4 = vector.extract_strided_slice %3 {offsets = [0, 64], sizes = [16, 64], strides = [1, 1]} : vector<16x192xbf16> to vector<16x64xbf16>
    %5 = vector.shape_cast %4 : vector<16x64xbf16> to vector<16x4x16xbf16>
    %6 = vector.extract_strided_slice %3 {offsets = [0, 128], sizes = [16, 64], strides = [1, 1]} : vector<16x192xbf16> to vector<16x64xbf16>
    %7 = vector.shape_cast %6 : vector<16x64xbf16> to vector<16x4x16xbf16>
    %c0_i32 = arith.constant 0 : i32
    %c0_i32_2 = arith.constant 0 : i32
    %c0_i32_3 = arith.constant 0 : i32
    %8 = tpu.memref_slice %arg2[%c0_i32, %c0_i32_2, %c0_i32_3] : memref<1x16x192xbf16, #tpu.memory_space<vmem>> -> memref<1x16x192xbf16, #tpu.memory_space<vmem>>
    %9 = tpu.memref_squeeze %8 : memref<1x16x192xbf16, #tpu.memory_space<vmem>> -> memref<16x192xbf16, #tpu.memory_space<vmem>>
    %10 = arith.index_cast %1 : i32 to index
    %c0_4 = arith.constant 0 : index
    %11 = vector.load %9[%10, %c0_4] : memref<16x192xbf16, #tpu.memory_space<vmem>>, vector<8x192xbf16>
    %12 = vector.extract_strided_slice %11 {offsets = [0, 0], sizes = [8, 64], strides = [1, 1]} : vector<8x192xbf16> to vector<8x64xbf16>
    %13 = vector.shape_cast %12 : vector<8x64xbf16> to vector<8x4x16xbf16>
    %cst = arith.constant dense<0.000000e+00> : vector<4x8x16xf32>
    %14 = tpu.matmul %13, %5, %cst {dimension_numbers = #tpu.dot_dimension_numbers<[2], [2], [0], [0], [0, 1, 0, 0, 1, 0], [1], [1]>} : vector<8x4x16xbf16>, vector<16x4x16xbf16>, vector<4x8x16xf32> -> vector<4x8x16xf32>
    %cst_5 = arith.constant 2.500000e-01 : f32
    %15 = vector.broadcast %cst_5 : f32 to vector<4x8x16xf32>
    %16 = arith.mulf %14, %15 : vector<4x8x16xf32>
    %c0_6 = arith.constant 0 : index
    %c0_7 = arith.constant 0 : index
    %c0_8 = arith.constant 0 : index
    %17 = vector.load %arg3[%c0_6, %c0_7, %c0_8] : memref<1x1x16xf32, #tpu.memory_space<vmem>>, vector<1x1x16xf32>
    %18 = vector.shape_cast %17 : vector<1x1x16xf32> to vector<1x16xf32>
    %19 = arith.index_cast %1 : i32 to index
    %c0_9 = arith.constant 0 : index
    %20 = vector.load %arg4[%19, %c0_9] : memref<16x1xf32, #tpu.memory_space<vmem>>, vector<8x1xf32>
    %c0_10 = arith.constant 0 : index
    %c0_11 = arith.constant 0 : index
    %21 = vector.load %arg5[%c0_10, %c0_11] : memref<1x16xf32, #tpu.memory_space<vmem>>, vector<1x16xf32>
    %c0_12 = arith.constant 0 : index
    %c0_13 = arith.constant 0 : index
    %22 = vector.load %arg6[%c0_12, %c0_13] : memref<1x16xf32, #tpu.memory_space<vmem>>, vector<1x16xf32>
    %23 = vector.broadcast %21 : vector<1x16xf32> to vector<8x16xf32>
    %24 = vector.broadcast %20 : vector<8x1xf32> to vector<8x16xf32>
    %25 = arith.cmpf oeq, %23, %24 : vector<8x16xf32>
    %cst_14 = arith.constant 1.000000e+00 : f32
    %26 = vector.broadcast %cst_14 : f32 to vector<8x1xf32>
    %27 = arith.subf %20, %26 : vector<8x1xf32>
    %28 = vector.broadcast %21 : vector<1x16xf32> to vector<8x16xf32>
    %29 = vector.broadcast %27 : vector<8x1xf32> to vector<8x16xf32>
    %30 = arith.cmpf oeq, %28, %29 : vector<8x16xf32>
    %cst_15 = arith.constant 5.000000e-01 : f32
    %31 = vector.broadcast %cst_15 : f32 to vector<1x16xf32>
    %32 = arith.cmpf ogt, %22, %31 : vector<1x16xf32>
    %33 = vector.broadcast %32 : vector<1x16xi1> to vector<8x16xi1>
    %34 = arith.andi %30, %33 : vector<8x16xi1>
    %35 = arith.ori %25, %34 : vector<8x16xi1>
    %36 = arith.extui %35 : vector<8x16xi1> to vector<8x16xi32>
    %37 = arith.sitofp %36 : vector<8x16xi32> to vector<8x16xf32>
    %cst_16 = arith.constant 1.000000e+00 : f32
    %38 = vector.broadcast %cst_16 : f32 to vector<1x16xf32>
    %39 = arith.subf %38, %18 : vector<1x16xf32>
    %cst_17 = arith.constant -1.000000e+09 : f32
    %40 = vector.broadcast %cst_17 : f32 to vector<1x16xf32>
    %41 = arith.mulf %39, %40 : vector<1x16xf32>
    %42 = vector.broadcast %18 : vector<1x16xf32> to vector<8x16xf32>
    %43 = arith.mulf %42, %37 : vector<8x16xf32>
    %cst_18 = arith.constant 1.000000e+00 : f32
    %44 = vector.broadcast %cst_18 : f32 to vector<8x16xf32>
    %45 = arith.subf %44, %43 : vector<8x16xf32>
    %cst_19 = arith.constant -1.000000e+09 : f32
    %46 = vector.broadcast %cst_19 : f32 to vector<8x16xf32>
    %47 = arith.mulf %45, %46 : vector<8x16xf32>
    %48 = vector.shape_cast %47 : vector<8x16xf32> to vector<1x8x16xf32>
    %49 = vector.broadcast %48 : vector<1x8x16xf32> to vector<4x8x16xf32>
    %50 = arith.addf %16, %49 : vector<4x8x16xf32>
    %cst_20 = arith.constant dense<0xFF800000> : vector<4x8xf32>
    %51 = vector.multi_reduction <maximumf>, %50, %cst_20 [2] : vector<4x8x16xf32> to vector<4x8xf32>
    %52 = vector.shape_cast %51 : vector<4x8xf32> to vector<4x8x1xf32>
    %53 = vector.broadcast %52 : vector<4x8x1xf32> to vector<4x8x16xf32>
    %54 = arith.subf %50, %53 : vector<4x8x16xf32>
    %55 = math.exp %54 : vector<4x8x16xf32>
    %cst_21 = arith.constant dense<0.000000e+00> : vector<4x8xf32>
    %56 = vector.multi_reduction <add>, %55, %cst_21 [2] : vector<4x8x16xf32> to vector<4x8xf32>
    %57 = vector.shape_cast %56 : vector<4x8xf32> to vector<4x8x1xf32>
    %58 = tpu.reciprocal %57 {approx = true} : vector<4x8x1xf32> -> vector<4x8x1xf32>
    %59 = vector.broadcast %58 : vector<4x8x1xf32> to vector<4x8x16xf32>
    %60 = arith.mulf %55, %59 : vector<4x8x16xf32>
    %61 = vector.shape_cast %41 : vector<1x16xf32> to vector<1x1x16xf32>
    %62 = vector.broadcast %61 : vector<1x1x16xf32> to vector<4x8x16xf32>
    %63 = arith.addf %16, %62 : vector<4x8x16xf32>
    %cst_22 = arith.constant dense<0xFF800000> : vector<4x8xf32>
    %64 = vector.multi_reduction <maximumf>, %63, %cst_22 [2] : vector<4x8x16xf32> to vector<4x8xf32>
    %65 = vector.shape_cast %64 : vector<4x8xf32> to vector<4x8x1xf32>
    %66 = vector.broadcast %65 : vector<4x8x1xf32> to vector<4x8x16xf32>
    %67 = arith.subf %63, %66 : vector<4x8x16xf32>
    %68 = math.exp %67 : vector<4x8x16xf32>
    %cst_23 = arith.constant dense<0.000000e+00> : vector<4x8xf32>
    %69 = vector.multi_reduction <add>, %68, %cst_23 [2] : vector<4x8x16xf32> to vector<4x8xf32>
    %70 = vector.shape_cast %69 : vector<4x8xf32> to vector<4x8x1xf32>
    %71 = tpu.reciprocal %70 {approx = true} : vector<4x8x1xf32> -> vector<4x8x1xf32>
    %72 = vector.broadcast %71 : vector<4x8x1xf32> to vector<4x8x16xf32>
    %73 = arith.mulf %68, %72 : vector<4x8x16xf32>
    %c0_24 = arith.constant 0 : index
    %c0_25 = arith.constant 0 : index
    %c0_26 = arith.constant 0 : index
    %74 = vector.load %arg9[%c0_24, %c0_25, %c0_26] : memref<1x8x64xbf16, #tpu.memory_space<vmem>>, vector<1x8x64xbf16>
    %75 = vector.shape_cast %74 : vector<1x8x64xbf16> to vector<8x64xbf16>
    %76 = arith.extf %75 : vector<8x64xbf16> to vector<8x64xf32>
    %c0_27 = arith.constant 0 : index
    %c0_28 = arith.constant 0 : index
    %77 = vector.load %arg7[%c0_27, %c0_28] : memref<64x64xbf16, #tpu.memory_space<vmem>>, vector<64x64xbf16>
    %c0_29 = arith.constant 0 : index
    %c0_30 = arith.constant 0 : index
    %78 = vector.load %arg8[%c0_29, %c0_30] : memref<1x64xf32, #tpu.memory_space<vmem>>, vector<1x64xf32>
    %79 = arith.truncf %60 : vector<4x8x16xf32> to vector<4x8x16xbf16>
    %cst_31 = arith.constant dense<0.000000e+00> : vector<4x8x16xf32>
    %80 = tpu.matmul %79, %7, %cst_31 {dimension_numbers = #tpu.dot_dimension_numbers<[2], [0], [1], [2], [0, 0, 0, 1, 1, 2], [0], [1]>} : vector<4x8x16xbf16>, vector<16x4x16xbf16>, vector<4x8x16xf32> -> vector<4x8x16xf32>
    %81 = arith.truncf %80 : vector<4x8x16xf32> to vector<4x8x16xbf16>
    %82 = tpu.transpose %81, [1, 0, 2] : vector<4x8x16xbf16> -> vector<8x4x16xbf16>
    %83 = vector.shape_cast %82 : vector<8x4x16xbf16> to vector<8x64xbf16>
    %cst_32 = arith.constant dense<0.000000e+00> : vector<8x64xf32>
    %84 = tpu.matmul %83, %77, %cst_32 {dimension_numbers = #tpu.dot_dimension_numbers<[1], [0], [0], [1], [0, 0, 1, 1], [], []>} : vector<8x64xbf16>, vector<64x64xbf16>, vector<8x64xf32> -> vector<8x64xf32>
    %85 = vector.broadcast %78 : vector<1x64xf32> to vector<8x64xf32>
    %86 = arith.addf %84, %85 : vector<8x64xf32>
    %87 = arith.addf %86, %76 : vector<8x64xf32>
    %88 = arith.truncf %87 : vector<8x64xf32> to vector<8x64xbf16>
    %c0_33 = arith.constant 0 : index
    %c0_34 = arith.constant 0 : index
    %c0_35 = arith.constant 0 : index
    %89 = vector.load %arg10[%c0_33, %c0_34, %c0_35] : memref<1x8x64xbf16, #tpu.memory_space<vmem>>, vector<1x8x64xbf16>
    %90 = vector.shape_cast %89 : vector<1x8x64xbf16> to vector<8x64xbf16>
    %91 = vector.shape_cast %88 : vector<8x64xbf16> to vector<1x8x64xbf16>
    tpu.vector_store %arg10[%c0_33, %c0_34, %c0_35], %91 {strides = array<i32>} : memref<1x8x64xbf16, #tpu.memory_space<vmem>>, vector<1x8x64xbf16>,
    %92 = arith.truncf %73 : vector<4x8x16xf32> to vector<4x8x16xbf16>
    %cst_36 = arith.constant dense<0.000000e+00> : vector<4x8x16xf32>
    %93 = tpu.matmul %92, %7, %cst_36 {dimension_numbers = #tpu.dot_dimension_numbers<[2], [0], [1], [2], [0, 0, 0, 1, 1, 2], [0], [1]>} : vector<4x8x16xbf16>, vector<16x4x16xbf16>, vector<4x8x16xf32> -> vector<4x8x16xf32>
    %94 = arith.truncf %93 : vector<4x8x16xf32> to vector<4x8x16xbf16>
    %95 = tpu.transpose %94, [1, 0, 2] : vector<4x8x16xbf16> -> vector<8x4x16xbf16>
    %96 = vector.shape_cast %95 : vector<8x4x16xbf16> to vector<8x64xbf16>
    %cst_37 = arith.constant dense<0.000000e+00> : vector<8x64xf32>
    %97 = tpu.matmul %96, %77, %cst_37 {dimension_numbers = #tpu.dot_dimension_numbers<[1], [0], [0], [1], [0, 0, 1, 1], [], []>} : vector<8x64xbf16>, vector<64x64xbf16>, vector<8x64xf32> -> vector<8x64xf32>
    %98 = vector.broadcast %78 : vector<1x64xf32> to vector<8x64xf32>
    %99 = arith.addf %97, %98 : vector<8x64xf32>
    %100 = arith.addf %99, %76 : vector<8x64xf32>
    %101 = arith.truncf %100 : vector<8x64xf32> to vector<8x64xbf16>
    %c0_38 = arith.constant 0 : index
    %c0_39 = arith.constant 0 : index
    %c0_40 = arith.constant 0 : index
    %102 = vector.load %arg11[%c0_38, %c0_39, %c0_40] : memref<1x8x64xbf16, #tpu.memory_space<vmem>>, vector<1x8x64xbf16>
    %103 = vector.shape_cast %102 : vector<1x8x64xbf16> to vector<8x64xbf16>
    %104 = vector.shape_cast %101 : vector<8x64xbf16> to vector<1x8x64xbf16>
    tpu.vector_store %arg11[%c0_38, %c0_39, %c0_40], %104 {strides = array<i32>} : memref<1x8x64xbf16, #tpu.memory_space<vmem>>, vector<1x8x64xbf16>,
    return
  }
  func.func @transform_0(%arg0: i32, %arg1: i32) -> (i32, i32, i32) {
    %c0_i32 = arith.constant 0 : i32
    %c0_i32_0 = arith.constant 0 : i32
    %c0_i32_1 = arith.constant 0 : i32
    return %arg0, %c0_i32, %c0_i32_0 : i32, i32, i32
  }
  func.func @transform_1(%arg0: i32, %arg1: i32) -> (i32, i32, i32) {
    %c0_i32 = arith.constant 0 : i32
    %c0_i32_0 = arith.constant 0 : i32
    %c0_i32_1 = arith.constant 0 : i32
    return %arg0, %c0_i32, %c0_i32_0 : i32, i32, i32
  }
  func.func @transform_2(%arg0: i32, %arg1: i32) -> (i32, i32) {
    %c0_i32 = arith.constant 0 : i32
    %c0_i32_0 = arith.constant 0 : i32
    %c0_i32_1 = arith.constant 0 : i32
    return %c0_i32, %c0_i32_0 : i32, i32
  }
  func.func @transform_3(%arg0: i32, %arg1: i32) -> (i32, i32) {
    %c0_i32 = arith.constant 0 : i32
    %c0_i32_0 = arith.constant 0 : i32
    %c0_i32_1 = arith.constant 0 : i32
    return %c0_i32, %c0_i32_0 : i32, i32
  }
  func.func @transform_4(%arg0: i32, %arg1: i32) -> (i32, i32) {
    %c0_i32 = arith.constant 0 : i32
    %c0_i32_0 = arith.constant 0 : i32
    %c0_i32_1 = arith.constant 0 : i32
    return %c0_i32, %c0_i32_0 : i32, i32
  }
  func.func @transform_5(%arg0: i32, %arg1: i32) -> (i32, i32) {
    %c0_i32 = arith.constant 0 : i32
    %c0_i32_0 = arith.constant 0 : i32
    %c0_i32_1 = arith.constant 0 : i32
    return %c0_i32, %c0_i32_0 : i32, i32
  }
  func.func @transform_6(%arg0: i32, %arg1: i32) -> (i32, i32) {
    %c0_i32 = arith.constant 0 : i32
    %c0_i32_0 = arith.constant 0 : i32
    %c0_i32_1 = arith.constant 0 : i32
    return %c0_i32, %c0_i32_0 : i32, i32
  }
  func.func @transform_7(%arg0: i32, %arg1: i32) -> (i32, i32, i32) {
    %c0_i32 = arith.constant 0 : i32
    %c0_i32_0 = arith.constant 0 : i32
    return %arg0, %arg1, %c0_i32 : i32, i32, i32
  }
  func.func @transform_8(%arg0: i32, %arg1: i32) -> (i32, i32, i32) {
    %c0_i32 = arith.constant 0 : i32
    %c0_i32_0 = arith.constant 0 : i32
    return %arg0, %arg1, %c0_i32 : i32, i32, i32
  }
  func.func @transform_9(%arg0: i32, %arg1: i32) -> (i32, i32, i32) {
    %c0_i32 = arith.constant 0 : i32
    %c0_i32_0 = arith.constant 0 : i32
    return %arg0, %arg1, %c0_i32 : i32, i32, i32
  }
}

module attributes {stable_mosaic.version = 11 : i64} {
  func.func @kernel(%arg0: i32, %arg1: memref<8x64xbf16, #tpu.memory_space<vmem>>, %arg2: memref<8x1xf32, #tpu.memory_space<vmem>>, %arg3: memref<1x64xf32, #tpu.memory_space<vmem>>, %arg4: memref<1x64xf32, #tpu.memory_space<vmem>>, %arg5: memref<64x128xbf16, #tpu.memory_space<vmem>>, %arg6: memref<1x128xf32, #tpu.memory_space<vmem>>, %arg7: memref<8x64xbf16, #tpu.memory_space<vmem>>) attributes {dimension_semantics = [#tpu.dimension_semantics<parallel>], iteration_bounds = array<i64: 4>, scalar_prefetch = 0 : i64, scratch_operands = 0 : i64, tpu.core_type = #tpu.core_type<tc>, window_params = [{transform_indices = @transform_0, window_bounds = array<i64: 8, 64>}, {transform_indices = @transform_1, window_bounds = array<i64: 8, 1>}, {pipeline_mode = #tpu.pipeline_mode<synchronous>, transform_indices = @transform_2, window_bounds = array<i64: 1, 64>}, {pipeline_mode = #tpu.pipeline_mode<synchronous>, transform_indices = @transform_3, window_bounds = array<i64: 1, 64>}, {pipeline_mode = #tpu.pipeline_mode<synchronous>, transform_indices = @transform_4, window_bounds = array<i64: 64, 128>}, {pipeline_mode = #tpu.pipeline_mode<synchronous>, transform_indices = @transform_5, window_bounds = array<i64: 1, 128>}, {transform_indices = @transform_6, window_bounds = array<i64: 8, 64>}]} {
    %c0 = arith.constant 0 : index
    %c0_0 = arith.constant 0 : index
    %0 = vector.load %arg1[%c0, %c0_0] : memref<8x64xbf16, #tpu.memory_space<vmem>>, vector<8x64xbf16>
    %1 = arith.extf %0 : vector<8x64xbf16> to vector<8x64xf32>
    %c0_1 = arith.constant 0 : index
    %c0_2 = arith.constant 0 : index
    %2 = vector.load %arg2[%c0_1, %c0_2] : memref<8x1xf32, #tpu.memory_space<vmem>>, vector<8x1xf32>
    %3 = vector.broadcast %2 : vector<8x1xf32> to vector<8x64xf32>
    %4 = arith.mulf %1, %3 : vector<8x64xf32>
    %cst = arith.constant dense<0.000000e+00> : vector<8xf32>
    %5 = vector.multi_reduction <add>, %4, %cst [1] : vector<8x64xf32> to vector<8xf32>
    %6 = vector.shape_cast %5 : vector<8xf32> to vector<8x1xf32>
    %cst_3 = arith.constant 6.400000e+01 : f32
    %7 = vector.broadcast %cst_3 : f32 to vector<8x1xf32>
    %8 = arith.divf %6, %7 : vector<8x1xf32>
    %9 = vector.broadcast %8 : vector<8x1xf32> to vector<8x64xf32>
    %10 = arith.subf %4, %9 : vector<8x64xf32>
    %11 = arith.mulf %10, %10 : vector<8x64xf32>
    %cst_4 = arith.constant dense<0.000000e+00> : vector<8xf32>
    %12 = vector.multi_reduction <add>, %11, %cst_4 [1] : vector<8x64xf32> to vector<8xf32>
    %13 = vector.shape_cast %12 : vector<8xf32> to vector<8x1xf32>
    %cst_5 = arith.constant 6.400000e+01 : f32
    %14 = vector.broadcast %cst_5 : f32 to vector<8x1xf32>
    %15 = arith.divf %13, %14 : vector<8x1xf32>
    %cst_6 = arith.constant 9.99999974E-6 : f32
    %16 = vector.broadcast %cst_6 : f32 to vector<8x1xf32>
    %17 = arith.addf %15, %16 : vector<8x1xf32>
    %18 = math.rsqrt %17 : vector<8x1xf32>
    %19 = vector.broadcast %18 : vector<8x1xf32> to vector<8x64xf32>
    %20 = arith.mulf %10, %19 : vector<8x64xf32>
    %c0_7 = arith.constant 0 : index
    %c0_8 = arith.constant 0 : index
    %21 = vector.load %arg3[%c0_7, %c0_8] : memref<1x64xf32, #tpu.memory_space<vmem>>, vector<1x64xf32>
    %22 = vector.broadcast %21 : vector<1x64xf32> to vector<8x64xf32>
    %23 = arith.mulf %20, %22 : vector<8x64xf32>
    %c0_9 = arith.constant 0 : index
    %c0_10 = arith.constant 0 : index
    %24 = vector.load %arg4[%c0_9, %c0_10] : memref<1x64xf32, #tpu.memory_space<vmem>>, vector<1x64xf32>
    %25 = vector.broadcast %24 : vector<1x64xf32> to vector<8x64xf32>
    %26 = arith.addf %23, %25 : vector<8x64xf32>
    %27 = arith.truncf %26 : vector<8x64xf32> to vector<8x64xbf16>
    %c0_11 = arith.constant 0 : index
    %c0_12 = arith.constant 0 : index
    %28 = vector.load %arg5[%c0_11, %c0_12] : memref<64x128xbf16, #tpu.memory_space<vmem>>, vector<64x128xbf16>
    %cst_13 = arith.constant dense<0.000000e+00> : vector<8x128xf32>
    %29 = tpu.matmul %27, %28, %cst_13 {dimension_numbers = #tpu.dot_dimension_numbers<[1], [0], [0], [1], [0, 0, 1, 1], [], []>} : vector<8x64xbf16>, vector<64x128xbf16>, vector<8x128xf32> -> vector<8x128xf32>
    %c0_14 = arith.constant 0 : index
    %c0_15 = arith.constant 0 : index
    %30 = vector.load %arg6[%c0_14, %c0_15] : memref<1x128xf32, #tpu.memory_space<vmem>>, vector<1x128xf32>
    %31 = vector.broadcast %30 : vector<1x128xf32> to vector<8x128xf32>
    %32 = arith.addf %29, %31 : vector<8x128xf32>
    %33 = vector.extract_strided_slice %32 {offsets = [0, 0], sizes = [8, 64], strides = [1, 1]} : vector<8x128xf32> to vector<8x64xf32>
    %34 = vector.extract_strided_slice %32 {offsets = [0, 64], sizes = [8, 64], strides = [1, 1]} : vector<8x128xf32> to vector<8x64xf32>
    %35 = arith.negf %34 : vector<8x64xf32>
    %36 = math.exp %35 : vector<8x64xf32>
    %cst_16 = arith.constant 1.000000e+00 : f32
    %37 = vector.broadcast %cst_16 : f32 to vector<8x64xf32>
    %38 = arith.addf %37, %36 : vector<8x64xf32>
    %39 = arith.divf %37, %38 : vector<8x64xf32>
    %40 = arith.mulf %33, %39 : vector<8x64xf32>
    %41 = arith.truncf %40 : vector<8x64xf32> to vector<8x64xbf16>
    %c0_17 = arith.constant 0 : index
    %c0_18 = arith.constant 0 : index
    %42 = vector.load %arg7[%c0_17, %c0_18] : memref<8x64xbf16, #tpu.memory_space<vmem>>, vector<8x64xbf16>
    tpu.vector_store %arg7[%c0_17, %c0_18], %41 {strides = array<i32>} : memref<8x64xbf16, #tpu.memory_space<vmem>>, vector<8x64xbf16>,
    return
  }
  func.func @transform_0(%arg0: i32) -> (i32, i32) {
    %c0_i32 = arith.constant 0 : i32
    %c0_i32_0 = arith.constant 0 : i32
    return %arg0, %c0_i32 : i32, i32
  }
  func.func @transform_1(%arg0: i32) -> (i32, i32) {
    %c0_i32 = arith.constant 0 : i32
    %c0_i32_0 = arith.constant 0 : i32
    return %arg0, %c0_i32 : i32, i32
  }
  func.func @transform_2(%arg0: i32) -> (i32, i32) {
    %c0_i32 = arith.constant 0 : i32
    %c0_i32_0 = arith.constant 0 : i32
    %c0_i32_1 = arith.constant 0 : i32
    return %c0_i32, %c0_i32_0 : i32, i32
  }
  func.func @transform_3(%arg0: i32) -> (i32, i32) {
    %c0_i32 = arith.constant 0 : i32
    %c0_i32_0 = arith.constant 0 : i32
    %c0_i32_1 = arith.constant 0 : i32
    return %c0_i32, %c0_i32_0 : i32, i32
  }
  func.func @transform_4(%arg0: i32) -> (i32, i32) {
    %c0_i32 = arith.constant 0 : i32
    %c0_i32_0 = arith.constant 0 : i32
    %c0_i32_1 = arith.constant 0 : i32
    return %c0_i32, %c0_i32_0 : i32, i32
  }
  func.func @transform_5(%arg0: i32) -> (i32, i32) {
    %c0_i32 = arith.constant 0 : i32
    %c0_i32_0 = arith.constant 0 : i32
    %c0_i32_1 = arith.constant 0 : i32
    return %c0_i32, %c0_i32_0 : i32, i32
  }
  func.func @transform_6(%arg0: i32) -> (i32, i32) {
    %c0_i32 = arith.constant 0 : i32
    %c0_i32_0 = arith.constant 0 : i32
    return %arg0, %c0_i32 : i32, i32
  }
}

module attributes {stable_mosaic.version = 11 : i64} {
  func.func @_dwconv_kernel(%arg0: i32, %arg1: memref<1x14x64xbf16, #tpu.memory_space<vmem>>, %arg2: memref<7x64xf32, #tpu.memory_space<vmem>>, %arg3: memref<1x64xf32, #tpu.memory_space<vmem>>, %arg4: memref<1x8x64xbf16, #tpu.memory_space<vmem>>, %arg5: memref<8x64xf32, #tpu.memory_space<vmem>>, %arg6: memref<8x64xf32, #tpu.memory_space<vmem>>) attributes {dimension_semantics = [#tpu.dimension_semantics<parallel>], iteration_bounds = array<i64: 4>, scalar_prefetch = 0 : i64, scratch_operands = 0 : i64, tpu.core_type = #tpu.core_type<tc>, window_params = [{transform_indices = @transform_0, window_bounds = array<i64: 1, 14, 64>}, {pipeline_mode = #tpu.pipeline_mode<synchronous>, transform_indices = @transform_1, window_bounds = array<i64: 7, 64>}, {pipeline_mode = #tpu.pipeline_mode<synchronous>, transform_indices = @transform_2, window_bounds = array<i64: 1, 64>}, {transform_indices = @transform_3, window_bounds = array<i64: 1, 8, 64>}, {transform_indices = @transform_4, window_bounds = array<i64: 8, 64>}, {transform_indices = @transform_5, window_bounds = array<i64: 8, 64>}]} {
    %c0 = arith.constant 0 : index
    %c0_0 = arith.constant 0 : index
    %c0_1 = arith.constant 0 : index
    %0 = vector.load %arg1[%c0, %c0_0, %c0_1] : memref<1x14x64xbf16, #tpu.memory_space<vmem>>, vector<1x14x64xbf16>
    %1 = arith.extf %0 : vector<1x14x64xbf16> to vector<1x14x64xf32>
    %c0_2 = arith.constant 0 : index
    %c0_3 = arith.constant 0 : index
    %2 = vector.load %arg2[%c0_2, %c0_3] : memref<7x64xf32, #tpu.memory_space<vmem>>, vector<7x64xf32>
    %3 = vector.extract_strided_slice %1 {offsets = [0, 0, 0], sizes = [1, 8, 64], strides = [1, 1, 1]} : vector<1x14x64xf32> to vector<1x8x64xf32>
    %4 = vector.extract_strided_slice %2 {offsets = [0, 0], sizes = [1, 64], strides = [1, 1]} : vector<7x64xf32> to vector<1x64xf32>
    %5 = vector.shape_cast %4 : vector<1x64xf32> to vector<64xf32>
    %6 = vector.shape_cast %5 : vector<64xf32> to vector<1x1x64xf32>
    %7 = vector.broadcast %6 : vector<1x1x64xf32> to vector<1x8x64xf32>
    %8 = arith.mulf %3, %7 : vector<1x8x64xf32>
    %9 = vector.extract_strided_slice %1 {offsets = [0, 1, 0], sizes = [1, 8, 64], strides = [1, 1, 1]} : vector<1x14x64xf32> to vector<1x8x64xf32>
    %10 = vector.extract_strided_slice %2 {offsets = [1, 0], sizes = [1, 64], strides = [1, 1]} : vector<7x64xf32> to vector<1x64xf32>
    %11 = vector.shape_cast %10 : vector<1x64xf32> to vector<64xf32>
    %12 = vector.shape_cast %11 : vector<64xf32> to vector<1x1x64xf32>
    %13 = vector.broadcast %12 : vector<1x1x64xf32> to vector<1x8x64xf32>
    %14 = arith.mulf %9, %13 : vector<1x8x64xf32>
    %15 = arith.addf %8, %14 : vector<1x8x64xf32>
    %16 = vector.extract_strided_slice %1 {offsets = [0, 2, 0], sizes = [1, 8, 64], strides = [1, 1, 1]} : vector<1x14x64xf32> to vector<1x8x64xf32>
    %17 = vector.extract_strided_slice %2 {offsets = [2, 0], sizes = [1, 64], strides = [1, 1]} : vector<7x64xf32> to vector<1x64xf32>
    %18 = vector.shape_cast %17 : vector<1x64xf32> to vector<64xf32>
    %19 = vector.shape_cast %18 : vector<64xf32> to vector<1x1x64xf32>
    %20 = vector.broadcast %19 : vector<1x1x64xf32> to vector<1x8x64xf32>
    %21 = arith.mulf %16, %20 : vector<1x8x64xf32>
    %22 = arith.addf %15, %21 : vector<1x8x64xf32>
    %23 = vector.extract_strided_slice %1 {offsets = [0, 3, 0], sizes = [1, 8, 64], strides = [1, 1, 1]} : vector<1x14x64xf32> to vector<1x8x64xf32>
    %24 = vector.extract_strided_slice %2 {offsets = [3, 0], sizes = [1, 64], strides = [1, 1]} : vector<7x64xf32> to vector<1x64xf32>
    %25 = vector.shape_cast %24 : vector<1x64xf32> to vector<64xf32>
    %26 = vector.shape_cast %25 : vector<64xf32> to vector<1x1x64xf32>
    %27 = vector.broadcast %26 : vector<1x1x64xf32> to vector<1x8x64xf32>
    %28 = arith.mulf %23, %27 : vector<1x8x64xf32>
    %29 = arith.addf %22, %28 : vector<1x8x64xf32>
    %30 = vector.extract_strided_slice %1 {offsets = [0, 4, 0], sizes = [1, 8, 64], strides = [1, 1, 1]} : vector<1x14x64xf32> to vector<1x8x64xf32>
    %31 = vector.extract_strided_slice %2 {offsets = [4, 0], sizes = [1, 64], strides = [1, 1]} : vector<7x64xf32> to vector<1x64xf32>
    %32 = vector.shape_cast %31 : vector<1x64xf32> to vector<64xf32>
    %33 = vector.shape_cast %32 : vector<64xf32> to vector<1x1x64xf32>
    %34 = vector.broadcast %33 : vector<1x1x64xf32> to vector<1x8x64xf32>
    %35 = arith.mulf %30, %34 : vector<1x8x64xf32>
    %36 = arith.addf %29, %35 : vector<1x8x64xf32>
    %37 = vector.extract_strided_slice %1 {offsets = [0, 5, 0], sizes = [1, 8, 64], strides = [1, 1, 1]} : vector<1x14x64xf32> to vector<1x8x64xf32>
    %38 = vector.extract_strided_slice %2 {offsets = [5, 0], sizes = [1, 64], strides = [1, 1]} : vector<7x64xf32> to vector<1x64xf32>
    %39 = vector.shape_cast %38 : vector<1x64xf32> to vector<64xf32>
    %40 = vector.shape_cast %39 : vector<64xf32> to vector<1x1x64xf32>
    %41 = vector.broadcast %40 : vector<1x1x64xf32> to vector<1x8x64xf32>
    %42 = arith.mulf %37, %41 : vector<1x8x64xf32>
    %43 = arith.addf %36, %42 : vector<1x8x64xf32>
    %44 = vector.extract_strided_slice %1 {offsets = [0, 6, 0], sizes = [1, 8, 64], strides = [1, 1, 1]} : vector<1x14x64xf32> to vector<1x8x64xf32>
    %45 = vector.extract_strided_slice %2 {offsets = [6, 0], sizes = [1, 64], strides = [1, 1]} : vector<7x64xf32> to vector<1x64xf32>
    %46 = vector.shape_cast %45 : vector<1x64xf32> to vector<64xf32>
    %47 = vector.shape_cast %46 : vector<64xf32> to vector<1x1x64xf32>
    %48 = vector.broadcast %47 : vector<1x1x64xf32> to vector<1x8x64xf32>
    %49 = arith.mulf %44, %48 : vector<1x8x64xf32>
    %50 = arith.addf %43, %49 : vector<1x8x64xf32>
    %c0_4 = arith.constant 0 : index
    %c0_5 = arith.constant 0 : index
    %51 = vector.load %arg3[%c0_4, %c0_5] : memref<1x64xf32, #tpu.memory_space<vmem>>, vector<1x64xf32>
    %52 = vector.shape_cast %51 : vector<1x64xf32> to vector<1x1x64xf32>
    %53 = vector.broadcast %52 : vector<1x1x64xf32> to vector<1x8x64xf32>
    %54 = arith.addf %50, %53 : vector<1x8x64xf32>
    %55 = arith.truncf %54 : vector<1x8x64xf32> to vector<1x8x64xbf16>
    %c0_6 = arith.constant 0 : index
    %c0_7 = arith.constant 0 : index
    %c0_8 = arith.constant 0 : index
    %56 = vector.load %arg4[%c0_6, %c0_7, %c0_8] : memref<1x8x64xbf16, #tpu.memory_space<vmem>>, vector<1x8x64xbf16>
    tpu.vector_store %arg4[%c0_6, %c0_7, %c0_8], %55 {strides = array<i32>} : memref<1x8x64xbf16, #tpu.memory_space<vmem>>, vector<1x8x64xbf16>,
    %cst = arith.constant dense<0.000000e+00> : vector<64xf32>
    %57 = vector.multi_reduction <add>, %54, %cst [0, 1] : vector<1x8x64xf32> to vector<64xf32>
    %58 = arith.mulf %54, %54 : vector<1x8x64xf32>
    %cst_9 = arith.constant dense<0.000000e+00> : vector<64xf32>
    %59 = vector.multi_reduction <add>, %58, %cst_9 [0, 1] : vector<1x8x64xf32> to vector<64xf32>
    %60 = tpu.iota {dimensions = array<i32: 0>} : vector<8x64xi32>
    %c0_i32 = arith.constant 0 : i32
    %61 = vector.broadcast %c0_i32 : i32 to vector<8x64xi32>
    %62 = arith.cmpi eq, %60, %61 : vector<8x64xi32>
    %63 = vector.shape_cast %57 : vector<64xf32> to vector<1x64xf32>
    %cst_10 = arith.constant 0.000000e+00 : f32
    %64 = vector.shape_cast %63 : vector<1x64xf32> to vector<1x64xf32>
    %65 = vector.broadcast %64 : vector<1x64xf32> to vector<8x64xf32>
    %66 = vector.broadcast %cst_10 : f32 to vector<8x64xf32>
    %67 = arith.select %62, %65, %66 : vector<8x64xi1>, vector<8x64xf32>
    %c0_11 = arith.constant 0 : index
    %c0_12 = arith.constant 0 : index
    %68 = vector.load %arg5[%c0_11, %c0_12] : memref<8x64xf32, #tpu.memory_space<vmem>>, vector<8x64xf32>
    tpu.vector_store %arg5[%c0_11, %c0_12], %67 {strides = array<i32>} : memref<8x64xf32, #tpu.memory_space<vmem>>, vector<8x64xf32>,
    %c0_i32_13 = arith.constant 0 : i32
    %69 = vector.broadcast %c0_i32_13 : i32 to vector<8x64xi32>
    %70 = arith.cmpi eq, %60, %69 : vector<8x64xi32>
    %71 = vector.shape_cast %59 : vector<64xf32> to vector<1x64xf32>
    %cst_14 = arith.constant 0.000000e+00 : f32
    %72 = vector.shape_cast %71 : vector<1x64xf32> to vector<1x64xf32>
    %73 = vector.broadcast %72 : vector<1x64xf32> to vector<8x64xf32>
    %74 = vector.broadcast %cst_14 : f32 to vector<8x64xf32>
    %75 = arith.select %70, %73, %74 : vector<8x64xi1>, vector<8x64xf32>
    %c0_15 = arith.constant 0 : index
    %c0_16 = arith.constant 0 : index
    %76 = vector.load %arg6[%c0_15, %c0_16] : memref<8x64xf32, #tpu.memory_space<vmem>>, vector<8x64xf32>
    tpu.vector_store %arg6[%c0_15, %c0_16], %75 {strides = array<i32>} : memref<8x64xf32, #tpu.memory_space<vmem>>, vector<8x64xf32>,
    return
  }
  func.func @transform_0(%arg0: i32) -> (i32, i32, i32) {
    %c0_i32 = arith.constant 0 : i32
    %c0_i32_0 = arith.constant 0 : i32
    %c0_i32_1 = arith.constant 0 : i32
    return %arg0, %c0_i32, %c0_i32_0 : i32, i32, i32
  }
  func.func @transform_1(%arg0: i32) -> (i32, i32) {
    %c0_i32 = arith.constant 0 : i32
    %c0_i32_0 = arith.constant 0 : i32
    %c0_i32_1 = arith.constant 0 : i32
    return %c0_i32, %c0_i32_0 : i32, i32
  }
  func.func @transform_2(%arg0: i32) -> (i32, i32) {
    %c0_i32 = arith.constant 0 : i32
    %c0_i32_0 = arith.constant 0 : i32
    %c0_i32_1 = arith.constant 0 : i32
    return %c0_i32, %c0_i32_0 : i32, i32
  }
  func.func @transform_3(%arg0: i32) -> (i32, i32, i32) {
    %c0_i32 = arith.constant 0 : i32
    %c0_i32_0 = arith.constant 0 : i32
    %c0_i32_1 = arith.constant 0 : i32
    return %arg0, %c0_i32, %c0_i32_0 : i32, i32, i32
  }
  func.func @transform_4(%arg0: i32) -> (i32, i32) {
    %c0_i32 = arith.constant 0 : i32
    %c0_i32_0 = arith.constant 0 : i32
    return %arg0, %c0_i32 : i32, i32
  }
  func.func @transform_5(%arg0: i32) -> (i32, i32) {
    %c0_i32 = arith.constant 0 : i32
    %c0_i32_0 = arith.constant 0 : i32
    return %arg0, %c0_i32 : i32, i32
  }
}

module attributes {stable_mosaic.version = 11 : i64} {
  func.func @_dwconv_kernel(%arg0: i32, %arg1: memref<1x22x64xbf16, #tpu.memory_space<vmem>>, %arg2: memref<7x64xf32, #tpu.memory_space<vmem>>, %arg3: memref<1x64xf32, #tpu.memory_space<vmem>>, %arg4: memref<1x16x64xbf16, #tpu.memory_space<vmem>>, %arg5: memref<8x64xf32, #tpu.memory_space<vmem>>, %arg6: memref<8x64xf32, #tpu.memory_space<vmem>>) attributes {dimension_semantics = [#tpu.dimension_semantics<parallel>], iteration_bounds = array<i64: 2>, scalar_prefetch = 0 : i64, scratch_operands = 0 : i64, tpu.core_type = #tpu.core_type<tc>, window_params = [{transform_indices = @transform_0, window_bounds = array<i64: 1, 22, 64>}, {pipeline_mode = #tpu.pipeline_mode<synchronous>, transform_indices = @transform_1, window_bounds = array<i64: 7, 64>}, {pipeline_mode = #tpu.pipeline_mode<synchronous>, transform_indices = @transform_2, window_bounds = array<i64: 1, 64>}, {transform_indices = @transform_3, window_bounds = array<i64: 1, 16, 64>}, {transform_indices = @transform_4, window_bounds = array<i64: 8, 64>}, {transform_indices = @transform_5, window_bounds = array<i64: 8, 64>}]} {
    %c0 = arith.constant 0 : index
    %c0_0 = arith.constant 0 : index
    %c0_1 = arith.constant 0 : index
    %0 = vector.load %arg1[%c0, %c0_0, %c0_1] : memref<1x22x64xbf16, #tpu.memory_space<vmem>>, vector<1x22x64xbf16>
    %1 = arith.extf %0 : vector<1x22x64xbf16> to vector<1x22x64xf32>
    %c0_2 = arith.constant 0 : index
    %c0_3 = arith.constant 0 : index
    %2 = vector.load %arg2[%c0_2, %c0_3] : memref<7x64xf32, #tpu.memory_space<vmem>>, vector<7x64xf32>
    %3 = vector.extract_strided_slice %1 {offsets = [0, 0, 0], sizes = [1, 16, 64], strides = [1, 1, 1]} : vector<1x22x64xf32> to vector<1x16x64xf32>
    %4 = vector.extract_strided_slice %2 {offsets = [0, 0], sizes = [1, 64], strides = [1, 1]} : vector<7x64xf32> to vector<1x64xf32>
    %5 = vector.shape_cast %4 : vector<1x64xf32> to vector<64xf32>
    %6 = vector.shape_cast %5 : vector<64xf32> to vector<1x1x64xf32>
    %7 = vector.broadcast %6 : vector<1x1x64xf32> to vector<1x16x64xf32>
    %8 = arith.mulf %3, %7 : vector<1x16x64xf32>
    %9 = vector.extract_strided_slice %1 {offsets = [0, 1, 0], sizes = [1, 16, 64], strides = [1, 1, 1]} : vector<1x22x64xf32> to vector<1x16x64xf32>
    %10 = vector.extract_strided_slice %2 {offsets = [1, 0], sizes = [1, 64], strides = [1, 1]} : vector<7x64xf32> to vector<1x64xf32>
    %11 = vector.shape_cast %10 : vector<1x64xf32> to vector<64xf32>
    %12 = vector.shape_cast %11 : vector<64xf32> to vector<1x1x64xf32>
    %13 = vector.broadcast %12 : vector<1x1x64xf32> to vector<1x16x64xf32>
    %14 = arith.mulf %9, %13 : vector<1x16x64xf32>
    %15 = arith.addf %8, %14 : vector<1x16x64xf32>
    %16 = vector.extract_strided_slice %1 {offsets = [0, 2, 0], sizes = [1, 16, 64], strides = [1, 1, 1]} : vector<1x22x64xf32> to vector<1x16x64xf32>
    %17 = vector.extract_strided_slice %2 {offsets = [2, 0], sizes = [1, 64], strides = [1, 1]} : vector<7x64xf32> to vector<1x64xf32>
    %18 = vector.shape_cast %17 : vector<1x64xf32> to vector<64xf32>
    %19 = vector.shape_cast %18 : vector<64xf32> to vector<1x1x64xf32>
    %20 = vector.broadcast %19 : vector<1x1x64xf32> to vector<1x16x64xf32>
    %21 = arith.mulf %16, %20 : vector<1x16x64xf32>
    %22 = arith.addf %15, %21 : vector<1x16x64xf32>
    %23 = vector.extract_strided_slice %1 {offsets = [0, 3, 0], sizes = [1, 16, 64], strides = [1, 1, 1]} : vector<1x22x64xf32> to vector<1x16x64xf32>
    %24 = vector.extract_strided_slice %2 {offsets = [3, 0], sizes = [1, 64], strides = [1, 1]} : vector<7x64xf32> to vector<1x64xf32>
    %25 = vector.shape_cast %24 : vector<1x64xf32> to vector<64xf32>
    %26 = vector.shape_cast %25 : vector<64xf32> to vector<1x1x64xf32>
    %27 = vector.broadcast %26 : vector<1x1x64xf32> to vector<1x16x64xf32>
    %28 = arith.mulf %23, %27 : vector<1x16x64xf32>
    %29 = arith.addf %22, %28 : vector<1x16x64xf32>
    %30 = vector.extract_strided_slice %1 {offsets = [0, 4, 0], sizes = [1, 16, 64], strides = [1, 1, 1]} : vector<1x22x64xf32> to vector<1x16x64xf32>
    %31 = vector.extract_strided_slice %2 {offsets = [4, 0], sizes = [1, 64], strides = [1, 1]} : vector<7x64xf32> to vector<1x64xf32>
    %32 = vector.shape_cast %31 : vector<1x64xf32> to vector<64xf32>
    %33 = vector.shape_cast %32 : vector<64xf32> to vector<1x1x64xf32>
    %34 = vector.broadcast %33 : vector<1x1x64xf32> to vector<1x16x64xf32>
    %35 = arith.mulf %30, %34 : vector<1x16x64xf32>
    %36 = arith.addf %29, %35 : vector<1x16x64xf32>
    %37 = vector.extract_strided_slice %1 {offsets = [0, 5, 0], sizes = [1, 16, 64], strides = [1, 1, 1]} : vector<1x22x64xf32> to vector<1x16x64xf32>
    %38 = vector.extract_strided_slice %2 {offsets = [5, 0], sizes = [1, 64], strides = [1, 1]} : vector<7x64xf32> to vector<1x64xf32>
    %39 = vector.shape_cast %38 : vector<1x64xf32> to vector<64xf32>
    %40 = vector.shape_cast %39 : vector<64xf32> to vector<1x1x64xf32>
    %41 = vector.broadcast %40 : vector<1x1x64xf32> to vector<1x16x64xf32>
    %42 = arith.mulf %37, %41 : vector<1x16x64xf32>
    %43 = arith.addf %36, %42 : vector<1x16x64xf32>
    %44 = vector.extract_strided_slice %1 {offsets = [0, 6, 0], sizes = [1, 16, 64], strides = [1, 1, 1]} : vector<1x22x64xf32> to vector<1x16x64xf32>
    %45 = vector.extract_strided_slice %2 {offsets = [6, 0], sizes = [1, 64], strides = [1, 1]} : vector<7x64xf32> to vector<1x64xf32>
    %46 = vector.shape_cast %45 : vector<1x64xf32> to vector<64xf32>
    %47 = vector.shape_cast %46 : vector<64xf32> to vector<1x1x64xf32>
    %48 = vector.broadcast %47 : vector<1x1x64xf32> to vector<1x16x64xf32>
    %49 = arith.mulf %44, %48 : vector<1x16x64xf32>
    %50 = arith.addf %43, %49 : vector<1x16x64xf32>
    %c0_4 = arith.constant 0 : index
    %c0_5 = arith.constant 0 : index
    %51 = vector.load %arg3[%c0_4, %c0_5] : memref<1x64xf32, #tpu.memory_space<vmem>>, vector<1x64xf32>
    %52 = vector.shape_cast %51 : vector<1x64xf32> to vector<1x1x64xf32>
    %53 = vector.broadcast %52 : vector<1x1x64xf32> to vector<1x16x64xf32>
    %54 = arith.addf %50, %53 : vector<1x16x64xf32>
    %55 = arith.truncf %54 : vector<1x16x64xf32> to vector<1x16x64xbf16>
    %c0_6 = arith.constant 0 : index
    %c0_7 = arith.constant 0 : index
    %c0_8 = arith.constant 0 : index
    %56 = vector.load %arg4[%c0_6, %c0_7, %c0_8] : memref<1x16x64xbf16, #tpu.memory_space<vmem>>, vector<1x16x64xbf16>
    tpu.vector_store %arg4[%c0_6, %c0_7, %c0_8], %55 {strides = array<i32>} : memref<1x16x64xbf16, #tpu.memory_space<vmem>>, vector<1x16x64xbf16>,
    %cst = arith.constant dense<0.000000e+00> : vector<64xf32>
    %57 = vector.multi_reduction <add>, %54, %cst [0, 1] : vector<1x16x64xf32> to vector<64xf32>
    %58 = arith.mulf %54, %54 : vector<1x16x64xf32>
    %cst_9 = arith.constant dense<0.000000e+00> : vector<64xf32>
    %59 = vector.multi_reduction <add>, %58, %cst_9 [0, 1] : vector<1x16x64xf32> to vector<64xf32>
    %60 = tpu.iota {dimensions = array<i32: 0>} : vector<8x64xi32>
    %c0_i32 = arith.constant 0 : i32
    %61 = vector.broadcast %c0_i32 : i32 to vector<8x64xi32>
    %62 = arith.cmpi eq, %60, %61 : vector<8x64xi32>
    %63 = vector.shape_cast %57 : vector<64xf32> to vector<1x64xf32>
    %cst_10 = arith.constant 0.000000e+00 : f32
    %64 = vector.shape_cast %63 : vector<1x64xf32> to vector<1x64xf32>
    %65 = vector.broadcast %64 : vector<1x64xf32> to vector<8x64xf32>
    %66 = vector.broadcast %cst_10 : f32 to vector<8x64xf32>
    %67 = arith.select %62, %65, %66 : vector<8x64xi1>, vector<8x64xf32>
    %c0_11 = arith.constant 0 : index
    %c0_12 = arith.constant 0 : index
    %68 = vector.load %arg5[%c0_11, %c0_12] : memref<8x64xf32, #tpu.memory_space<vmem>>, vector<8x64xf32>
    tpu.vector_store %arg5[%c0_11, %c0_12], %67 {strides = array<i32>} : memref<8x64xf32, #tpu.memory_space<vmem>>, vector<8x64xf32>,
    %c0_i32_13 = arith.constant 0 : i32
    %69 = vector.broadcast %c0_i32_13 : i32 to vector<8x64xi32>
    %70 = arith.cmpi eq, %60, %69 : vector<8x64xi32>
    %71 = vector.shape_cast %59 : vector<64xf32> to vector<1x64xf32>
    %cst_14 = arith.constant 0.000000e+00 : f32
    %72 = vector.shape_cast %71 : vector<1x64xf32> to vector<1x64xf32>
    %73 = vector.broadcast %72 : vector<1x64xf32> to vector<8x64xf32>
    %74 = vector.broadcast %cst_14 : f32 to vector<8x64xf32>
    %75 = arith.select %70, %73, %74 : vector<8x64xi1>, vector<8x64xf32>
    %c0_15 = arith.constant 0 : index
    %c0_16 = arith.constant 0 : index
    %76 = vector.load %arg6[%c0_15, %c0_16] : memref<8x64xf32, #tpu.memory_space<vmem>>, vector<8x64xf32>
    tpu.vector_store %arg6[%c0_15, %c0_16], %75 {strides = array<i32>} : memref<8x64xf32, #tpu.memory_space<vmem>>, vector<8x64xf32>,
    return
  }
  func.func @transform_0(%arg0: i32) -> (i32, i32, i32) {
    %c0_i32 = arith.constant 0 : i32
    %c0_i32_0 = arith.constant 0 : i32
    %c0_i32_1 = arith.constant 0 : i32
    return %arg0, %c0_i32, %c0_i32_0 : i32, i32, i32
  }
  func.func @transform_1(%arg0: i32) -> (i32, i32) {
    %c0_i32 = arith.constant 0 : i32
    %c0_i32_0 = arith.constant 0 : i32
    %c0_i32_1 = arith.constant 0 : i32
    return %c0_i32, %c0_i32_0 : i32, i32
  }
  func.func @transform_2(%arg0: i32) -> (i32, i32) {
    %c0_i32 = arith.constant 0 : i32
    %c0_i32_0 = arith.constant 0 : i32
    %c0_i32_1 = arith.constant 0 : i32
    return %c0_i32, %c0_i32_0 : i32, i32
  }
  func.func @transform_3(%arg0: i32) -> (i32, i32, i32) {
    %c0_i32 = arith.constant 0 : i32
    %c0_i32_0 = arith.constant 0 : i32
    %c0_i32_1 = arith.constant 0 : i32
    return %arg0, %c0_i32, %c0_i32_0 : i32, i32, i32
  }
  func.func @transform_4(%arg0: i32) -> (i32, i32) {
    %c0_i32 = arith.constant 0 : i32
    %c0_i32_0 = arith.constant 0 : i32
    return %arg0, %c0_i32 : i32, i32
  }
  func.func @transform_5(%arg0: i32) -> (i32, i32) {
    %c0_i32 = arith.constant 0 : i32
    %c0_i32_0 = arith.constant 0 : i32
    return %arg0, %c0_i32 : i32, i32
  }
}

module attributes {stable_mosaic.version = 11 : i64} {
  func.func @kernel(%arg0: i32, %arg1: memref<8x64xbf16, #tpu.memory_space<vmem>>, %arg2: memref<1x64xf32, #tpu.memory_space<vmem>>, %arg3: memref<1x64xf32, #tpu.memory_space<vmem>>, %arg4: memref<64x64xbf16, #tpu.memory_space<vmem>>, %arg5: memref<1x64xf32, #tpu.memory_space<vmem>>, %arg6: memref<8x64xbf16, #tpu.memory_space<vmem>>, %arg7: memref<8x1xf32, #tpu.memory_space<vmem>>, %arg8: memref<8x64xbf16, #tpu.memory_space<vmem>>) attributes {dimension_semantics = [#tpu.dimension_semantics<parallel>], iteration_bounds = array<i64: 4>, scalar_prefetch = 0 : i64, scratch_operands = 0 : i64, tpu.core_type = #tpu.core_type<tc>, window_params = [{transform_indices = @transform_0, window_bounds = array<i64: 8, 64>}, {pipeline_mode = #tpu.pipeline_mode<synchronous>, transform_indices = @transform_1, window_bounds = array<i64: 1, 64>}, {pipeline_mode = #tpu.pipeline_mode<synchronous>, transform_indices = @transform_2, window_bounds = array<i64: 1, 64>}, {pipeline_mode = #tpu.pipeline_mode<synchronous>, transform_indices = @transform_3, window_bounds = array<i64: 64, 64>}, {pipeline_mode = #tpu.pipeline_mode<synchronous>, transform_indices = @transform_4, window_bounds = array<i64: 1, 64>}, {transform_indices = @transform_5, window_bounds = array<i64: 8, 64>}, {transform_indices = @transform_6, window_bounds = array<i64: 8, 1>}, {transform_indices = @transform_7, window_bounds = array<i64: 8, 64>}]} {
    %c0 = arith.constant 0 : index
    %c0_0 = arith.constant 0 : index
    %0 = vector.load %arg1[%c0, %c0_0] : memref<8x64xbf16, #tpu.memory_space<vmem>>, vector<8x64xbf16>
    %1 = arith.extf %0 : vector<8x64xbf16> to vector<8x64xf32>
    %c0_1 = arith.constant 0 : index
    %c0_2 = arith.constant 0 : index
    %2 = vector.load %arg2[%c0_1, %c0_2] : memref<1x64xf32, #tpu.memory_space<vmem>>, vector<1x64xf32>
    %3 = vector.broadcast %2 : vector<1x64xf32> to vector<8x64xf32>
    %4 = arith.mulf %1, %3 : vector<8x64xf32>
    %c0_3 = arith.constant 0 : index
    %c0_4 = arith.constant 0 : index
    %5 = vector.load %arg3[%c0_3, %c0_4] : memref<1x64xf32, #tpu.memory_space<vmem>>, vector<1x64xf32>
    %6 = vector.broadcast %5 : vector<1x64xf32> to vector<8x64xf32>
    %7 = arith.addf %4, %6 : vector<8x64xf32>
    %8 = arith.negf %7 : vector<8x64xf32>
    %9 = math.exp %8 : vector<8x64xf32>
    %cst = arith.constant 1.000000e+00 : f32
    %10 = vector.broadcast %cst : f32 to vector<8x64xf32>
    %11 = arith.addf %10, %9 : vector<8x64xf32>
    %12 = arith.divf %10, %11 : vector<8x64xf32>
    %13 = arith.mulf %7, %12 : vector<8x64xf32>
    %14 = arith.truncf %13 : vector<8x64xf32> to vector<8x64xbf16>
    %c0_5 = arith.constant 0 : index
    %c0_6 = arith.constant 0 : index
    %15 = vector.load %arg4[%c0_5, %c0_6] : memref<64x64xbf16, #tpu.memory_space<vmem>>, vector<64x64xbf16>
    %cst_7 = arith.constant dense<0.000000e+00> : vector<8x64xf32>
    %16 = tpu.matmul %14, %15, %cst_7 {dimension_numbers = #tpu.dot_dimension_numbers<[1], [0], [0], [1], [0, 0, 1, 1], [], []>} : vector<8x64xbf16>, vector<64x64xbf16>, vector<8x64xf32> -> vector<8x64xf32>
    %c0_8 = arith.constant 0 : index
    %c0_9 = arith.constant 0 : index
    %17 = vector.load %arg6[%c0_8, %c0_9] : memref<8x64xbf16, #tpu.memory_space<vmem>>, vector<8x64xbf16>
    %18 = arith.extf %17 : vector<8x64xbf16> to vector<8x64xf32>
    %c0_10 = arith.constant 0 : index
    %c0_11 = arith.constant 0 : index
    %19 = vector.load %arg7[%c0_10, %c0_11] : memref<8x1xf32, #tpu.memory_space<vmem>>, vector<8x1xf32>
    %20 = vector.broadcast %19 : vector<8x1xf32> to vector<8x64xf32>
    %21 = arith.mulf %18, %20 : vector<8x64xf32>
    %c0_12 = arith.constant 0 : index
    %c0_13 = arith.constant 0 : index
    %22 = vector.load %arg5[%c0_12, %c0_13] : memref<1x64xf32, #tpu.memory_space<vmem>>, vector<1x64xf32>
    %23 = vector.broadcast %22 : vector<1x64xf32> to vector<8x64xf32>
    %24 = arith.addf %16, %23 : vector<8x64xf32>
    %25 = arith.addf %24, %21 : vector<8x64xf32>
    %26 = arith.truncf %25 : vector<8x64xf32> to vector<8x64xbf16>
    %c0_14 = arith.constant 0 : index
    %c0_15 = arith.constant 0 : index
    %27 = vector.load %arg8[%c0_14, %c0_15] : memref<8x64xbf16, #tpu.memory_space<vmem>>, vector<8x64xbf16>
    tpu.vector_store %arg8[%c0_14, %c0_15], %26 {strides = array<i32>} : memref<8x64xbf16, #tpu.memory_space<vmem>>, vector<8x64xbf16>,
    return
  }
  func.func @transform_0(%arg0: i32) -> (i32, i32) {
    %c0_i32 = arith.constant 0 : i32
    %c0_i32_0 = arith.constant 0 : i32
    return %arg0, %c0_i32 : i32, i32
  }
  func.func @transform_1(%arg0: i32) -> (i32, i32) {
    %c0_i32 = arith.constant 0 : i32
    %c0_i32_0 = arith.constant 0 : i32
    %c0_i32_1 = arith.constant 0 : i32
    return %c0_i32, %c0_i32_0 : i32, i32
  }
  func.func @transform_2(%arg0: i32) -> (i32, i32) {
    %c0_i32 = arith.constant 0 : i32
    %c0_i32_0 = arith.constant 0 : i32
    %c0_i32_1 = arith.constant 0 : i32
    return %c0_i32, %c0_i32_0 : i32, i32
  }
  func.func @transform_3(%arg0: i32) -> (i32, i32) {
    %c0_i32 = arith.constant 0 : i32
    %c0_i32_0 = arith.constant 0 : i32
    %c0_i32_1 = arith.constant 0 : i32
    return %c0_i32, %c0_i32_0 : i32, i32
  }
  func.func @transform_4(%arg0: i32) -> (i32, i32) {
    %c0_i32 = arith.constant 0 : i32
    %c0_i32_0 = arith.constant 0 : i32
    %c0_i32_1 = arith.constant 0 : i32
    return %c0_i32, %c0_i32_0 : i32, i32
  }
  func.func @transform_5(%arg0: i32) -> (i32, i32) {
    %c0_i32 = arith.constant 0 : i32
    %c0_i32_0 = arith.constant 0 : i32
    return %arg0, %c0_i32 : i32, i32
  }
  func.func @transform_6(%arg0: i32) -> (i32, i32) {
    %c0_i32 = arith.constant 0 : i32
    %c0_i32_0 = arith.constant 0 : i32
    return %arg0, %c0_i32 : i32, i32
  }
  func.func @transform_7(%arg0: i32) -> (i32, i32) {
    %c0_i32 = arith.constant 0 : i32
    %c0_i32_0 = arith.constant 0 : i32
    return %arg0, %c0_i32 : i32, i32
  }
}

module attributes {stable_mosaic.version = 11 : i64} {
  func.func @_vrnn_kernel(%arg0: i32, %arg1: memref<8x64xbf16, #tpu.memory_space<vmem>>, %arg2: memref<8x64xbf16, #tpu.memory_space<vmem>>, %arg3: memref<64x64xbf16, #tpu.memory_space<vmem>>, %arg4: memref<1x64xf32, #tpu.memory_space<vmem>>, %arg5: memref<1x64xf32, #tpu.memory_space<vmem>>, %arg6: memref<1x64xf32, #tpu.memory_space<vmem>>, %arg7: memref<8x64xbf16, #tpu.memory_space<vmem>>) attributes {dimension_semantics = [#tpu.dimension_semantics<parallel>], iteration_bounds = array<i64: 4>, scalar_prefetch = 0 : i64, scratch_operands = 0 : i64, tpu.core_type = #tpu.core_type<tc>, window_params = [{transform_indices = @transform_0, window_bounds = array<i64: 8, 64>}, {transform_indices = @transform_1, window_bounds = array<i64: 8, 64>}, {pipeline_mode = #tpu.pipeline_mode<synchronous>, transform_indices = @transform_2, window_bounds = array<i64: 64, 64>}, {pipeline_mode = #tpu.pipeline_mode<synchronous>, transform_indices = @transform_3, window_bounds = array<i64: 1, 64>}, {pipeline_mode = #tpu.pipeline_mode<synchronous>, transform_indices = @transform_4, window_bounds = array<i64: 1, 64>}, {pipeline_mode = #tpu.pipeline_mode<synchronous>, transform_indices = @transform_5, window_bounds = array<i64: 1, 64>}, {transform_indices = @transform_6, window_bounds = array<i64: 8, 64>}]} {
    %c0 = arith.constant 0 : index
    %c0_0 = arith.constant 0 : index
    %0 = vector.load %arg1[%c0, %c0_0] : memref<8x64xbf16, #tpu.memory_space<vmem>>, vector<8x64xbf16>
    %1 = arith.extf %0 : vector<8x64xbf16> to vector<8x64xf32>
    %c0_1 = arith.constant 0 : index
    %c0_2 = arith.constant 0 : index
    %2 = vector.load %arg2[%c0_1, %c0_2] : memref<8x64xbf16, #tpu.memory_space<vmem>>, vector<8x64xbf16>
    %3 = arith.extf %2 : vector<8x64xbf16> to vector<8x64xf32>
    %4 = arith.addf %1, %3 : vector<8x64xf32>
    %5 = arith.truncf %4 : vector<8x64xf32> to vector<8x64xbf16>
    %c0_3 = arith.constant 0 : index
    %c0_4 = arith.constant 0 : index
    %6 = vector.load %arg3[%c0_3, %c0_4] : memref<64x64xbf16, #tpu.memory_space<vmem>>, vector<64x64xbf16>
    %cst = arith.constant dense<0.000000e+00> : vector<8x64xf32>
    %7 = tpu.matmul %5, %6, %cst {dimension_numbers = #tpu.dot_dimension_numbers<[1], [0], [0], [1], [0, 0, 1, 1], [], []>} : vector<8x64xbf16>, vector<64x64xbf16>, vector<8x64xf32> -> vector<8x64xf32>
    %c0_5 = arith.constant 0 : index
    %c0_6 = arith.constant 0 : index
    %8 = vector.load %arg4[%c0_5, %c0_6] : memref<1x64xf32, #tpu.memory_space<vmem>>, vector<1x64xf32>
    %9 = vector.broadcast %8 : vector<1x64xf32> to vector<8x64xf32>
    %10 = arith.addf %7, %9 : vector<8x64xf32>
    %cst_7 = arith.constant 0.000000e+00 : f32
    %11 = vector.broadcast %cst_7 : f32 to vector<8x64xf32>
    %12 = arith.maximumf %10, %11 : vector<8x64xf32>
    %13 = arith.addf %12, %1 : vector<8x64xf32>
    %cst_8 = arith.constant dense<0.000000e+00> : vector<8xf32>
    %14 = vector.multi_reduction <add>, %13, %cst_8 [1] : vector<8x64xf32> to vector<8xf32>
    %15 = vector.shape_cast %14 : vector<8xf32> to vector<8x1xf32>
    %cst_9 = arith.constant 6.400000e+01 : f32
    %16 = vector.broadcast %cst_9 : f32 to vector<8x1xf32>
    %17 = arith.divf %15, %16 : vector<8x1xf32>
    %18 = vector.broadcast %17 : vector<8x1xf32> to vector<8x64xf32>
    %19 = arith.subf %13, %18 : vector<8x64xf32>
    %20 = arith.mulf %19, %19 : vector<8x64xf32>
    %cst_10 = arith.constant dense<0.000000e+00> : vector<8xf32>
    %21 = vector.multi_reduction <add>, %20, %cst_10 [1] : vector<8x64xf32> to vector<8xf32>
    %22 = vector.shape_cast %21 : vector<8xf32> to vector<8x1xf32>
    %cst_11 = arith.constant 6.400000e+01 : f32
    %23 = vector.broadcast %cst_11 : f32 to vector<8x1xf32>
    %24 = arith.divf %22, %23 : vector<8x1xf32>
    %cst_12 = arith.constant 9.99999974E-6 : f32
    %25 = vector.broadcast %cst_12 : f32 to vector<8x1xf32>
    %26 = arith.addf %24, %25 : vector<8x1xf32>
    %27 = math.rsqrt %26 : vector<8x1xf32>
    %28 = vector.broadcast %27 : vector<8x1xf32> to vector<8x64xf32>
    %29 = arith.mulf %19, %28 : vector<8x64xf32>
    %c0_13 = arith.constant 0 : index
    %c0_14 = arith.constant 0 : index
    %30 = vector.load %arg5[%c0_13, %c0_14] : memref<1x64xf32, #tpu.memory_space<vmem>>, vector<1x64xf32>
    %31 = vector.broadcast %30 : vector<1x64xf32> to vector<8x64xf32>
    %32 = arith.mulf %29, %31 : vector<8x64xf32>
    %c0_15 = arith.constant 0 : index
    %c0_16 = arith.constant 0 : index
    %33 = vector.load %arg6[%c0_15, %c0_16] : memref<1x64xf32, #tpu.memory_space<vmem>>, vector<1x64xf32>
    %34 = vector.broadcast %33 : vector<1x64xf32> to vector<8x64xf32>
    %35 = arith.addf %32, %34 : vector<8x64xf32>
    %36 = arith.truncf %35 : vector<8x64xf32> to vector<8x64xbf16>
    %c0_17 = arith.constant 0 : index
    %c0_18 = arith.constant 0 : index
    %37 = vector.load %arg7[%c0_17, %c0_18] : memref<8x64xbf16, #tpu.memory_space<vmem>>, vector<8x64xbf16>
    tpu.vector_store %arg7[%c0_17, %c0_18], %36 {strides = array<i32>} : memref<8x64xbf16, #tpu.memory_space<vmem>>, vector<8x64xbf16>,
    return
  }
  func.func @transform_0(%arg0: i32) -> (i32, i32) {
    %c0_i32 = arith.constant 0 : i32
    %c0_i32_0 = arith.constant 0 : i32
    return %arg0, %c0_i32 : i32, i32
  }
  func.func @transform_1(%arg0: i32) -> (i32, i32) {
    %c0_i32 = arith.constant 0 : i32
    %c0_i32_0 = arith.constant 0 : i32
    return %arg0, %c0_i32 : i32, i32
  }
  func.func @transform_2(%arg0: i32) -> (i32, i32) {
    %c0_i32 = arith.constant 0 : i32
    %c0_i32_0 = arith.constant 0 : i32
    %c0_i32_1 = arith.constant 0 : i32
    return %c0_i32, %c0_i32_0 : i32, i32
  }
  func.func @transform_3(%arg0: i32) -> (i32, i32) {
    %c0_i32 = arith.constant 0 : i32
    %c0_i32_0 = arith.constant 0 : i32
    %c0_i32_1 = arith.constant 0 : i32
    return %c0_i32, %c0_i32_0 : i32, i32
  }
  func.func @transform_4(%arg0: i32) -> (i32, i32) {
    %c0_i32 = arith.constant 0 : i32
    %c0_i32_0 = arith.constant 0 : i32
    %c0_i32_1 = arith.constant 0 : i32
    return %c0_i32, %c0_i32_0 : i32, i32
  }
  func.func @transform_5(%arg0: i32) -> (i32, i32) {
    %c0_i32 = arith.constant 0 : i32
    %c0_i32_0 = arith.constant 0 : i32
    %c0_i32_1 = arith.constant 0 : i32
    return %c0_i32, %c0_i32_0 : i32, i32
  }
  func.func @transform_6(%arg0: i32) -> (i32, i32) {
    %c0_i32 = arith.constant 0 : i32
    %c0_i32_0 = arith.constant 0 : i32
    return %arg0, %c0_i32 : i32, i32
  }
}

module attributes {stable_mosaic.version = 11 : i64} {
  func.func @kernel(%arg0: i32, %arg1: i32, %arg2: memref<8x64xbf16, #tpu.memory_space<vmem>>, %arg3: memref<1x64xf32, #tpu.memory_space<vmem>>, %arg4: memref<1x64xf32, #tpu.memory_space<vmem>>, %arg5: memref<64x128xbf16, #tpu.memory_space<vmem>>, %arg6: memref<1x128xf32, #tpu.memory_space<vmem>>, %arg7: memref<128x64xbf16, #tpu.memory_space<vmem>>, %arg8: memref<1x64xf32, #tpu.memory_space<vmem>>, %arg9: memref<1x64xf32, #tpu.memory_space<vmem>>, %arg10: memref<1x64xf32, #tpu.memory_space<vmem>>, %arg11: memref<8x64xbf16, #tpu.memory_space<vmem>>, %arg12: memref<8x64xbf16, #tpu.memory_space<vmem>>, %arg13: memref<8x64xf32, #tpu.memory_space<vmem>>) attributes {dimension_semantics = [#tpu.dimension_semantics<parallel>, #tpu.dimension_semantics<arbitrary>], iteration_bounds = array<i64: 4, 1>, scalar_prefetch = 0 : i64, scratch_operands = 2 : i64, tpu.core_type = #tpu.core_type<tc>, window_params = [{transform_indices = @transform_0, window_bounds = array<i64: 8, 64>}, {pipeline_mode = #tpu.pipeline_mode<synchronous>, transform_indices = @transform_1, window_bounds = array<i64: 1, 64>}, {pipeline_mode = #tpu.pipeline_mode<synchronous>, transform_indices = @transform_2, window_bounds = array<i64: 1, 64>}, {transform_indices = @transform_3, window_bounds = array<i64: 64, 128>}, {transform_indices = @transform_4, window_bounds = array<i64: 1, 128>}, {transform_indices = @transform_5, window_bounds = array<i64: 128, 64>}, {pipeline_mode = #tpu.pipeline_mode<synchronous>, transform_indices = @transform_6, window_bounds = array<i64: 1, 64>}, {pipeline_mode = #tpu.pipeline_mode<synchronous>, transform_indices = @transform_7, window_bounds = array<i64: 1, 64>}, {pipeline_mode = #tpu.pipeline_mode<synchronous>, transform_indices = @transform_8, window_bounds = array<i64: 1, 64>}, {transform_indices = @transform_9, window_bounds = array<i64: 8, 64>}]} {
    %c0_i32 = arith.constant 0 : i32
    %0 = arith.cmpi eq, %arg1, %c0_i32 : i32
    %1 = arith.extui %0 : i1 to i32
    %c0_i32_0 = arith.constant 0 : i32
    %2 = arith.cmpi ne, %1, %c0_i32_0 : i32
    scf.if %2 {
      %c0_16 = arith.constant 0 : index
      %c0_17 = arith.constant 0 : index
      %24 = vector.load %arg2[%c0_16, %c0_17] : memref<8x64xbf16, #tpu.memory_space<vmem>>, vector<8x64xbf16>
      %25 = arith.extf %24 : vector<8x64xbf16> to vector<8x64xf32>
      %cst_18 = arith.constant dense<0.000000e+00> : vector<8xf32>
      %26 = vector.multi_reduction <add>, %25, %cst_18 [1] : vector<8x64xf32> to vector<8xf32>
      %27 = vector.shape_cast %26 : vector<8xf32> to vector<8x1xf32>
      %cst_19 = arith.constant 6.400000e+01 : f32
      %28 = vector.broadcast %cst_19 : f32 to vector<8x1xf32>
      %29 = arith.divf %27, %28 : vector<8x1xf32>
      %30 = vector.broadcast %29 : vector<8x1xf32> to vector<8x64xf32>
      %31 = arith.subf %25, %30 : vector<8x64xf32>
      %32 = arith.mulf %31, %31 : vector<8x64xf32>
      %cst_20 = arith.constant dense<0.000000e+00> : vector<8xf32>
      %33 = vector.multi_reduction <add>, %32, %cst_20 [1] : vector<8x64xf32> to vector<8xf32>
      %34 = vector.shape_cast %33 : vector<8xf32> to vector<8x1xf32>
      %cst_21 = arith.constant 6.400000e+01 : f32
      %35 = vector.broadcast %cst_21 : f32 to vector<8x1xf32>
      %36 = arith.divf %34, %35 : vector<8x1xf32>
      %cst_22 = arith.constant 9.99999974E-6 : f32
      %37 = vector.broadcast %cst_22 : f32 to vector<8x1xf32>
      %38 = arith.addf %36, %37 : vector<8x1xf32>
      %39 = math.rsqrt %38 : vector<8x1xf32>
      %40 = vector.broadcast %39 : vector<8x1xf32> to vector<8x64xf32>
      %41 = arith.mulf %31, %40 : vector<8x64xf32>
      %c0_23 = arith.constant 0 : index
      %c0_24 = arith.constant 0 : index
      %42 = vector.load %arg3[%c0_23, %c0_24] : memref<1x64xf32, #tpu.memory_space<vmem>>, vector<1x64xf32>
      %43 = vector.broadcast %42 : vector<1x64xf32> to vector<8x64xf32>
      %44 = arith.mulf %41, %43 : vector<8x64xf32>
      %c0_25 = arith.constant 0 : index
      %c0_26 = arith.constant 0 : index
      %45 = vector.load %arg4[%c0_25, %c0_26] : memref<1x64xf32, #tpu.memory_space<vmem>>, vector<1x64xf32>
      %46 = vector.broadcast %45 : vector<1x64xf32> to vector<8x64xf32>
      %47 = arith.addf %44, %46 : vector<8x64xf32>
      %48 = arith.truncf %47 : vector<8x64xf32> to vector<8x64xbf16>
      %c0_27 = arith.constant 0 : index
      %c0_28 = arith.constant 0 : index
      %49 = vector.load %arg12[%c0_27, %c0_28] : memref<8x64xbf16, #tpu.memory_space<vmem>>, vector<8x64xbf16>
      tpu.vector_store %arg12[%c0_27, %c0_28], %48 {strides = array<i32>} : memref<8x64xbf16, #tpu.memory_space<vmem>>, vector<8x64xbf16>,
      %cst_29 = arith.constant 0.000000e+00 : f32
      %50 = vector.broadcast %cst_29 : f32 to vector<8x64xf32>
      %c0_30 = arith.constant 0 : index
      %c0_31 = arith.constant 0 : index
      %51 = vector.load %arg13[%c0_30, %c0_31] : memref<8x64xf32, #tpu.memory_space<vmem>>, vector<8x64xf32>
      tpu.vector_store %arg13[%c0_30, %c0_31], %50 {strides = array<i32>} : memref<8x64xf32, #tpu.memory_space<vmem>>, vector<8x64xf32>,
    } else {
    }
    %c0 = arith.constant 0 : index
    %c0_1 = arith.constant 0 : index
    %3 = vector.load %arg12[%c0, %c0_1] : memref<8x64xbf16, #tpu.memory_space<vmem>>, vector<8x64xbf16>
    %c0_2 = arith.constant 0 : index
    %c0_3 = arith.constant 0 : index
    %4 = vector.load %arg5[%c0_2, %c0_3] : memref<64x128xbf16, #tpu.memory_space<vmem>>, vector<64x128xbf16>
    %cst = arith.constant dense<0.000000e+00> : vector<8x128xf32>
    %5 = tpu.matmul %3, %4, %cst {dimension_numbers = #tpu.dot_dimension_numbers<[1], [0], [0], [1], [0, 0, 1, 1], [], []>} : vector<8x64xbf16>, vector<64x128xbf16>, vector<8x128xf32> -> vector<8x128xf32>
    %c0_4 = arith.constant 0 : index
    %c0_5 = arith.constant 0 : index
    %6 = vector.load %arg6[%c0_4, %c0_5] : memref<1x128xf32, #tpu.memory_space<vmem>>, vector<1x128xf32>
    %7 = vector.broadcast %6 : vector<1x128xf32> to vector<8x128xf32>
    %8 = arith.addf %5, %7 : vector<8x128xf32>
    %9 = arith.negf %8 : vector<8x128xf32>
    %10 = math.exp %9 : vector<8x128xf32>
    %cst_6 = arith.constant 1.000000e+00 : f32
    %11 = vector.broadcast %cst_6 : f32 to vector<8x128xf32>
    %12 = arith.addf %11, %10 : vector<8x128xf32>
    %13 = arith.divf %11, %12 : vector<8x128xf32>
    %14 = arith.mulf %8, %13 : vector<8x128xf32>
    %c0_7 = arith.constant 0 : index
    %c0_8 = arith.constant 0 : index
    %15 = vector.load %arg13[%c0_7, %c0_8] : memref<8x64xf32, #tpu.memory_space<vmem>>, vector<8x64xf32>
    %16 = arith.truncf %14 : vector<8x128xf32> to vector<8x128xbf16>
    %c0_9 = arith.constant 0 : index
    %c0_10 = arith.constant 0 : index
    %17 = vector.load %arg7[%c0_9, %c0_10] : memref<128x64xbf16, #tpu.memory_space<vmem>>, vector<128x64xbf16>
    %cst_11 = arith.constant dense<0.000000e+00> : vector<8x64xf32>
    %18 = tpu.matmul %16, %17, %cst_11 {dimension_numbers = #tpu.dot_dimension_numbers<[1], [0], [0], [1], [0, 0, 1, 1], [], []>} : vector<8x128xbf16>, vector<128x64xbf16>, vector<8x64xf32> -> vector<8x64xf32>
    %19 = arith.addf %15, %18 : vector<8x64xf32>
    %c0_12 = arith.constant 0 : index
    %c0_13 = arith.constant 0 : index
    %20 = vector.load %arg13[%c0_12, %c0_13] : memref<8x64xf32, #tpu.memory_space<vmem>>, vector<8x64xf32>
    tpu.vector_store %arg13[%c0_12, %c0_13], %19 {strides = array<i32>} : memref<8x64xf32, #tpu.memory_space<vmem>>, vector<8x64xf32>,
    %c0_i32_14 = arith.constant 0 : i32
    %21 = arith.cmpi eq, %arg1, %c0_i32_14 : i32
    %22 = arith.extui %21 : i1 to i32
    %c0_i32_15 = arith.constant 0 : i32
    %23 = arith.cmpi ne, %22, %c0_i32_15 : i32
    scf.if %23 {
      %c0_16 = arith.constant 0 : index
      %c0_17 = arith.constant 0 : index
      %24 = vector.load %arg13[%c0_16, %c0_17] : memref<8x64xf32, #tpu.memory_space<vmem>>, vector<8x64xf32>
      %c0_18 = arith.constant 0 : index
      %c0_19 = arith.constant 0 : index
      %25 = vector.load %arg8[%c0_18, %c0_19] : memref<1x64xf32, #tpu.memory_space<vmem>>, vector<1x64xf32>
      %26 = vector.broadcast %25 : vector<1x64xf32> to vector<8x64xf32>
      %27 = arith.addf %24, %26 : vector<8x64xf32>
      %cst_20 = arith.constant 5.000000e-01 : f32
      %28 = vector.broadcast %cst_20 : f32 to vector<8x64xf32>
      %29 = arith.mulf %27, %28 : vector<8x64xf32>
      %c0_21 = arith.constant 0 : index
      %c0_22 = arith.constant 0 : index
      %30 = vector.load %arg2[%c0_21, %c0_22] : memref<8x64xbf16, #tpu.memory_space<vmem>>, vector<8x64xbf16>
      %31 = arith.extf %30 : vector<8x64xbf16> to vector<8x64xf32>
      %32 = arith.addf %29, %31 : vector<8x64xf32>
      %cst_23 = arith.constant dense<0.000000e+00> : vector<8xf32>
      %33 = vector.multi_reduction <add>, %32, %cst_23 [1] : vector<8x64xf32> to vector<8xf32>
      %34 = vector.shape_cast %33 : vector<8xf32> to vector<8x1xf32>
      %cst_24 = arith.constant 6.400000e+01 : f32
      %35 = vector.broadcast %cst_24 : f32 to vector<8x1xf32>
      %36 = arith.divf %34, %35 : vector<8x1xf32>
      %37 = vector.broadcast %36 : vector<8x1xf32> to vector<8x64xf32>
      %38 = arith.subf %32, %37 : vector<8x64xf32>
      %39 = arith.mulf %38, %38 : vector<8x64xf32>
      %cst_25 = arith.constant dense<0.000000e+00> : vector<8xf32>
      %40 = vector.multi_reduction <add>, %39, %cst_25 [1] : vector<8x64xf32> to vector<8xf32>
      %41 = vector.shape_cast %40 : vector<8xf32> to vector<8x1xf32>
      %cst_26 = arith.constant 6.400000e+01 : f32
      %42 = vector.broadcast %cst_26 : f32 to vector<8x1xf32>
      %43 = arith.divf %41, %42 : vector<8x1xf32>
      %cst_27 = arith.constant 9.99999974E-6 : f32
      %44 = vector.broadcast %cst_27 : f32 to vector<8x1xf32>
      %45 = arith.addf %43, %44 : vector<8x1xf32>
      %46 = math.rsqrt %45 : vector<8x1xf32>
      %47 = vector.broadcast %46 : vector<8x1xf32> to vector<8x64xf32>
      %48 = arith.mulf %38, %47 : vector<8x64xf32>
      %c0_28 = arith.constant 0 : index
      %c0_29 = arith.constant 0 : index
      %49 = vector.load %arg9[%c0_28, %c0_29] : memref<1x64xf32, #tpu.memory_space<vmem>>, vector<1x64xf32>
      %50 = vector.broadcast %49 : vector<1x64xf32> to vector<8x64xf32>
      %51 = arith.mulf %48, %50 : vector<8x64xf32>
      %c0_30 = arith.constant 0 : index
      %c0_31 = arith.constant 0 : index
      %52 = vector.load %arg10[%c0_30, %c0_31] : memref<1x64xf32, #tpu.memory_space<vmem>>, vector<1x64xf32>
      %53 = vector.broadcast %52 : vector<1x64xf32> to vector<8x64xf32>
      %54 = arith.addf %51, %53 : vector<8x64xf32>
      %55 = arith.truncf %54 : vector<8x64xf32> to vector<8x64xbf16>
      %c0_32 = arith.constant 0 : index
      %c0_33 = arith.constant 0 : index
      %56 = vector.load %arg11[%c0_32, %c0_33] : memref<8x64xbf16, #tpu.memory_space<vmem>>, vector<8x64xbf16>
      tpu.vector_store %arg11[%c0_32, %c0_33], %55 {strides = array<i32>} : memref<8x64xbf16, #tpu.memory_space<vmem>>, vector<8x64xbf16>,
    } else {
    }
    return
  }
  func.func @transform_0(%arg0: i32, %arg1: i32) -> (i32, i32) {
    %c0_i32 = arith.constant 0 : i32
    %c0_i32_0 = arith.constant 0 : i32
    return %arg0, %c0_i32 : i32, i32
  }
  func.func @transform_1(%arg0: i32, %arg1: i32) -> (i32, i32) {
    %c0_i32 = arith.constant 0 : i32
    %c0_i32_0 = arith.constant 0 : i32
    %c0_i32_1 = arith.constant 0 : i32
    return %c0_i32, %c0_i32_0 : i32, i32
  }
  func.func @transform_2(%arg0: i32, %arg1: i32) -> (i32, i32) {
    %c0_i32 = arith.constant 0 : i32
    %c0_i32_0 = arith.constant 0 : i32
    %c0_i32_1 = arith.constant 0 : i32
    return %c0_i32, %c0_i32_0 : i32, i32
  }
  func.func @transform_3(%arg0: i32, %arg1: i32) -> (i32, i32) {
    %c0_i32 = arith.constant 0 : i32
    %c0_i32_0 = arith.constant 0 : i32
    return %c0_i32, %arg1 : i32, i32
  }
  func.func @transform_4(%arg0: i32, %arg1: i32) -> (i32, i32) {
    %c0_i32 = arith.constant 0 : i32
    %c0_i32_0 = arith.constant 0 : i32
    return %c0_i32, %arg1 : i32, i32
  }
  func.func @transform_5(%arg0: i32, %arg1: i32) -> (i32, i32) {
    %c0_i32 = arith.constant 0 : i32
    %c0_i32_0 = arith.constant 0 : i32
    return %arg1, %c0_i32 : i32, i32
  }
  func.func @transform_6(%arg0: i32, %arg1: i32) -> (i32, i32) {
    %c0_i32 = arith.constant 0 : i32
    %c0_i32_0 = arith.constant 0 : i32
    %c0_i32_1 = arith.constant 0 : i32
    return %c0_i32, %c0_i32_0 : i32, i32
  }
  func.func @transform_7(%arg0: i32, %arg1: i32) -> (i32, i32) {
    %c0_i32 = arith.constant 0 : i32
    %c0_i32_0 = arith.constant 0 : i32
    %c0_i32_1 = arith.constant 0 : i32
    return %c0_i32, %c0_i32_0 : i32, i32
  }
  func.func @transform_8(%arg0: i32, %arg1: i32) -> (i32, i32) {
    %c0_i32 = arith.constant 0 : i32
    %c0_i32_0 = arith.constant 0 : i32
    %c0_i32_1 = arith.constant 0 : i32
    return %c0_i32, %c0_i32_0 : i32, i32
  }
  func.func @transform_9(%arg0: i32, %arg1: i32) -> (i32, i32) {
    %c0_i32 = arith.constant 0 : i32
    %c0_i32_0 = arith.constant 0 : i32
    return %arg0, %c0_i32 : i32, i32
  }
}

</mosaic_0001>

<bundles_post_ra>
// kernel: encoder_forward.25
= control target key start
LH: loop header
LB: loop body
LE: loop exit
PB: predicated region body
PF: predicated region fallthrough
CT: control target
= control target key end

     0   :  { %8 = vsyncpa [#allocation4], 0  ;;  %s541_s12 = smov 0   ;;  %s543_s13 = smov 0   ;;  %s581_s0 = inlined_call_operand.vmem [shape: bf16[32,16], index: 0, kind: input, shape index: {}]   ;;  %s582_s1 = inlined_call_operand.hbm [shape: bf16[16,64], index: 1, kind: input, shape index: {}]   ;;  %s583_s2 = inlined_call_operand.vmem [shape: f32[1,64], index: 2, kind: input, shape index: {}]   ;;  %s584_s3 = inlined_call_operand.vmem [shape: bf16[32,64], index: 3, kind: output, shape index: {}]  }
   0x1   :  { %s545_s14 = smov 0  }
   0x2 LB: > { %s402_s15 = sadd.s32 4294967295, %s515_s14   ;;  %s33_s16 = sadd.s32 1, %s511_s13  ;;  %s515_s14 = sphi %s545_s14, %s14_s14   ;;  %s511_s13 = sphi %s543_s13, %s586_s13   ;;  %s507_s12 = sphi %s541_s12, %s585_s12  }
   0x3   : > { %p35_p0 = scmp.ge.s32.totalorder %s33_s16, 4  ;;  %p404_p1 = scmp.ge.s32.totalorder %s515_s14, 1 }
   0x4   : > { %p148_p2 = scmp.lt.s32.totalorder %s515_s14, 5  ;;  %p428_p4 = scmp.eq.s32.totalorder %s402_s15, 0 }
   0x5   : > { %s588_s16 = smov (%p35_p0, %s33_s16), 0  ;;  %s163_s19 = sshll.u32 %s582_s1, 4  ;;  %s164_s19 = int_to_ptr.hbm [resolvable:$true] %s163_s19 }
   0x6   : > { %p149_p3 = pnand %p404_p1, %p148_p2  ;;  %s517_s20 = smov [#allocation3]  }
   0x7   : > { %s165_s21 = sshll.u32 %s517_s20, 4  ;;  %s518_s22 = smov 64   ;;  %s166_s21 = int_to_ptr.vmem [resolvable:$true] %s165_s21 }
   0x8   : > { %p424_p5 = pneg %p149_p3  ;;  %s519_s23 = smov 4  }
   0x9   : > { %197 = sbr.rel (%p149_p3) target bundleno = 162 (0xa2), region = 32 }
   0xa   : > { %p425_p6 = pnand %p428_p4, %p424_p5 }
   0xc   : > { %427 = dma.hbm_to_vmem [thread:$0]  (!%p425_p6), %s164_s19, 128, %s166_s21, [#allocation4], %s518_s22, %s518_s22, %s519_s23  }
   0xe   : > { %502 = dma.done.wait (%p428_p4), [#allocation4], 128  }
   0xf   : > { %504 = vsyncadd (%p428_p4), [#allocation4], 4294967168  ;;  %p229_p7 = scmp.lt.s32.totalorder %s507_s12, 3  ;;  %vm252_vm0 = vcmask 523264   ;;  %v520_v0 = vmov 0.0   ;;  %v419_v1 = vld [vmem:[#allocation3] sm:$0xff] }
  0x10   : > { %253 = vst.msk [vmem:[#allocation2] sm:$0xff] %vm252_vm0, %v520_v0  ;;  %275 = vmatpush.bf16.msra.mxu0 %v419_v1  ;;  %vm264_vm1 = vcmask 130048   ;;  %v458_v6 = vld [vmem:[%s583_s2] ss:$0 sm:$0xff]  ;;  %vm294_vm2 = vcmask 519168  }
  0x11   : > { %s590_s12 = smov (!%p229_p7, %s507_s12), 3 }
  0x12   : > { %s410_s24 = sshll.u32 %s590_s12, 2 }
  0x13   : > { %s235_s27 = scalar_lea.vmem %s581_s0, %s410_s24  ;;  %s246_s5 = scalar_lea.vmem %s584_s3, %s410_s24 }
  0x14   : > { %v255_v2 = vld [vmem:[%s235_s27] sm:$0xf] }
  0x15   : > { %416 = vmatmul.msk.bf16.vlgmr.msra.gmra.mxu0 %vm264_vm1, %v255_v2 }
  0x17   : > { %v254_v3 = vld [vmem:[#allocation2] sm:$0xff] }
  0x92   : > { %v277_v4 = vpop.f32.mrf.mxu0 }
  0x93   : > { %v281_v5 = vadd.f32 %v277_v4, %v254_v3 }
  0x95   : > { %283 = vst.msk [vmem:[#allocation2] sm:$0xff] %vm252_vm0, %v281_v5 }
  0x9a   : > { %v279_v7 = vpop.f32.mrf.mxu0 }
  0x9c   : > { %v287_v8 = vld [vmem:[#allocation2] sm:$0xff] }
  0x9d   : > { %v292_v9 = vadd.f32 %v458_v6, %v287_v8 }
  0x9f   : > { %v293_v10 = vpack.c.bf16 %v292_v9, %v292_v9 }
  0xa1   : > { %295 = vst.msk [vmem:[%s246_s5] sm:$0xf] %vm294_vm2, %v293_v10 }
  0xa2 PF: > { %s14_s14 = sadd.s32 1, %s515_s14   ;;  %s585_s12 = smov %s511_s13 }
  0xa3   : > { %p11_p8 = scmp.ge.s32.totalorder %s14_s14, 6   ;;  %s586_s13 = smov %s588_s16 }
  0xa5   :  { %13 = sbr.rel (!%p11_p8) target bundleno = 2 (0x2), region = 79 }
  0xaa   :  { %321 = vsyncpa [#allocation4], 1 }
  0xab   :  { %323 = vsyncpa [#allocation4 + $0x1], 1 }

// kernel: encoder_forward.26
= control target key start
LH: loop header
LB: loop body
LE: loop exit
PB: predicated region body
PF: predicated region fallthrough
CT: control target
= control target key end

     0   :  { %s843_s24 = smov 0   ;;  %s845_s25 = smov 0   ;;  %s942_s0 = inlined_call_operand.vmem [shape: bf16[32,64], index: 0, kind: input, shape index: {}]   ;;  %s943_s1 = inlined_call_operand.vmem [shape: f32[1,64], index: 1, kind: input, shape index: {}]   ;;  %s944_s2 = inlined_call_operand.vmem [shape: f32[1,64], index: 2, kind: input, shape index: {}]   ;;  %s945_s3 = inlined_call_operand.vmem [shape: bf16[64,128], index: 3, kind: input, shape index: {}]   ;;  %s946_s4 = inlined_call_operand.vmem [shape: f32[1,128], index: 4, kind: input, shape index: {}]   ;;  %s947_s5 = inlined_call_operand.vmem [shape: bf16[128,64], index: 5, kind: input, shape index: {}]   ;;  %s948_s6 = inlined_call_operand.vmem [shape: f32[1,64], index: 6, kind: input, shape index: {}]   ;;  %s949_s7 = inlined_call_operand.vmem [shape: bf16[32,64], index: 7, kind: output, shape index: {}]  }
   0x1   :  { %s847_s26 = smov 0  }
   0x2 LB: > { %s29_s27 = sadd.s32 1, %s795_s25  ;;  %p672_p0 = scmp.ge.s32.totalorder %s799_s26, 1  ;;  %s799_s26 = sphi %s847_s26, %s17_s26   ;;  %s795_s25 = sphi %s845_s25, %s951_s25   ;;  %s791_s24 = sphi %s843_s24, %s950_s24  }
   0x3   : > { %p31_p1 = scmp.ge.s32.totalorder %s29_s27, 4  ;;  %p276_p2 = scmp.lt.s32.totalorder %s799_s26, 5 }
   0x5   : > { %s953_s27 = smov (%p31_p1, %s29_s27), 0  ;;  %p277_p3 = pnand %p672_p0, %p276_p2 }
   0x6   : > { %p318_p4 = scmp.lt.s32.totalorder (!%p277_p3), %s791_s24, 3 }
   0x7   : > { %280 = sbr.rel (%p277_p3) target bundleno = 601 (0x259), region = 48 }
   0xc   : > { %s955_s24 = smov (!%p318_p4, %s791_s24), 3  ;;  %vm346_vm0 = vcmask 523264   ;;  %v801_v3 = vmov 64.0   ;;  %v730_v15 = vld [vmem:[%s945_s3 + $0x18] sm:$0xff]  ;;  %v729_v16 = vld [vmem:[%s945_s3 + $0x10] sm:$0xff]  ;;  %v728_v17 = vld [vmem:[%s945_s3 + $0x8] sm:$0xff] }
   0xd   : > { %s673_s28 = sshll.u32 %s955_s24, 2  ;;  %769 = vrcp.f32 %v801_v3  ;;  %435 = vmatpush.bf16.msra.mxu0 %v730_v15  ;;  %v727_v19 = vld [vmem:[%s945_s3] sm:$0xff]  ;;  %vm387_vm5 = vcmask 519168   ;;  %v738_v36 = vld [vmem:[%s947_s5 + $0x38] sm:$0xff]  ;;  %v737_v37 = vld [vmem:[%s947_s5 + $0x30] sm:$0xff]  ;;  %v802_v48 = vmov 0.0  }
   0xe   : > { %s869_s8 = scalar_lea.vmem %s942_s0, %s673_s28  ;;  %v765_v28 = vld [vmem:[%s943_s1] ss:$0 sm:$0xff]  ;;  %530 = vmatpush.bf16.msra.mxu1 %v738_v36  ;;  %v736_v38 = vld [vmem:[%s947_s5 + $0x28] sm:$0xff]  ;;  %v734_v40 = vld [vmem:[%s947_s5 + $0x18] sm:$0xff]  ;;  %389 = vst.msk [vmem:[#allocation3] sm:$0xff] %vm346_vm0, %v802_v48  ;;  %s338_s9 = scalar_lea.vmem %s949_s7, %s673_s28 }
   0xf   : > { %v344_v0 = vld [vmem:[%s869_s8] sm:$0xf]  ;;  %v733_v41 = vld [vmem:[%s947_s5 + $0x10] sm:$0xff]  ;;  %v732_v42 = vld [vmem:[%s947_s5 + $0x8] sm:$0xff] }
  0x10   : > { %v345_v1 = vunpack.c.l.bf16 %v344_v0  ;;  %v766_v30 = vld [vmem:[%s944_s2] ss:$0 sm:$0xff] }
  0x11   : > { %436 = vmatpush.bf16.msra.mxu0 %v729_v16  ;;  %v735_v39 = vld [vmem:[%s947_s5 + $0x20] sm:$0xff] }
  0x12   : > { %v347_v2 = vsel %vm346_vm0, %v345_v1, 0.0  ;;  %531 = vmatpush.bf16.msra.mxu1 %v737_v37  ;;  %v731_v43 = vld [vmem:[%s947_s5] sm:$0xff] }
  0x13   : > { %348 = vadd.xlane.f32.xlu0 %v347_v2  ;;  %v770_v4 = vpop.eup %769  ;;  %v767_v44 = vld [vmem:[%s946_s4] ss:$0 sm:$0xff] }
  0x14   : > { %v351_v5 = vmul.f32 64.0, %v770_v4  ;;  %vm355_vm1 = vweird.f32 %v770_v4  ;;  %v768_v3 = vld [vmem:[%s948_s6] ss:$0 sm:$0xff] }
  0x15   : > { %437 = vmatpush.bf16.msra.mxu0 %v728_v17  ;;  %v464_v0 = vld [vmem:[#allocation3] sm:$0xff] }
  0x16   : > { %v352_v6 = vsub.f32 1.0, %v351_v5  ;;  %532 = vmatpush.bf16.msra.mxu1 %v736_v38 }
  0x18   : > { %v353_v7 = vmul.f32 %v770_v4, %v352_v6 }
  0x19   : > { %438 = vmatpush.bf16.msra.mxu0 %v727_v19 }
  0x1a   : > { %v354_v8 = vadd.f32 %v770_v4, %v353_v7  ;;  %533 = vmatpush.bf16.msra.mxu1 %v735_v39 }
  0x1c   : > { %v356_v9 = vsel %vm355_vm1, %v770_v4, %v354_v8  ;;  %v555_v4 = vld [vmem:[%s869_s8] sm:$0xf] }
  0x1d   : > { %v556_v7 = vunpack.c.l.bf16 %v555_v4 }
  0x1e   : > { %534 = vmatpush.bf16.msra.mxu1 %v734_v40 }
  0x22   : > { %535 = vmatpush.bf16.msra.mxu1 %v733_v41 }
  0x26   : > { %536 = vmatpush.bf16.msra.mxu1 %v732_v42 }
  0x2a   : > { %537 = vmatpush.bf16.msra.mxu1 %v731_v43 }
  0x86   : > { %v349_v10 = vpop.xlane.xlu0 %348 }
  0x87   : > { %v357_v11 = vmul.f32 %v356_v9, %v349_v10 }
  0x89   : > { %v358_v12 = vsub.f32 %v345_v1, %v357_v11 }
  0x8b   : > { %v359_v13 = vmul.f32 %v358_v12, %v358_v12 }
  0x8d   : > { %v360_v14 = vsel %vm346_vm0, %v359_v13, 0.0 }
  0x8e   : > { %361 = vadd.xlane.f32.xlu0 %v360_v14 }
 0x101   : > { %v362_v18 = vpop.xlane.xlu0 %361 }
 0x102   : > { %v363_v20 = vmul.f32 %v362_v18, %v356_v9 }
 0x104   : > { %v364_v21 = vadd.f32 1e-05, %v363_v20 }
 0x106   : > { %771 = vrsqrt.f32 %v364_v21  ;;  %vm371_vm3 = vweird.f32 %v364_v21 }
 0x10c   : > { %v772_v22 = vpop.eup %771 }
 0x10d   : > { %v366_v23 = vmul.f32 %v772_v22, %v364_v21  ;;  %vm372_vm2 = vweird.f32 %v772_v22 }
 0x10e   : > { %vm373_vm4 = vmor %vm371_vm3, %vm372_vm2 }
 0x10f   : > { %v367_v24 = vmul.f32 %v772_v22, %v366_v23 }
 0x111   : > { %v368_v25 = vmul.f32 0.5, %v367_v24 }
 0x113   : > { %v369_v26 = vsub.f32 1.5, %v368_v25 }
 0x115   : > { %v370_v27 = vmul.f32 %v772_v22, %v369_v26 }
 0x117   : > { %v374_v29 = vsel %vm373_vm4, %v772_v22, %v370_v27 }
 0x118   : > { %v375_v31 = vmul.f32 %v374_v29, %v358_v12 }
 0x11a   : > { %v380_v32 = vmul.f32 %v765_v28, %v375_v31 }
 0x11c   : > { %v385_v33 = vadd.f32 %v766_v30, %v380_v32 }
 0x11e   : > { %v386_v34 = vpack.c.bf16 %v385_v33, %v385_v33 }
 0x120   : > { %388 = vst.msk [vmem:[#allocation2] sm:$0xf] %vm387_vm5, %v386_v34 }
 0x127   : > { %v390_v35 = vld [vmem:[#allocation2] sm:$0xf] }
 0x128   : > { %691 = vmatmul.msk.bf16.vlgmr.msra.gmra.mxu0 %vm346_vm0, %v390_v35 }
 0x1a5   : > { %v440_v45 = vpop.f32.mrf.mxu0 }
 0x1a6   : > { %v441_v46 = vadd.f32 %v767_v44, %v440_v45 }
 0x1a8   : > { %v692_v47 = vmul.f32 -1.442695, %v441_v46 }
 0x1aa   : > { %773 = vpow2.f32 %v692_v47 }
 0x1ad   : > { %v442_v49 = vpop.f32.mrf.mxu0 }
 0x1b0   : > { %v774_v50 = vpop.eup %773 }
 0x1b1   : > { %v447_v51 = vadd.f32 1.0, %v774_v50 }
 0x1b3   : > { %775 = vrcp.f32 %v447_v51  ;;  %v459_v55 = vand.u32 2147483648, %v447_v51  ;;  %v457_v57 = vand.u32 2147483647, %v447_v51  ;;  %vm453_vm7 = vweird.f32 %v447_v51 }
 0x1b5   : > { %v460_v59 = vor.u32 1.1754944e-38, %v459_v55  ;;  %vm458_vm9 = vcmp.eq.f32.partialorder %v457_v57, 8.507059e+37 }
 0x1b9   : > { %v776_v52 = vpop.eup %775 }
 0x1ba   : > { %v449_v53 = vmul.f32 %v776_v52, %v447_v51  ;;  %vm454_vm6 = vweird.f32 %v776_v52 }
 0x1bb   : > { %vm455_vm8 = vmor %vm453_vm7, %vm454_vm6 }
 0x1bc   : > { %v450_v54 = vsub.f32 1.0, %v449_v53 }
 0x1be   : > { %v451_v56 = vmul.f32 %v776_v52, %v450_v54 }
 0x1c0   : > { %v452_v58 = vadd.f32 %v776_v52, %v451_v56 }
 0x1c2   : > { %v456_v60 = vsel %vm455_vm8, %v776_v52, %v452_v58 }
 0x1c3   : > { %v461_v61 = vsel %vm458_vm9, %v460_v59, %v456_v60 }
 0x1c4   : > { %v463_v62 = vmul.f32 %v461_v61, %v441_v46 }
 0x1c6   : > { %v465_v63 = vpack.c.bf16 %v463_v62, %v463_v62 }
 0x1c8   : > { %538 = vmatmul.bf16.vlgmr.msra.gmra.mxu1 %v465_v63 }
 0x245   : > { %v539_v1 = vpop.f32.mrf.mxu1 }
 0x246   : > { %v543_v2 = vadd.f32 %v539_v1, %v464_v0 }
 0x248   : > { %544 = vst.msk [vmem:[#allocation3] sm:$0xff] %vm346_vm0, %v543_v2 }
 0x24d   : > { %v541_v5 = vpop.f32.mrf.mxu1 }
 0x24f   : > { %v548_v6 = vld [vmem:[#allocation3] sm:$0xff] }
 0x250   : > { %v553_v8 = vadd.f32 %v768_v3, %v548_v6 }
 0x252   : > { %v554_v9 = vmul.f32 0.5, %v553_v8 }
 0x254   : > { %v557_v10 = vadd.f32 %v556_v7, %v554_v9 }
 0x256   : > { %v558_v11 = vpack.c.bf16 %v557_v10, %v557_v10 }
 0x258   : > { %560 = vst.msk [vmem:[%s338_s9] sm:$0xf] %vm387_vm5, %v558_v11 }
 0x259 PF: > { %s17_s26 = sadd.s32 1, %s799_s26   ;;  %s950_s24 = smov %s795_s25 }
 0x25a   : > { %p14_p5 = scmp.ge.s32.totalorder %s17_s26, 6   ;;  %s951_s25 = smov %s953_s27 }
 0x25c   :  { %16 = sbr.rel (!%p14_p5) target bundleno = 2 (0x2), region = 95 }

// kernel: encoder_forward.27
= control target key start
LH: loop header
LB: loop body
LE: loop exit
PB: predicated region body
PF: predicated region fallthrough
CT: control target
= control target key end

     0   :  { %s516_s18 = smov 0   ;;  %s598_s0 = inlined_call_operand.vmem [shape: bf16[32,64], index: 0, kind: input, shape index: {}]   ;;  %s599_s1 = inlined_call_operand.vmem [shape: f32[1,64], index: 1, kind: input, shape index: {}]   ;;  %s600_s2 = inlined_call_operand.vmem [shape: f32[1,64], index: 2, kind: input, shape index: {}]   ;;  %s601_s3 = inlined_call_operand.vmem [shape: bf16[64,192], index: 3, kind: input, shape index: {}]   ;;  %s602_s4 = inlined_call_operand.vmem [shape: f32[1,192], index: 4, kind: input, shape index: {}]   ;;  %s603_s5 = inlined_call_operand.vmem [shape: bf16[32,192], index: 5, kind: output, shape index: {}]  }
   0x1 LB: > { %s409_s19 = sadd.s32 4294967295, %s483_s18   ;;  %p413_p0 = scmp.ge.s32.totalorder %s483_s18, 1  ;;  %s483_s18 = sphi %s516_s18, %s15_s18  }
   0x2   : > { %p186_p1 = scmp.lt.s32.totalorder %s483_s18, 5 }
   0x4   : > { %p187_p2 = pnand %p413_p0, %p186_p1 }
   0x5   : > { %p213_p3 = scmp.lt.s32.totalorder (!%p187_p2), %s409_s19, 3 }
   0x6   : > { %190 = sbr.rel (%p187_p2) target bundleno = 421 (0x1a5), region = 40 }
   0xb   : > { %s605_s19 = smov (!%p213_p3, %s409_s19), 3  ;;  %vm225_vm0 = vcmask 523264   ;;  %v485_v3 = vmov 64.0   ;;  %v443_v15 = vld [vmem:[%s601_s3 + $0x30] sm:$0xf]  ;;  %vm350_vm5 = vcmask 1043456  }
   0xc   : > { %s414_s20 = sshll.u32 %s605_s19, 2  ;;  %473 = vrcp.f32 %v485_v3  ;;  %v461_v16 = vld [vmem:[%s601_s3 + $0x34] sm:$0xf0]  ;;  %v460_v17 = vld [vmem:[%s601_s3 + $0x34] sm:$0xf]  ;;  %s453_s14 = sshll.u32 %s605_s19, 3 }
   0xd   : > { %s216_s23 = scalar_lea.vmem %s598_s0, %s414_s20  ;;  %v444_v18 = vor.u32 %v461_v16, %v443_v15  ;;  %v445_v19 = vld [vmem:[%s601_s3 + $0x38] sm:$0xf0]  ;;  %v435_v21 = vld [vmem:[%s601_s3 + $0x20] sm:$0xf]  ;;  %v459_v22 = vld [vmem:[%s601_s3 + $0x24] sm:$0xf0]  ;;  %s221_s17 = scalar_lea.vmem %s603_s5, %s453_s14 }
   0xe   : > { %v223_v0 = vld [vmem:[%s216_s23] sm:$0xf]  ;;  %v448_v20 = vor.u32 %v460_v17, %v445_v19  ;;  %v458_v23 = vld [vmem:[%s601_s3 + $0x24] sm:$0xf]  ;;  %v436_v24 = vor.u32 %v459_v22, %v435_v21  ;;  %v437_v25 = vld [vmem:[%s601_s3 + $0x28] sm:$0xf0] }
   0xf   : > { %v224_v1 = vunpack.c.l.bf16 %v223_v0  ;;  %327 = vmatpush.bf16.msra.mxu0 %v444_v18  ;;  %v440_v26 = vor.u32 %v458_v23, %v437_v25  ;;  %v427_v27 = vld [vmem:[%s601_s3 + $0x10] sm:$0xf]  ;;  %v457_v28 = vld [vmem:[%s601_s3 + $0x14] sm:$0xf0]  ;;  %v456_v29 = vld [vmem:[%s601_s3 + $0x14] sm:$0xf] }
  0x10   : > { %340 = vmatpush.bf16.msra.mxu1 %v448_v20  ;;  %v428_v30 = vor.u32 %v457_v28, %v427_v27  ;;  %v429_v31 = vld [vmem:[%s601_s3 + $0x18] sm:$0xf0]  ;;  %v419_v32 = vld [vmem:[%s601_s3] sm:$0xf]  ;;  %v455_v33 = vld [vmem:[%s601_s3 + $0x4] sm:$0xf0] }
  0x11   : > { %v226_v2 = vsel %vm225_vm0, %v224_v1, 0.0  ;;  %v432_v34 = vor.u32 %v456_v29, %v429_v31  ;;  %v454_v35 = vld [vmem:[%s601_s3 + $0x4] sm:$0xf]  ;;  %v421_v36 = vld [vmem:[%s601_s3 + $0x8] sm:$0xf0]  ;;  %v420_v37 = vor.u32 %v455_v33, %v419_v32  ;;  %vm351_vm6 = vcmask 523268  }
  0x12   : > { %227 = vadd.xlane.f32.xlu0 %v226_v2  ;;  %v474_v4 = vpop.eup %473  ;;  %v424_v38 = vor.u32 %v454_v35, %v421_v36  ;;  %v471_v48 = vld [vmem:[%s599_s1] ss:$0 sm:$0xff]  ;;  %vm352_vm7 = vmor %vm351_vm6, %vm350_vm5 }
  0x13   : > { %v230_v5 = vmul.f32 64.0, %v474_v4  ;;  %vm234_vm1 = vweird.f32 %v474_v4  ;;  %328 = vmatpush.bf16.msra.mxu0 %v436_v24  ;;  %v472_v51 = vld [vmem:[%s600_s2] ss:$0 sm:$0xff] }
  0x14   : > { %341 = vmatpush.bf16.msra.mxu1 %v440_v26  ;;  %v274_v55 = vld [vmem:[%s602_s4] sm:$0x3] }
  0x15   : > { %v231_v6 = vsub.f32 1.0, %v230_v5  ;;  %v276_v56 = vperm.slane %v274_v55, 0  ;;  %v277_v57 = vperm.slane %v274_v55, 1 }
  0x17   : > { %v232_v7 = vmul.f32 %v474_v4, %v231_v6  ;;  %329 = vmatpush.bf16.msra.mxu0 %v428_v30 }
  0x18   : > { %342 = vmatpush.bf16.msra.mxu1 %v432_v34 }
  0x19   : > { %v233_v8 = vadd.f32 %v474_v4, %v232_v7 }
  0x1b   : > { %v235_v9 = vsel %vm234_vm1, %v474_v4, %v233_v8  ;;  %330 = vmatpush.bf16.msra.mxu0 %v420_v37 }
  0x1c   : > { %343 = vmatpush.bf16.msra.mxu1 %v424_v38 }
  0x85   : > { %v228_v10 = vpop.xlane.xlu0 %227 }
  0x86   : > { %v236_v11 = vmul.f32 %v235_v9, %v228_v10 }
  0x88   : > { %v237_v12 = vsub.f32 %v224_v1, %v236_v11 }
  0x8a   : > { %v238_v13 = vmul.f32 %v237_v12, %v237_v12 }
  0x8c   : > { %v239_v14 = vsel %vm225_vm0, %v238_v13, 0.0 }
  0x8d   : > { %240 = vadd.xlane.f32.xlu0 %v239_v14 }
 0x100   : > { %v241_v39 = vpop.xlane.xlu0 %240 }
 0x101   : > { %v242_v40 = vmul.f32 %v241_v39, %v235_v9 }
 0x103   : > { %v243_v41 = vadd.f32 1e-05, %v242_v40 }
 0x105   : > { %475 = vrsqrt.f32 %v243_v41  ;;  %vm250_vm3 = vweird.f32 %v243_v41 }
 0x10b   : > { %v476_v42 = vpop.eup %475 }
 0x10c   : > { %v245_v43 = vmul.f32 %v476_v42, %v243_v41  ;;  %vm251_vm2 = vweird.f32 %v476_v42 }
 0x10d   : > { %vm252_vm4 = vmor %vm250_vm3, %vm251_vm2 }
 0x10e   : > { %v246_v44 = vmul.f32 %v476_v42, %v245_v43 }
 0x110   : > { %v247_v45 = vmul.f32 0.5, %v246_v44 }
 0x112   : > { %v248_v46 = vsub.f32 1.5, %v247_v45 }
 0x114   : > { %v249_v47 = vmul.f32 %v476_v42, %v248_v46 }
 0x116   : > { %v253_v49 = vsel %vm252_vm4, %v476_v42, %v249_v47 }
 0x117   : > { %v254_v50 = vmul.f32 %v253_v49, %v237_v12 }
 0x119   : > { %v259_v52 = vmul.f32 %v471_v48, %v254_v50 }
 0x11b   : > { %v264_v53 = vadd.f32 %v472_v51, %v259_v52 }
 0x11d   : > { %v265_v54 = vpack.c.bf16 %v264_v53, %v264_v53 }
 0x11f   : > { %449 = vmatmul.msk.bf16.vlgmr.msra.gmra.mxu0 %vm225_vm0, %v265_v54  ;;  %450 = vmatmul.msk.bf16.vlgmr.msra.gmra.mxu1 %vm225_vm0, %v265_v54 }
 0x19c   : > { %v332_v58 = vpop.f32.mrf.mxu0  ;;  %v345_v59 = vpop.f32.mrf.mxu1 }
 0x19d   : > { %v333_v60 = vadd.f32 %v332_v58, %v276_v56  ;;  %v346_v61 = vadd.f32 %v345_v59, %v277_v57 }
 0x19f   : > { %v349_v62 = vpack.c.bf16 %v346_v61, %v333_v60 }
 0x1a1   : > { %353 = vst.msk [vmem:[%s221_s17] sm:$0xff] %vm352_vm7, %v349_v62 }
 0x1a4   : > { %v334_v63 = vpop.f32.mrf.mxu0  ;;  %v347_v0 = vpop.f32.mrf.mxu1 }
 0x1a5 PF: > { %s15_s18 = sadd.s32 1, %s483_s18  }
 0x1a6   : > { %p12_p4 = scmp.ge.s32.totalorder %s15_s18, 6  }
 0x1a8   :  { %14 = sbr.rel (!%p12_p4) target bundleno = 1 (0x1), region = 70 }

// kernel: encoder_forward.28
= control target key start
LH: loop header
LB: loop body
LE: loop exit
PB: predicated region body
PF: predicated region fallthrough
CT: control target
= control target key end

     0   :  { %s1669_s30 = smov 0   ;;  %s1671_s10 = smov 0   ;;  %s1935_s0 = inlined_call_operand.vmem [shape: bf16[2,16,192], index: 0, kind: input, shape index: {}]   ;;  %s1936_s1 = inlined_call_operand.vmem [shape: f32[2,1,16], index: 1, kind: input, shape index: {}]   ;;  %s1937_s2 = inlined_call_operand.vmem [shape: f32[16,1], index: 2, kind: input, shape index: {}]   ;;  %s1938_s3 = inlined_call_operand.vmem [shape: f32[1,16], index: 3, kind: input, shape index: {}]   ;;  %s1939_s4 = inlined_call_operand.vmem [shape: f32[1,16], index: 4, kind: input, shape index: {}]   ;;  %s1940_s5 = inlined_call_operand.vmem [shape: bf16[64,64], index: 5, kind: input, shape index: {}]   ;;  %s1941_s6 = inlined_call_operand.vmem [shape: f32[1,64], index: 6, kind: input, shape index: {}]   ;;  %s1942_s7 = inlined_call_operand.vmem [shape: bf16[2,16,64], index: 7, kind: input, shape index: {}]   ;;  %s1943_s8 = inlined_call_operand.vmem [shape: bf16[2,16,64], index: 8, kind: output, shape index: {0}]   ;;  %s1944_s9 = inlined_call_operand.vmem [shape: bf16[2,16,64], index: 9, kind: output, shape index: {1}]  }
   0x1   :  { %s1673_s11 = smov 0   ;;  %s1675_s12 = smov 0  }
   0x2   :  { %s1677_s13 = smov 0  }
   0x3 LB: > { %s29_s14 = sadd.s32 1, %s1598_s11  ;;  %s32_s15 = sadd.s32 1, %s1602_s12  ;;  %s1606_s13 = sphi %s1677_s13, %s20_s13   ;;  %s1602_s12 = sphi %s1675_s12, %s1948_s12   ;;  %s1598_s11 = sphi %s1673_s11, %s1947_s11   ;;  %s1594_s10 = sphi %s1671_s10, %s1946_s10   ;;  %s1590_s30 = sphi %s1669_s30, %s1945_s30  }
   0x4   : > { %p30_p0 = scmp.ge.s32.totalorder %s29_s14, 2  ;;  %p1418_p1 = scmp.ge.s32.totalorder %s1606_s13, 1 }
   0x5   : > { %p329_p2 = scmp.lt.s32.totalorder %s1606_s13, 5 }
   0x6   : > { %s1950_s14 = smov (%p30_p0, %s29_s14), 0  ;;  %s1952_s15 = smov (!%p30_p0, %s32_s15), %s1602_s12 }
   0x7   : > { %p330_p3 = pnand %p1418_p1, %p329_p2  ;;  %p34_p4 = scmp.ge.s32.totalorder %s1952_s15, 2 }
   0x8   : > { %p387_p5 = scmp.lt.s32.totalorder (!%p330_p3), %s1594_s10, 1  ;;  %s1608_s20 = smov (!%p330_p3), 80  }
   0x9   : > { %s1954_s15 = smov (%p34_p4, %s1952_s15), 0  ;;  %333 = sbr.rel (%p330_p3) target bundleno = 1578 (0x62a), region = 52 }
   0xa   : > { %s1609_s21 = smov (!%p330_p3), 96   ;;  %s1610_s22 = smov (!%p330_p3), 112  }
   0xb   : > { %s1611_s23 = smov (!%p330_p3), 64   ;;  %s1427_s24 = sshll.u32 (!%p330_p3), %s1590_s30, 3 }
   0xc   : > { %s616_s28 = scalar_lea.vmem (!%p330_p3), %s1937_s2, %s1427_s24  ;;  %s1617_s17 = smov (!%p330_p3), 32  }
   0xd   : > { %s1618_s18 = smov (!%p330_p3), 48   ;;  %p397_p6 = scmp.lt.s32.totalorder (!%p330_p3), %s1590_s30, 1 }
   0xe   : > { %s1956_s10 = smov (!%p387_p5, %s1594_s10), 1  ;;  %v617_v21 = vld [vmem:[%s616_s28] sm:$0xff]  ;;  %v1612_v22 = vmov 0   ;;  %vm546_vm0 = vcmask 130048   ;;  %v1613_v58 = vmov 0.0   ;;  %vm873_vm7 = vcmask 1047556  }
   0xf   : > { %s1468_s16 = sshll.u32 %s1956_s10, 4  ;;  %1532 = vset.pattern.permute.xlu0 %v1612_v22  ;;  %v1438_v23 = vadd.f32 -1.0, %v617_v21  ;;  %v619_v50 = vld [vmem:[%s1939_s4] sm:$0x1]  ;;  %vm980_vm8 = vcmask 261120   ;;  %vm983_vm9 = vcmask 392192  }
  0x10   : > { %s391_s19 = scalar_lea.vmem %s1935_s0, %s1468_s16  ;;  %vm636_vm1 = vcmp.gt.f32.partialorder %v619_v50, 0.5  ;;  %v1533_v54 = vld [vmem:[%s1938_s3] ss:$0 sm:$0xff]  ;;  %s1616_s16 = smov 16   ;;  %vm1013_vm10 = vcmask 523264   ;;  %vm1031_vm11 = vcmask 519168  }
  0x11   : > { %v1707_v0 = vld [vmem:[%s391_s19] sm:$0xff]  ;;  %v1714_v1 = vld [vmem:[%s391_s19 + $0x8] sm:$0xff]  ;;  %s449_s25 = scalar_lea.vmem %s391_s19, %s1427_s24  ;;  %v637_v52 = vsel %vm636_vm1, 1, %v1612_v22  ;;  %s1958_s30 = smov (!%p397_p6, %s1590_s30), 1 }
  0x12   : > { %433 = vrot.lane.b32.xlu1 %v1707_v0, %s1608_s20  ;;  %429 = vrot.lane.b32.xlu0 %v1707_v0, %s1609_s21  ;;  %v1432_v2 = vld [vmem:[%s391_s19] sm:$0xf]  ;;  %v1469_v3 = vld [vmem:[%s391_s19 + $0x4] sm:$0xf0]  ;;  %v638_v53 = vperm.slane %v637_v52, 0  ;;  %v438_v50 = vrot.slane %v1714_v1, 4 }
  0x13   : > { %425 = vrot.lane.b32.xlu2 %v1707_v0, %s1610_s22  ;;  %v1433_v4 = vor.u32 %v1469_v3, %v1432_v2  ;;  %v450_v5 = vld [vmem:[%s449_s25] sm:$0xff]  ;;  %s1421_s19 = sshll.u32 %s1956_s10, 1 }
  0x14   : > { %vm639_vm2 = vcmp.eq.s32.totalorder %v638_v53, 1  ;;  %v767_v52 = vunpack.c.l.b16 %v438_v50  ;;  %v1474_v53 = vld [vmem:[%s1940_s5 + $0x18] sm:$0xff] }
  0x1a   : > { %435 = vrot.lane.b32.xlu1 %v1714_v1, %s1608_s20  ;;  %431 = vrot.lane.b32.xlu0 %v1714_v1, %s1609_s21 }
  0x1b   : > { %427 = vrot.lane.b32.xlu2 %v1714_v1, %s1610_s22 }
  0x23   : > { %470 = vrot.lane.b32.xlu2 %v1433_v4, %s1611_s23 }
  0x2b   : > { %456 = vrot.lane.b32.xlu2 %v450_v5, %s1608_s20  ;;  %s400_s20 = sadd.s32 %s1421_s19, %s1958_s30 }
  0x6d   : > { %v426_v8 = vpop.permute.xlu2 %425 }
  0x6e   : > { %v460_v18 = vunpack.c.l.b16 %v426_v8  ;;  %v439_v32 = vrot.slane %v426_v8, 4 }
  0x70   : > { %v786_v37 = vunpack.c.l.b16 %v439_v32 }
  0x75   : > { %v428_v17 = vpop.permute.xlu2 %427 }
  0x76   : > { %v461_v19 = vunpack.c.l.b16 %v428_v17  ;;  %v440_v33 = vrot.slane %v428_v17, 4 }
  0x78   : > { %v467_v20 = vpack.c.b16 %v461_v19, %v460_v18  ;;  %v787_v38 = vunpack.c.l.b16 %v440_v33 }
  0x7a   : > { %v788_v43 = vpack.c.b16 %v787_v38, %v786_v37 }
  0x7d   : > { %v471_v26 = vpop.permute.xlu2 %470 }
  0x84   : > { %v434_v6 = vpop.permute.xlu1 %433  ;;  %v430_v7 = vpop.permute.xlu0 %429 }
  0x85   : > { %v464_v11 = vunpack.c.l.b16 %v434_v6  ;;  %v462_v12 = vunpack.c.l.b16 %v430_v7  ;;  %v457_v28 = vpop.permute.xlu2 %456  ;;  %v441_v31 = vrot.slane %v430_v7, 4  ;;  %v443_v42 = vrot.slane %v434_v6, 4 }
  0x87   : > { %v806_v36 = vunpack.c.l.b16 %v441_v31  ;;  %v826_v46 = vunpack.c.l.b16 %v443_v42 }
  0x8c   : > { %v436_v9 = vpop.permute.xlu1 %435  ;;  %v432_v10 = vpop.permute.xlu0 %431 }
  0x8d   : > { %v465_v13 = vunpack.c.l.b16 %v436_v9  ;;  %v463_v14 = vunpack.c.l.b16 %v432_v10  ;;  %v442_v29 = vrot.slane %v432_v10, 4  ;;  %v444_v39 = vrot.slane %v436_v9, 4 }
  0x8f   : > { %v469_v15 = vpack.c.b16 %v465_v13, %v464_v11  ;;  %v468_v16 = vpack.c.b16 %v463_v14, %v462_v12  ;;  %v807_v34 = vunpack.c.l.b16 %v442_v29  ;;  %v827_v44 = vunpack.c.l.b16 %v444_v39 }
  0x91   : > { %476 = vrot.lane.b32.xlu1 %v469_v15, %s1611_s23  ;;  %474 = vrot.lane.b32.xlu0 %v468_v16, %s1611_s23  ;;  %v808_v41 = vpack.c.b16 %v807_v34, %v806_v36  ;;  %v1729_v49 = vpack.c.b16 %v827_v44, %v826_v46 }
  0x99   : > { %472 = vrot.lane.b32.xlu0 %v467_v20, %s1611_s23  ;;  %454 = vrot.lane.b32.xlu1 %v450_v5, %s1609_s21  ;;  %s394_s21 = scalar_lea.vmem %s1936_s1, %s1956_s10 }
  0x9a   : > { %v615_v56 = vld [vmem:[%s394_s21] sm:$0x1] }
  0x9b   : > { %v1534_v57 = vld [vmem:[%s394_s21] ss:$0 sm:$0xff]  ;;  %v644_v60 = vsub.f32 1.0, %v615_v56  ;;  %s1853_s21 = sshll.u32 %s400_s20, 2 }
  0x9c   : > { %s402_s24 = scalar_lea.vmem %s1942_s7, %s1853_s21  ;;  %s410_s27 = scalar_lea.vmem %s1943_s8, %s1853_s21 }
  0x9d   : > { %v645_v62 = vmul.f32 -1e+09, %v644_v60 }
  0x9f   : > { %v701_v2 = vperm.slane %v645_v62, 0 }
  0xa1   : > { %452 = vrot.lane.b32.xlu0 %v450_v5, %s1610_s22 }
  0xa9   : > { %632 = vperm.xlu0 %1532, %v1438_v23  }
  0xb1   : > { %625 = vperm.xlu0 %1532, %v617_v21  }
 0x103   : > { %v477_v24 = vpop.permute.xlu1 %476  ;;  %v475_v25 = vpop.permute.xlu0 %474 }
 0x104   : > { %1526 = vxpose.binary.xlu1.c.b16.start.end [1/2] (short) (narrow) %v477_v24, %v475_v25, 16 }
 0x10b   : > { %v473_v27 = vpop.permute.xlu0 %472  ;;  %v455_v30 = vpop.permute.xlu1 %454 }
 0x10c   : > { %1529 = vxpose.binary.xlu2.c.b16.start.end [1/2] (short) (narrow) %v473_v27, %v471_v26, 16 }
 0x113   : > { %v453_v47 = vpop.permute.xlu0 %452 }
 0x11b   : > { %v633_v51 = vpop.permute.xlu0 %632 }
 0x11c   : > { %vm635_vm3 = vcmp.eq.f32.partialorder %v1533_v54, %v633_v51 }
 0x11d   : > { %vm640_vm4 = vmand %vm635_vm3, %vm639_vm2 }
 0x123   : > { %v626_v55 = vpop.permute.xlu0 %625 }
 0x124   : > { %vm628_vm5 = vcmp.eq.f32.partialorder %v1533_v54, %v626_v55 }
 0x125   : > { %vm641_vm6 = vmor %vm628_vm5, %vm640_vm4 }
 0x126   : > { %v1439_v59 = vsel %vm641_vm6, 1.0, %v1613_v58  ;;  %v1472_v58 = vld [vmem:[%s1940_s5 + $0x8] sm:$0xff] }
 0x127   : > { %v649_v61 = vmul.f32 %v1534_v57, %v1439_v59  ;;  %v1473_v57 = vld [vmem:[%s1940_s5 + $0x10] sm:$0xff]  ;;  %v1471_v59 = vld [vmem:[%s1940_s5] sm:$0xff] }
 0x129   : > { %v650_v63 = vsub.f32 1.0, %v649_v61 }
 0x12b   : > { %v651_v4 = vmul.f32 -1e+09, %v650_v63 }
 0x1ad   : > { %v1530_v35 = vpop.trf.xlu2 }
 0x1ae   : > { %557 = vmatpush.bf16.msra.mxu0 %v1530_v35 }
 0x1b0   : > { %v1527_v40 = vpop.trf.xlu1 }
 0x1b1   : > { %1434 = vmatmul.msk.bf16.vlgmr.msra.gmra.mxu0 %vm546_vm0, %v450_v5  ;;  %589 = vmatpush.bf16.msra.mxu2 %v1527_v40 }
 0x1b4   : > { %1436 = vmatmul.msk.bf16.vlgmr.msra.gmra.mxu2 %vm546_vm0, %v455_v30 }
 0x1b5   : > { %820 = vmatpush.bf16.msrb.mxu2 %v808_v41  ;;  %v1531_v45 = vpop.trf.xlu2 }
 0x1b6   : > { %573 = vmatpush.bf16.msra.mxu1 %v1531_v45 }
 0x1b8   : > { %v1528_v48 = vpop.trf.xlu1 }
 0x1b9   : > { %1063 = vmatpush.bf16.msra.mxu2 %v788_v43  ;;  %1435 = vmatmul.msk.bf16.vlgmr.msra.gmra.mxu1 %vm546_vm0, %v453_v47 }
 0x1ba   : > { %800 = vmatpush.bf16.msrb.mxu1 %v788_v43  ;;  %605 = vmatpush.bf16.msra.mxu3 %v1528_v48  ;;  %v437_v48 = vrot.slane %v1707_v0, 4 }
 0x1bc   : > { %v766_v51 = vunpack.c.l.b16 %v437_v48 }
 0x1bd   : > { %1437 = vmatmul.msk.bf16.vlgmr.msra.gmra.mxu3 %vm546_vm0, %v457_v28 }
 0x1be   : > { %840 = vmatpush.bf16.msrb.mxu3 %v1729_v49  ;;  %v768_v54 = vpack.c.b16 %v767_v52, %v766_v51 }
 0x1c0   : > { %780 = vmatpush.bf16.msrb.mxu0 %v768_v54  ;;  %1047 = vmatpush.bf16.msra.mxu1 %v768_v54 }
 0x1c2   : > { %1079 = vmatpush.bf16.msra.mxu3 %v808_v41 }
 0x1c4   : > { %1020 = vmatpush.bf16.msra.mxu0 %v1474_v53 }
 0x1c8   : > { %1021 = vmatpush.bf16.msra.mxu0 %v1473_v57 }
 0x1cc   : > { %1022 = vmatpush.bf16.msra.mxu0 %v1472_v58 }
 0x1d0   : > { %1023 = vmatpush.bf16.msra.mxu0 %v1471_v59 }
 0x22e   : > { %v559_v3 = vpop.f32.mrf.mxu0 }
 0x22f   : > { %v611_v5 = vmul.f32 0.25, %v559_v3 }
 0x231   : > { %v652_v6 = vadd.f32 %v651_v4, %v611_v5  ;;  %v1744_v7 = vadd.f32 %v701_v2, %v611_v5 }
 0x233   : > { %v656_v8 = vsel %vm546_vm0, %v652_v6, -inf  ;;  %v707_v0 = vsel %vm546_vm0, %v1744_v7, -inf }
 0x234   : > { %657 = vmax.xlane.f32.xlu1 %v656_v8 }
 0x236   : > { %v561_v9 = vpop.f32.mrf.mxu0  ;;  %v575_v10 = vpop.f32.mrf.mxu1 }
 0x237   : > { %v612_v11 = vmul.f32 0.25, %v575_v10  ;;  %v591_v12 = vpop.f32.mrf.mxu2 }
 0x238   : > { %v613_v13 = vmul.f32 0.25, %v591_v12 }
 0x239   : > { %v1747_v14 = vadd.f32 %v701_v2, %v612_v11  ;;  %v653_v22 = vadd.f32 %v651_v4, %v612_v11 }
 0x23a   : > { %v654_v15 = vadd.f32 %v651_v4, %v613_v13  ;;  %v1749_v16 = vadd.f32 %v701_v2, %v613_v13 }
 0x23b   : > { %v659_v26 = vsel %vm546_vm0, %v653_v22, -inf  ;;  %v710_v55 = vsel %vm546_vm0, %v1747_v14, -inf }
 0x23c   : > { %v662_v17 = vsel %vm546_vm0, %v654_v15, -inf  ;;  %v713_v56 = vsel %vm546_vm0, %v1749_v16, -inf }
 0x23d   : > { %663 = vmax.xlane.f32.xlu0 %v662_v17 }
 0x23e   : > { %v577_v18 = vpop.f32.mrf.mxu1 }
 0x23f   : > { %v593_v19 = vpop.f32.mrf.mxu2 }
 0x240   : > { %v607_v20 = vpop.f32.mrf.mxu3 }
 0x241   : > { %v614_v21 = vmul.f32 0.25, %v607_v20 }
 0x243   : > { %v655_v23 = vadd.f32 %v651_v4, %v614_v21  ;;  %v1752_v24 = vadd.f32 %v701_v2, %v614_v21 }
 0x245   : > { %v665_v25 = vsel %vm546_vm0, %v655_v23, -inf  ;;  %660 = vmax.xlane.f32.xlu0 %v659_v26  ;;  %v716_v1 = vsel %vm546_vm0, %v1752_v24, -inf }
 0x246   : > { %666 = vmax.xlane.f32.xlu2 %v665_v25 }
 0x248   : > { %v609_v27 = vpop.f32.mrf.mxu3 }
 0x2a7   : > { %v658_v28 = vpop.xlane.xlu1 %657 }
 0x2a8   : > { %v668_v29 = vsub.f32 %v652_v6, %v658_v28 }
 0x2aa   : > { %v672_v30 = vmul.f32 1.442695, %v668_v29 }
 0x2ac   : > { %1536 = vpow2.f32 %v672_v30  ;;  %v1614_v30 = vmov 1983009808  }
 0x2b0   : > { %v664_v31 = vpop.xlane.xlu0 %663 }
 0x2b1   : > { %v670_v32 = vsub.f32 %v654_v15, %v664_v31  ;;  %v864_v31 = vunpack.c.l.s4 %v1614_v30 }
 0x2b2   : > { %v1537_v33 = vpop.eup %1536 }
 0x2b3   : > { %v676_v34 = vmul.f32 1.442695, %v670_v32  ;;  %v680_v35 = vsel %vm546_vm0, %v1537_v33, 0.0 }
 0x2b4   : > { %681 = vadd.xlane.f32.xlu0 %v680_v35 }
 0x2b5   : > { %1538 = vpow2.f32 %v676_v34 }
 0x2b8   : > { %v661_v37 = vpop.xlane.xlu0 %660 }
 0x2b9   : > { %v667_v36 = vpop.xlane.xlu2 %666  ;;  %v669_v41 = vsub.f32 %v653_v22, %v661_v37  ;;  %v1798_v37 = vunpack.c.0.s8 %v864_v31 }
 0x2ba   : > { %v671_v38 = vsub.f32 %v655_v23, %v667_v36 }
 0x2bb   : > { %v1539_v39 = vpop.eup %1538  ;;  %v674_v43 = vmul.f32 1.442695, %v669_v41 }
 0x2bc   : > { %v678_v40 = vmul.f32 1.442695, %v671_v38  ;;  %v686_v42 = vsel %vm546_vm0, %v1539_v39, 0.0 }
 0x2bd   : > { %687 = vadd.xlane.f32.xlu0 %v686_v42 }
 0x2be   : > { %1540 = vpow2.f32 %v678_v40  ;;  %v1615_v40 = vmov 1934713408  }
 0x2bf   : > { %1542 = vpow2.f32 %v674_v43  ;;  %v878_v41 = vunpack.c.l.s4 %v1615_v40 }
 0x2c1   : > { %v1801_v52 = vunpack.c.0.s8 %v878_v41 }
 0x2c4   : > { %v1541_v44 = vpop.eup %1540 }
 0x2c5   : > { %v689_v45 = vsel %vm546_vm0, %v1541_v44, 0.0  ;;  %v1543_v46 = vpop.eup %1542 }
 0x2c6   : > { %690 = vadd.xlane.f32.xlu0 %v689_v45  ;;  %v683_v47 = vsel %vm546_vm0, %v1543_v46, 0.0 }
 0x2ce   : > { %684 = vadd.xlane.f32.xlu0 %v683_v47 }
 0x2d6   : > { %711 = vmax.xlane.f32.xlu0 %v710_v55 }
 0x2de   : > { %714 = vmax.xlane.f32.xlu0 %v713_v56 }
 0x2e6   : > { %708 = vmax.xlane.f32.xlu0 %v707_v0 }
 0x2ee   : > { %717 = vmax.xlane.f32.xlu0 %v716_v1 }
 0x327   : > { %v682_v60 = vpop.xlane.xlu0 %681 }
 0x328   : > { %1544 = vrcp.f32 %v682_v60 }
 0x32e   : > { %v1545_v61 = vpop.eup %1544 }
 0x32f   : > { %v696_v62 = vmul.f32 %v1545_v61, %v1537_v33 }
 0x330   : > { %v688_v63 = vpop.xlane.xlu0 %687 }
 0x331   : > { %1546 = vrcp.f32 %v688_v63  ;;  %v762_v2 = vpack.c.bf16 %v696_v62, %v696_v62 }
 0x333   : > { %1440 = vmatmul.msk.bf16.vlgmr.msrb.gmra.mxu0 %vm546_vm0, %v762_v2 }
 0x334   : > { %1095 = vmatpush.bf16.msrb.mxu0 %v1729_v49 }
 0x337   : > { %v1547_v3 = vpop.eup %1546 }
 0x338   : > { %v698_v4 = vmul.f32 %v1547_v3, %v1539_v39 }
 0x339   : > { %v691_v5 = vpop.xlane.xlu0 %690 }
 0x33a   : > { %1548 = vrcp.f32 %v691_v5  ;;  %v764_v6 = vpack.c.bf16 %v698_v4, %v698_v4 }
 0x33c   : > { %1442 = vmatmul.msk.bf16.vlgmr.msrb.gmra.mxu2 %vm546_vm0, %v764_v6 }
 0x340   : > { %v1549_v8 = vpop.eup %1548 }
 0x341   : > { %v699_v9 = vmul.f32 %v1549_v8, %v1541_v44  ;;  %v685_v10 = vpop.xlane.xlu0 %684 }
 0x342   : > { %1550 = vrcp.f32 %v685_v10 }
 0x343   : > { %v765_v11 = vpack.c.bf16 %v699_v9, %v699_v9 }
 0x345   : > { %1443 = vmatmul.msk.bf16.vlgmr.msrb.gmra.mxu3 %vm546_vm0, %v765_v11 }
 0x348   : > { %v1551_v12 = vpop.eup %1550 }
 0x349   : > { %v697_v13 = vmul.f32 %v1551_v12, %v1543_v46  ;;  %v712_v15 = vpop.xlane.xlu0 %711 }
 0x34a   : > { %v720_v17 = vsub.f32 %v1747_v14, %v712_v15 }
 0x34b   : > { %v763_v49 = vpack.c.bf16 %v697_v13, %v697_v13 }
 0x34c   : > { %v725_v18 = vmul.f32 1.442695, %v720_v17 }
 0x34d   : > { %1441 = vmatmul.msk.bf16.vlgmr.msrb.gmra.mxu1 %vm546_vm0, %v763_v49 }
 0x34e   : > { %1552 = vpow2.f32 %v725_v18  ;;  %1244 = vmatpush.bf16.msrb.mxu1 %v1474_v53 }
 0x351   : > { %v715_v19 = vpop.xlane.xlu0 %714 }
 0x352   : > { %v721_v20 = vsub.f32 %v1749_v16, %v715_v19  ;;  %1245 = vmatpush.bf16.msrb.mxu1 %v1473_v57 }
 0x354   : > { %v1553_v21 = vpop.eup %1552  ;;  %v727_v22 = vmul.f32 1.442695, %v721_v20 }
 0x355   : > { %v734_v23 = vsel %vm546_vm0, %v1553_v21, 0.0 }
 0x356   : > { %1554 = vpow2.f32 %v727_v22  ;;  %735 = vadd.xlane.f32.xlu0 %v734_v23  ;;  %1246 = vmatpush.bf16.msrb.mxu1 %v1472_v58 }
 0x359   : > { %v1794_v27 = vpop.xlane.xlu0 %708 }
 0x35a   : > { %1247 = vmatpush.bf16.msrb.mxu1 %v1471_v59 }
 0x35c   : > { %v1790_v25 = vpop.eup %1554 }
 0x35d   : > { %v737_v14 = vsel %vm546_vm0, %v1790_v25, 0.0 }
 0x35e   : > { %738 = vadd.xlane.f32.xlu2 %v737_v14 }
 0x361   : > { %v1796_v29 = vpop.xlane.xlu0 %717 }
 0x3b0   : > { %v782_v26 = vpop.f32.mrf.mxu0 }
 0x3b1   : > { %v846_v33 = vpack.c.bf16 %v782_v26, %v782_v26 }
 0x3b3   : > { %v853_v46 = vshrl.u32 %v846_v33, 16 }
 0x3b8   : > { %v784_v28 = vpop.f32.mrf.mxu0 }
 0x3bf   : > { %v822_v16 = vpop.f32.mrf.mxu2 }
 0x3c0   : > { %v848_v32 = vpack.c.bf16 %v822_v16, %v822_v16 }
 0x3c2   : > { %v859_v42 = vshrl.u32 %v848_v32, 16 }
 0x3c7   : > { %v824_v34 = vpop.f32.mrf.mxu2 }
 0x3c8   : > { %v842_v35 = vpop.f32.mrf.mxu3 }
 0x3c9   : > { %v849_v36 = vpack.c.bf16 %v842_v35, %v842_v35  ;;  %v736_v38 = vpop.xlane.xlu0 %735 }
 0x3ca   : > { %1556 = vrcp.f32 %v736_v38  ;;  %v802_v39 = vpop.f32.mrf.mxu1 }
 0x3cb   : > { %v858_v43 = vpack.i.b16 %v849_v36, %v848_v32  ;;  %v860_v44 = vshrl.u32 %v849_v36, 16  ;;  %v847_v45 = vpack.c.bf16 %v802_v39, %v802_v39 }
 0x3cd   : > { %v861_v47 = vpack.i.b16 %v860_v44, %v859_v42  ;;  %v871_v48 = vperm.slane %v858_v43, %v1798_v37  ;;  %v852_v50 = vpack.i.b16 %v847_v45, %v846_v33  ;;  %v854_v51 = vshrl.u32 %v847_v45, 16 }
 0x3cf   : > { %v872_v53 = vrot.slane %v871_v48, 4  ;;  %v898_v54 = vperm.slane %v861_v47, %v1798_v37  ;;  %v855_v55 = vpack.i.b16 %v854_v51, %v853_v46  ;;  %v866_v56 = vperm.slane %v852_v50, %v1798_v37 }
 0x3d0   : > { %v1557_v0 = vpop.eup %1556  ;;  %v844_v1 = vpop.f32.mrf.mxu3 }
 0x3d1   : > { %v899_v57 = vrot.slane %v898_v54, 4  ;;  %v748_v58 = vmul.f32 %v1557_v0, %v1553_v21  ;;  %v874_v59 = vsel %vm873_vm7, %v872_v53, %v866_v56  ;;  %v875_v60 = vrot.slane %v866_v56, 4  ;;  %v739_v61 = vpop.xlane.xlu2 %738 }
 0x3d2   : > { %v880_v62 = vperm.slane %v874_v59, %v1801_v52  ;;  %v893_v63 = vperm.slane %v855_v55, %v1798_v37  ;;  %1558 = vrcp.f32 %v739_v61  ;;  %v804_v2 = vpop.f32.mrf.mxu1  ;;  %v719_v61 = vsub.f32 %v1744_v7, %v1794_v27 }
 0x3d3   : > { %v1034_v3 = vpack.c.bf16 %v748_v58, %v748_v58  ;;  %v876_v4 = vsel %vm873_vm7, %v871_v48, %v875_v60  ;;  %v722_v60 = vsub.f32 %v1752_v24, %v1796_v29 }
 0x3d4   : > { %v884_v5 = vperm.slane %v876_v4, %v1801_v52  ;;  %v900_v6 = vsel %vm873_vm7, %v899_v57, %v893_v63  ;;  %v901_v8 = vrot.slane %v893_v63, 4  ;;  %v885_v10 = vrot.slane %v880_v62, 4 }
 0x3d5   : > { %v906_v9 = vperm.slane %v900_v6, %v1801_v52  ;;  %1462 = vmatmul.msk.bf16.vlgmr.msra.gmra.mxu2 %vm546_vm0, %v1034_v3  ;;  %v723_v63 = vmul.f32 1.442695, %v719_v61 }
 0x3d6   : > { %v887_v11 = vrot.slane %v884_v5, 4  ;;  %v902_v12 = vsel %vm873_vm7, %v898_v54, %v901_v8  ;;  %v886_v20 = vsel %vm873_vm7, 0, %v885_v10 }
 0x3d7   : > { %v910_v13 = vperm.slane %v902_v12, %v1801_v52  ;;  %v911_v49 = vrot.slane %v906_v9, 4 }
 0x3d8   : > { %v1559_v15 = vpop.eup %1558  ;;  %v888_v17 = vsel %vm873_vm7, 0, %v887_v11  ;;  %v915_v23 = vsel %vm873_vm7, %v887_v11, %v880_v62  ;;  %v729_v62 = vmul.f32 1.442695, %v722_v60 }
 0x3d9   : > { %v913_v18 = vrot.slane %v910_v13, 4  ;;  %v920_v19 = vrot.slane %v888_v17, 4  ;;  %v749_v21 = vmul.f32 %v1559_v15, %v1790_v25  ;;  %v912_v30 = vsel %vm873_vm7, 0, %v911_v49 }
 0x3da   : > { %v919_v31 = vperm.slane %v915_v23, %v1798_v37  ;;  %1560 = vpow2.f32 %v729_v62  ;;  %v1864_v23 = vld [vmem:[%s1941_s6] ss:$0 sm:$0xff] }
 0x3db   : > { %v914_v22 = vsel %vm873_vm7, 0, %v913_v18  ;;  %v921_v14 = vsel %vm873_vm7, %v920_v19, %v886_v20  ;;  %v1035_v16 = vpack.c.bf16 %v749_v21, %v749_v21  ;;  %v934_v32 = vsel %vm873_vm7, %v913_v18, %v906_v9 }
 0x3dc   : > { %v925_v26 = vperm.slane %v921_v14, %v1798_v37  ;;  %v939_v28 = vrot.slane %v914_v22, 4  ;;  %v938_v38 = vperm.slane %v934_v32, %v1798_v37  ;;  %1562 = vpow2.f32 %v723_v63  ;;  %v1859_v22 = vld [vmem:[%s402_s24] sm:$0xf] }
 0x3dd   : > { %1463 = vmatmul.msk.bf16.vlgmr.msra.gmra.mxu3 %vm546_vm0, %v1035_v16  ;;  %v752_v14 = vunpack.c.l.bf16 %v1859_v22 }
 0x3de   : > { %v940_v33 = vsel %vm873_vm7, %v939_v28, %v912_v30  ;;  %v926_v25 = vrot.slane %v925_v26, 4 }
 0x3df   : > { %v944_v34 = vperm.slane %v940_v33, %v1798_v37 }
 0x3e0   : > { %v927_v35 = vsel %vm873_vm7, %v926_v25, %v919_v31  ;;  %v1561_v2 = vpop.eup %1560 }
 0x3e1   : > { %v931_v36 = vperm.slane %v927_v35, %v1801_v52  ;;  %v945_v39 = vrot.slane %v944_v34, 4  ;;  %v740_v4 = vsel %vm546_vm0, %v1561_v2, 0.0 }
 0x3e2   : > { %v1563_v3 = vpop.eup %1562 }
 0x3e3   : > { %v946_v40 = vsel %vm873_vm7, %v945_v39, %v938_v38  ;;  %v932_v41 = vrot.slane %v931_v36, 4  ;;  %v956_v43 = vshrl.u32 %v931_v36, 16  ;;  %v731_v5 = vsel %vm546_vm0, %v1563_v3, 0.0 }
 0x3e4   : > { %v950_v42 = vperm.slane %v946_v40, %v1801_v52 }
 0x3e5   : > { %v933_v45 = vsel %vm873_vm7, 0, %v932_v41 }
 0x3e6   : > { %v957_v44 = vshrl.u32 %v950_v42, 16  ;;  %v951_v46 = vrot.slane %v950_v42, 4  ;;  %v955_v47 = vpack.i.b16 %v950_v42, %v931_v36  ;;  %v962_v53 = vshrl.u32 %v933_v45, 16 }
 0x3e8   : > { %v958_v48 = vpack.i.b16 %v957_v44, %v956_v43  ;;  %v952_v50 = vsel %vm873_vm7, 0, %v951_v46 }
 0x3e9   : > { %v961_v51 = vpack.i.b16 %v952_v50, %v933_v45  ;;  %v963_v54 = vshrl.u32 %v952_v50, 16 }
 0x3ea   : > { %v965_v55 = vunpack.c.l.b16 %v958_v48 }
 0x3eb   : > { %v969_v56 = vunpack.c.l.b16 %v961_v51  ;;  %v964_v0 = vpack.i.b16 %v963_v54, %v962_v53 }
 0x3ec   : > { %v966_v1 = vpack.c.b16 %v965_v55, %v965_v55 }
 0x3ed   : > { %v970_v57 = vpack.c.b16 %v969_v56, %v969_v56  ;;  %v973_v58 = vunpack.c.l.b16 %v964_v0 }
 0x3ee   : > { %967 = vrot.lane.b32.xlu1 %v966_v1, %s1616_s16 }
 0x3ef   : > { %971 = vrot.lane.b32.xlu0 %v970_v57, %s1617_s17  ;;  %v974_v59 = vpack.c.b16 %v973_v58, %v973_v58 }
 0x3f1   : > { %975 = vrot.lane.b32.xlu2 %v974_v59, %s1618_s18 }
 0x418   : > { %741 = vadd.xlane.f32.xlu1 %v740_v4 }
 0x419   : > { %732 = vadd.xlane.f32.xlu0 %v731_v5 }
 0x44b   : > { %v976_v29 = vpop.permute.xlu2 %975 }
 0x458   : > { %v1065_v6 = vpop.f32.mrf.mxu2 }
 0x459   : > { %v1102_v33 = vpack.c.bf16 %v1065_v6, %v1065_v6 }
 0x45b   : > { %v1109_v41 = vshrl.u32 %v1102_v33, 16 }
 0x460   : > { %v968_v8 = vpop.permute.xlu1 %967  ;;  %v1067_v9 = vpop.f32.mrf.mxu2 }
 0x461   : > { %v979_v24 = vsel %vm546_vm0, %v955_v47, %v968_v8  ;;  %v1081_v7 = vpop.f32.mrf.mxu3  ;;  %v972_v27 = vpop.permute.xlu0 %971 }
 0x462   : > { %v982_v10 = vsel %vm980_vm8, %v979_v24, %v972_v27  ;;  %v1103_v32 = vpack.c.bf16 %v1081_v7, %v1081_v7 }
 0x463   : > { %v985_v11 = vsel %vm983_vm9, %v982_v10, %v976_v29 }
 0x464   : > { %1460 = vmatmul.msk.bf16.vlgmr.msra.gmra.mxu0 %vm1013_vm10, %v985_v11  ;;  %v1114_v38 = vshrl.u32 %v1103_v32, 16 }
 0x469   : > { %v1083_v12 = vpop.f32.mrf.mxu3 }
 0x48b   : > { %v742_v13 = vpop.xlane.xlu1 %741 }
 0x48c   : > { %1564 = vrcp.f32 %v742_v13  ;;  %v733_v15 = vpop.xlane.xlu0 %732 }
 0x48d   : > { %1566 = vrcp.f32 %v733_v15 }
 0x492   : > { %v1565_v17 = vpop.eup %1564 }
 0x493   : > { %v1567_v49 = vpop.eup %1566  ;;  %v750_v18 = vmul.f32 %v1565_v17, %v1561_v2 }
 0x494   : > { %v747_v19 = vmul.f32 %v1567_v49, %v1563_v3 }
 0x495   : > { %v1036_v20 = vpack.c.bf16 %v750_v18, %v750_v18 }
 0x496   : > { %v1033_v21 = vpack.c.bf16 %v747_v19, %v747_v19 }
 0x497   : > { %1464 = vmatmul.msk.bf16.vlgmr.msrb.gmra.mxu0 %vm546_vm0, %v1036_v20 }
 0x498   : > { %1461 = vmatmul.msk.bf16.vlgmr.msra.gmra.mxu1 %vm546_vm0, %v1033_v21 }
 0x4e1   : > { %v1025_v26 = vpop.f32.mrf.mxu0 }
 0x4e2   : > { %v1026_v28 = vadd.f32 %v1864_v23, %v1025_v26 }
 0x4e4   : > { %v1029_v16 = vadd.f32 %v1026_v28, %v752_v14 }
 0x4e6   : > { %v1030_v30 = vpack.c.bf16 %v1029_v16, %v1029_v16 }
 0x4e8   : > { %1032 = vst.msk [vmem:[%s410_s27] sm:$0xf] %vm1031_vm11, %v1030_v30 }
 0x4e9   : > { %v1027_v31 = vpop.f32.mrf.mxu0 }
 0x514   : > { %v1097_v25 = vpop.f32.mrf.mxu0 }
 0x515   : > { %v1104_v34 = vpack.c.bf16 %v1097_v25, %v1097_v25  ;;  %v1049_v35 = vpop.f32.mrf.mxu1 }
 0x516   : > { %v1101_v36 = vpack.c.bf16 %v1049_v35, %v1049_v35 }
 0x517   : > { %v1113_v39 = vpack.i.b16 %v1104_v34, %v1103_v32  ;;  %v1115_v40 = vshrl.u32 %v1104_v34, 16 }
 0x518   : > { %v1107_v42 = vpack.i.b16 %v1102_v33, %v1101_v36  ;;  %v1108_v43 = vshrl.u32 %v1101_v36, 16 }
 0x519   : > { %v1116_v44 = vpack.i.b16 %v1115_v40, %v1114_v38  ;;  %v1126_v45 = vperm.slane %v1113_v39, %v1798_v37 }
 0x51a   : > { %v1110_v46 = vpack.i.b16 %v1109_v41, %v1108_v43  ;;  %v1121_v47 = vperm.slane %v1107_v42, %v1798_v37 }
 0x51b   : > { %v1127_v48 = vrot.slane %v1126_v45, 4  ;;  %v1152_v50 = vperm.slane %v1116_v44, %v1798_v37 }
 0x51c   : > { %v1129_v51 = vrot.slane %v1121_v47, 4  ;;  %v1147_v53 = vperm.slane %v1110_v46, %v1798_v37  ;;  %v1099_v54 = vpop.f32.mrf.mxu0 }
 0x51d   : > { %v1153_v55 = vrot.slane %v1152_v50, 4  ;;  %v1128_v56 = vsel %vm873_vm7, %v1127_v48, %v1121_v47  ;;  %v1051_v0 = vpop.f32.mrf.mxu1 }
 0x51e   : > { %v1130_v1 = vsel %vm873_vm7, %v1126_v45, %v1129_v51  ;;  %v1134_v57 = vperm.slane %v1128_v56, %v1801_v52  ;;  %v1155_v58 = vrot.slane %v1147_v53, 4 }
 0x51f   : > { %v1138_v59 = vperm.slane %v1130_v1, %v1801_v52  ;;  %v1154_v60 = vsel %vm873_vm7, %v1153_v55, %v1147_v53 }
 0x520   : > { %v1156_v61 = vsel %vm873_vm7, %v1152_v50, %v1155_v58  ;;  %v1160_v62 = vperm.slane %v1154_v60, %v1801_v52  ;;  %v1139_v63 = vrot.slane %v1134_v57, 4 }
 0x521   : > { %v1141_v2 = vrot.slane %v1138_v59, 4  ;;  %v1164_v3 = vperm.slane %v1156_v61, %v1801_v52 }
 0x522   : > { %v1165_v5 = vrot.slane %v1160_v62, 4  ;;  %v1140_v24 = vsel %vm873_vm7, 0, %v1139_v63 }
 0x523   : > { %v1142_v4 = vsel %vm873_vm7, 0, %v1141_v2  ;;  %v1167_v6 = vrot.slane %v1164_v3, 4  ;;  %v1169_v8 = vsel %vm873_vm7, %v1141_v2, %v1134_v57 }
 0x524   : > { %v1174_v9 = vrot.slane %v1142_v4, 4  ;;  %v1166_v11 = vsel %vm873_vm7, 0, %v1165_v5  ;;  %v1173_v15 = vperm.slane %v1169_v8, %v1798_v37 }
 0x525   : > { %v1168_v7 = vsel %vm873_vm7, 0, %v1167_v6  ;;  %v1188_v27 = vsel %vm873_vm7, %v1167_v6, %v1160_v62 }
 0x526   : > { %v1175_v29 = vsel %vm873_vm7, %v1174_v9, %v1140_v24  ;;  %v1193_v10 = vrot.slane %v1168_v7, 4  ;;  %v1192_v19 = vperm.slane %v1188_v27, %v1798_v37 }
 0x527   : > { %v1179_v12 = vperm.slane %v1175_v29, %v1798_v37 }
 0x528   : > { %v1194_v13 = vsel %vm873_vm7, %v1193_v10, %v1166_v11 }
 0x529   : > { %v1180_v17 = vrot.slane %v1179_v12, 4  ;;  %v1198_v49 = vperm.slane %v1194_v13, %v1798_v37 }
 0x52b   : > { %v1181_v18 = vsel %vm873_vm7, %v1180_v17, %v1173_v15  ;;  %v1199_v20 = vrot.slane %v1198_v49, 4 }
 0x52c   : > { %v1185_v21 = vperm.slane %v1181_v18, %v1801_v52 }
 0x52d   : > { %v1200_v26 = vsel %vm873_vm7, %v1199_v20, %v1192_v19 }
 0x52e   : > { %v1204_v28 = vperm.slane %v1200_v26, %v1801_v52  ;;  %v1186_v16 = vrot.slane %v1185_v21, 4  ;;  %v1210_v30 = vshrl.u32 %v1185_v21, 16 }
 0x530   : > { %v1211_v31 = vshrl.u32 %v1204_v28, 16  ;;  %v1187_v32 = vsel %vm873_vm7, 0, %v1186_v16  ;;  %v1205_v33 = vrot.slane %v1204_v28, 4  ;;  %v1209_v25 = vpack.i.b16 %v1204_v28, %v1185_v21 }
 0x531   : > { %v1216_v38 = vshrl.u32 %v1187_v32, 16 }
 0x532   : > { %v1212_v34 = vpack.i.b16 %v1211_v31, %v1210_v30  ;;  %v1206_v35 = vsel %vm873_vm7, 0, %v1205_v33 }
 0x533   : > { %v1215_v36 = vpack.i.b16 %v1206_v35, %v1187_v32  ;;  %v1217_v37 = vshrl.u32 %v1206_v35, 16 }
 0x534   : > { %v1219_v39 = vunpack.c.l.b16 %v1212_v34 }
 0x535   : > { %v1218_v40 = vpack.i.b16 %v1217_v37, %v1216_v38  ;;  %v1223_v42 = vunpack.c.l.b16 %v1215_v36 }
 0x536   : > { %v1220_v41 = vpack.c.b16 %v1219_v39, %v1219_v39 }
 0x537   : > { %v1224_v52 = vpack.c.b16 %v1223_v42, %v1223_v42  ;;  %v1227_v43 = vunpack.c.l.b16 %v1218_v40 }
 0x538   : > { %1221 = vrot.lane.b32.xlu2 %v1220_v41, %s1616_s16  ;;  %s418_s16 = scalar_lea.vmem %s1944_s9, %s1853_s21 }
 0x539   : > { %v1228_v44 = vpack.c.b16 %v1227_v43, %v1227_v43 }
 0x540   : > { %1225 = vrot.lane.b32.xlu2 %v1224_v52, %s1617_s17 }
 0x548   : > { %1229 = vrot.lane.b32.xlu2 %v1228_v44, %s1618_s18 }
 0x592   : > { %v1222_v45 = vpop.permute.xlu2 %1221 }
 0x593   : > { %v1233_v47 = vsel %vm546_vm0, %v1209_v25, %v1222_v45 }
 0x59a   : > { %v1226_v46 = vpop.permute.xlu2 %1225 }
 0x59b   : > { %v1235_v48 = vsel %vm980_vm8, %v1233_v47, %v1226_v46 }
 0x5a2   : > { %v1230_v50 = vpop.permute.xlu2 %1229 }
 0x5a3   : > { %v1237_v51 = vsel %vm983_vm9, %v1235_v48, %v1230_v50 }
 0x5a4   : > { %1465 = vmatmul.msk.bf16.vlgmr.msrb.gmra.mxu1 %vm1013_vm10, %v1237_v51 }
 0x621   : > { %v1249_v53 = vpop.f32.mrf.mxu1 }
 0x622   : > { %v1250_v54 = vadd.f32 %v1864_v23, %v1249_v53 }
 0x624   : > { %v1253_v55 = vadd.f32 %v1250_v54, %v752_v14 }
 0x626   : > { %v1254_v56 = vpack.c.bf16 %v1253_v55, %v1253_v55 }
 0x628   : > { %1255 = vst.msk [vmem:[%s418_s16] sm:$0xf] %vm1031_vm11, %v1254_v56 }
 0x629   : > { %v1251_v0 = vpop.f32.mrf.mxu1 }
 0x62a PF: > { %s20_s13 = sadd.s32 1, %s1606_s13   ;;  %s1945_s30 = smov %s1598_s11 }
 0x62b   : > { %p17_p7 = scmp.ge.s32.totalorder %s20_s13, 6   ;;  %s1946_s10 = smov %s1602_s12 }
 0x62c   : > { %s1947_s11 = smov %s1950_s14  ;;  %s1948_s12 = smov %s1954_s15 }
 0x62d   :  { %19 = sbr.rel (!%p17_p7) target bundleno = 3 (0x3), region = 102 }

// kernel: encoder_forward.30
= control target key start
LH: loop header
LB: loop body
LE: loop exit
PB: predicated region body
PF: predicated region fallthrough
CT: control target
= control target key end

     0   :  { %s523_s18 = smov 0   ;;  %s568_s0 = inlined_call_operand.vmem [shape: bf16[4,14,64], index: 0, kind: input, shape index: {}]   ;;  %s569_s1 = inlined_call_operand.vmem [shape: f32[7,64], index: 1, kind: input, shape index: {}]   ;;  %s570_s2 = inlined_call_operand.vmem [shape: f32[1,64], index: 2, kind: input, shape index: {}]   ;;  %s571_s3 = inlined_call_operand.vmem [shape: bf16[4,8,64], index: 3, kind: output, shape index: {0}]   ;;  %s572_s4 = inlined_call_operand.vmem [shape: f32[32,64], index: 4, kind: output, shape index: {1}]   ;;  %s573_s5 = inlined_call_operand.vmem [shape: f32[32,64], index: 5, kind: output, shape index: {2}]  }
   0x1 LB: > { %s463_s19 = sadd.s32 4294967295, %s491_s18   ;;  %p467_p0 = scmp.ge.s32.totalorder %s491_s18, 1  ;;  %s491_s18 = sphi %s523_s18, %s16_s18  }
   0x2   : > { %p192_p1 = scmp.lt.s32.totalorder %s491_s18, 5 }
   0x4   : > { %p193_p2 = pnand %p467_p0, %p192_p1 }
   0x5   : > { %p227_p3 = scmp.lt.s32.totalorder (!%p193_p2), %s463_s19, 3 }
   0x6   : > { %196 = sbr.rel (%p193_p2) target bundleno = 53 (0x35), region = 32 }
   0xb   : > { %s575_s19 = smov (!%p227_p3, %s463_s19), 3  ;;  %v248_v0 = vld [vmem:[%s569_s1] sm:$0x7f]  ;;  %vm256_vm0 = vcmask 1046528   ;;  %vm267_vm1 = vcmask 1045504   ;;  %vm278_vm2 = vcmask 1044480   ;;  %v341_v56 = vlaneseq }
   0xc   : > { %s537_s22 = sshll.u32 %s575_s19, 3  ;;  %v249_v1 = vperm.slane %v248_v0, 0  ;;  %v251_v2 = vperm.slane %v248_v0, 1  ;;  %v262_v3 = vperm.slane %v248_v0, 2  ;;  %v273_v6 = vperm.slane %v248_v0, 3  ;;  %s470_s28 = sshll.u32 %s575_s19, 2 }
   0xd   : > { %s231_s25 = scalar_lea.vmem %s568_s0, %s537_s22  ;;  %v284_v7 = vperm.slane %v248_v0, 4  ;;  %v295_v10 = vperm.slane %v248_v0, 5  ;;  %v306_v11 = vperm.slane %v248_v0, 6  ;;  %vm289_vm3 = vcmask 1043456   ;;  %v484_v48 = vld [vmem:[%s570_s2] ss:$0 sm:$0xff]  ;;  %s235_s6 = scalar_lea.vmem %s571_s3, %s470_s28 }
   0xe   : > { %v244_v4 = vld [vmem:[%s231_s25] sm:$0xf]  ;;  %v245_v5 = vld [vmem:[%s231_s25 + $0x4] sm:$0x7]  ;;  %vm300_vm4 = vcmask 1042432   ;;  %vm311_vm5 = vcmask 1041408   ;;  %s239_s9 = scalar_lea.vmem %s572_s4, %s537_s22  ;;  %s243_s12 = scalar_lea.vmem %s573_s5, %s537_s22 }
   0xf   : > { %v246_v8 = vunpack.c.l.bf16 %v244_v4  ;;  %v247_v9 = vunpack.c.l.bf16 %v245_v5  ;;  %vm325_vm6 = vcmask 523264   ;;  %vm323_vm7 = vcmask 519168  }
  0x10   : > { %v342_v61 = vshrl.u32 %v341_v56, 7 }
  0x11   : > { %v250_v12 = vmul.f32 %v249_v1, %v246_v8  ;;  %v252_v13 = vmul.f32 %v251_v2, %v246_v8  ;;  %v253_v14 = vmul.f32 %v251_v2, %v247_v9  ;;  %v263_v15 = vmul.f32 %v262_v3, %v246_v8 }
  0x12   : > { %v264_v16 = vmul.f32 %v262_v3, %v247_v9  ;;  %v274_v17 = vmul.f32 %v273_v6, %v246_v8  ;;  %v275_v18 = vmul.f32 %v273_v6, %v247_v9  ;;  %v285_v19 = vmul.f32 %v284_v7, %v246_v8 }
  0x13   : > { %v257_v20 = vrot.slane %v252_v13, 1  ;;  %v258_v21 = vrot.slane %v253_v14, 1  ;;  %v268_v22 = vrot.slane %v263_v15, 2  ;;  %v286_v23 = vmul.f32 %v284_v7, %v247_v9 }
  0x14   : > { %v269_v24 = vrot.slane %v264_v16, 2  ;;  %v279_v25 = vrot.slane %v274_v17, 3  ;;  %v280_v26 = vrot.slane %v275_v18, 3  ;;  %v290_v27 = vrot.slane %v285_v19, 4 }
  0x15   : > { %v259_v28 = vsel %vm256_vm0, %v257_v20, %v258_v21  ;;  %v291_v29 = vrot.slane %v286_v23, 4  ;;  %v296_v30 = vmul.f32 %v295_v10, %v246_v8  ;;  %v297_v31 = vmul.f32 %v295_v10, %v247_v9 }
  0x16   : > { %v261_v32 = vadd.f32 %v259_v28, %v250_v12  ;;  %v270_v33 = vsel %vm267_vm1, %v268_v22, %v269_v24  ;;  %v307_v34 = vmul.f32 %v306_v11, %v246_v8  ;;  %v281_v35 = vsel %vm278_vm2, %v279_v25, %v280_v26 }
  0x17   : > { %v301_v36 = vrot.slane %v296_v30, 5  ;;  %v302_v37 = vrot.slane %v297_v31, 5  ;;  %v308_v38 = vmul.f32 %v306_v11, %v247_v9  ;;  %v292_v40 = vsel %vm289_vm3, %v290_v27, %v291_v29 }
  0x18   : > { %v272_v39 = vadd.f32 %v270_v33, %v261_v32  ;;  %v312_v41 = vrot.slane %v307_v34, 6  ;;  %vm343_vm8 = vcmp.eq.s32.totalorder %v342_v61, 0 }
  0x19   : > { %v313_v42 = vrot.slane %v308_v38, 6  ;;  %v303_v44 = vsel %vm300_vm4, %v301_v36, %v302_v37 }
  0x1a   : > { %v283_v43 = vadd.f32 %v281_v35, %v272_v39 }
  0x1b   : > { %v314_v46 = vsel %vm311_vm5, %v312_v41, %v313_v42 }
  0x1c   : > { %v294_v45 = vadd.f32 %v292_v40, %v283_v43 }
  0x1e   : > { %v305_v47 = vadd.f32 %v303_v44, %v294_v45 }
  0x20   : > { %v316_v49 = vadd.f32 %v314_v46, %v305_v47 }
  0x22   : > { %v321_v50 = vadd.f32 %v484_v48, %v316_v49 }
  0x24   : > { %v322_v51 = vpack.c.bf16 %v321_v50, %v321_v50  ;;  %v326_v52 = vsel %vm325_vm6, %v321_v50, 0.0  ;;  %v333_v53 = vmul.f32 %v321_v50, %v321_v50 }
  0x25   : > { %v327_v54 = vrot.slane %v326_v52, 4 }
  0x26   : > { %324 = vst.msk [vmem:[%s235_s6] sm:$0xf] %vm323_vm7, %v322_v51  ;;  %v334_v55 = vsel %vm325_vm6, %v333_v53, 0.0 }
  0x27   : > { %v328_v57 = vadd.f32 %v327_v54, %v326_v52  ;;  %v335_v58 = vrot.slane %v334_v55, 4 }
  0x29   : > { %v329_v59 = vrot.slane %v328_v57, 2  ;;  %v336_v60 = vadd.f32 %v335_v58, %v334_v55 }
  0x2b   : > { %v330_v62 = vadd.f32 %v329_v59, %v328_v57  ;;  %v337_v63 = vrot.slane %v336_v60, 2 }
  0x2d   : > { %v331_v0 = vrot.slane %v330_v62, 1  ;;  %v338_v1 = vadd.f32 %v337_v63, %v336_v60 }
  0x2f   : > { %v332_v2 = vadd.f32 %v331_v0, %v330_v62  ;;  %v339_v3 = vrot.slane %v338_v1, 1 }
  0x31   : > { %v344_v4 = vsel %vm343_vm8, %v332_v2, 0.0  ;;  %v340_v5 = vadd.f32 %v339_v3, %v338_v1 }
  0x32   : > { %345 = vst.msk [vmem:[%s239_s9] sm:$0xff] %vm325_vm6, %v344_v4 }
  0x33   : > { %v346_v6 = vsel %vm343_vm8, %v340_v5, 0.0 }
  0x34   : > { %347 = vst.msk [vmem:[%s243_s12] sm:$0xff] %vm325_vm6, %v346_v6 }
  0x35 PF: > { %s16_s18 = sadd.s32 1, %s491_s18  }
  0x36   : > { %p13_p4 = scmp.ge.s32.totalorder %s16_s18, 6  }
  0x38   :  { %15 = sbr.rel (!%p13_p4) target bundleno = 1 (0x1), region = 86 }

// kernel: encoder_forward.29
= control target key start
LH: loop header
LB: loop body
LE: loop exit
PB: predicated region body
PF: predicated region fallthrough
CT: control target
= control target key end

     0   :  { %s560_s21 = smov 0   ;;  %s612_s0 = inlined_call_operand.vmem [shape: bf16[32,64], index: 0, kind: input, shape index: {}]   ;;  %s613_s1 = inlined_call_operand.vmem [shape: f32[32,1], index: 1, kind: input, shape index: {}]   ;;  %s614_s2 = inlined_call_operand.vmem [shape: f32[1,64], index: 2, kind: input, shape index: {}]   ;;  %s615_s3 = inlined_call_operand.vmem [shape: f32[1,64], index: 3, kind: input, shape index: {}]   ;;  %s616_s4 = inlined_call_operand.vmem [shape: bf16[64,128], index: 4, kind: input, shape index: {}]   ;;  %s617_s5 = inlined_call_operand.vmem [shape: f32[1,128], index: 5, kind: input, shape index: {}]   ;;  %s618_s6 = inlined_call_operand.vmem [shape: bf16[32,64], index: 6, kind: output, shape index: {}]  }
   0x1 LB: > { %s459_s22 = sadd.s32 4294967295, %s520_s21   ;;  %p463_p0 = scmp.ge.s32.totalorder %s520_s21, 1  ;;  %s520_s21 = sphi %s560_s21, %s16_s21  }
   0x2   : > { %p220_p1 = scmp.lt.s32.totalorder %s520_s21, 5 }
   0x4   : > { %p221_p2 = pnand %p463_p0, %p220_p1 }
   0x5   : > { %p252_p3 = scmp.lt.s32.totalorder (!%p221_p2), %s459_s22, 3 }
   0x6   : > { %224 = sbr.rel (%p221_p2) target bundleno = 678 (0x2a6), region = 44 }
   0xb   : > { %v522_v0 = vmov 0   ;;  %s620_s22 = smov (!%p252_p3, %s459_s22), 3  ;;  %vm274_vm0 = vcmask 523264   ;;  %v523_v7 = vmov 64.0   ;;  %v490_v19 = vld [vmem:[%s616_s4 + $0x18] sm:$0xff]  ;;  %v489_v20 = vld [vmem:[%s616_s4 + $0x10] sm:$0xff] }
   0xc   : > { %502 = vset.pattern.permute.xlu0 %v522_v0  ;;  %s465_s23 = sshll.u32 %s620_s22, 3  ;;  %s464_s27 = sshll.u32 %s620_s22, 2  ;;  %506 = vrcp.f32 %v523_v7  ;;  %358 = vmatpush.bf16.msra.mxu0 %v490_v19  ;;  %v488_v21 = vld [vmem:[%s616_s4 + $0x8] sm:$0xff]  ;;  %v487_v22 = vld [vmem:[%s616_s4] sm:$0xff]  ;;  %vm392_vm9 = vcmask 519168  }
   0xd   : > { %s259_s26 = scalar_lea.vmem %s613_s1, %s465_s23  ;;  %s255_s30 = scalar_lea.vmem %s612_s0, %s464_s27  ;;  %v503_v32 = vld [vmem:[%s614_s2] ss:$0 sm:$0xff] }
   0xe   : > { %v267_v1 = vld [vmem:[%s259_s26] sm:$0xff]  ;;  %s524_s23 = smov 64   ;;  %s263_s26 = scalar_lea.vmem %s618_s6, %s464_s27 }
   0xf   : > { %270 = vperm.xlu0 %502, %v267_v1   ;;  %v265_v2 = vld [vmem:[%s255_s30] sm:$0xf] }
  0x10   : > { %v266_v3 = vunpack.c.l.bf16 %v265_v2  ;;  %359 = vmatpush.bf16.msra.mxu0 %v489_v20  ;;  %v504_v35 = vld [vmem:[%s615_s3] ss:$0 sm:$0xff] }
  0x11   : > { %v505_v39 = vld [vmem:[%s617_s5] ss:$0 sm:$0xff] }
  0x12   : > { %v507_v8 = vpop.eup %506 }
  0x13   : > { %v279_v9 = vmul.f32 64.0, %v507_v8  ;;  %vm283_vm1 = vweird.f32 %v507_v8 }
  0x14   : > { %360 = vmatpush.bf16.msra.mxu0 %v488_v21 }
  0x15   : > { %v280_v10 = vsub.f32 1.0, %v279_v9 }
  0x17   : > { %v281_v11 = vmul.f32 %v507_v8, %v280_v10 }
  0x18   : > { %361 = vmatpush.bf16.msra.mxu0 %v487_v22 }
  0x19   : > { %v282_v12 = vadd.f32 %v507_v8, %v281_v11 }
  0x1b   : > { %v284_v13 = vsel %vm283_vm1, %v507_v8, %v282_v12 }
  0x81   : > { %v271_v4 = vpop.permute.xlu0 %270 }
  0x82   : > { %v273_v5 = vmul.f32 %v271_v4, %v266_v3 }
  0x84   : > { %v275_v6 = vsel %vm274_vm0, %v273_v5, 0.0 }
  0x85   : > { %276 = vadd.xlane.f32.xlu0 %v275_v6 }
  0xf8   : > { %v277_v14 = vpop.xlane.xlu0 %276 }
  0xf9   : > { %v285_v15 = vmul.f32 %v284_v13, %v277_v14 }
  0xfb   : > { %v286_v16 = vsub.f32 %v273_v5, %v285_v15 }
  0xfd   : > { %v287_v17 = vmul.f32 %v286_v16, %v286_v16 }
  0xff   : > { %v288_v18 = vsel %vm274_vm0, %v287_v17, 0.0 }
 0x100   : > { %289 = vadd.xlane.f32.xlu1 %v288_v18 }
 0x173   : > { %v290_v23 = vpop.xlane.xlu1 %289 }
 0x174   : > { %v291_v24 = vmul.f32 %v290_v23, %v284_v13 }
 0x176   : > { %v292_v25 = vadd.f32 1e-05, %v291_v24 }
 0x178   : > { %508 = vrsqrt.f32 %v292_v25  ;;  %vm299_vm3 = vweird.f32 %v292_v25 }
 0x17e   : > { %v509_v26 = vpop.eup %508 }
 0x17f   : > { %v294_v27 = vmul.f32 %v509_v26, %v292_v25  ;;  %vm300_vm2 = vweird.f32 %v509_v26 }
 0x180   : > { %vm301_vm4 = vmor %vm299_vm3, %vm300_vm2 }
 0x181   : > { %v295_v28 = vmul.f32 %v509_v26, %v294_v27 }
 0x183   : > { %v296_v29 = vmul.f32 0.5, %v295_v28 }
 0x185   : > { %v297_v30 = vsub.f32 1.5, %v296_v29 }
 0x187   : > { %v298_v31 = vmul.f32 %v509_v26, %v297_v30 }
 0x189   : > { %v302_v33 = vsel %vm301_vm4, %v509_v26, %v298_v31 }
 0x18a   : > { %v303_v34 = vmul.f32 %v302_v33, %v286_v16 }
 0x18c   : > { %v308_v36 = vmul.f32 %v503_v32, %v303_v34 }
 0x18e   : > { %v313_v37 = vadd.f32 %v504_v35, %v308_v36 }
 0x190   : > { %v314_v38 = vpack.c.bf16 %v313_v37, %v313_v37 }
 0x192   : > { %483 = vmatmul.msk.bf16.vlgmr.msra.gmra.mxu0 %vm274_vm0, %v314_v38 }
 0x20f   : > { %v363_v40 = vpop.f32.mrf.mxu0 }
 0x210   : > { %v364_v41 = vadd.f32 %v505_v39, %v363_v40 }
 0x212   : > { %v484_v42 = vmul.f32 -1.442695, %v364_v41 }
 0x214   : > { %510 = vpow2.f32 %v484_v42 }
 0x217   : > { %v365_v43 = vpop.f32.mrf.mxu0 }
 0x21a   : > { %v511_v44 = vpop.eup %510 }
 0x21b   : > { %v370_v45 = vadd.f32 1.0, %v511_v44 }
 0x21d   : > { %512 = vrcp.f32 %v370_v45  ;;  %v382_v49 = vand.u32 2147483648, %v370_v45  ;;  %v380_v51 = vand.u32 2147483647, %v370_v45  ;;  %vm376_vm6 = vweird.f32 %v370_v45 }
 0x21f   : > { %v383_v53 = vor.u32 1.1754944e-38, %v382_v49  ;;  %vm381_vm8 = vcmp.eq.f32.partialorder %v380_v51, 8.507059e+37 }
 0x223   : > { %v513_v46 = vpop.eup %512 }
 0x224   : > { %v372_v47 = vmul.f32 %v513_v46, %v370_v45  ;;  %vm377_vm5 = vweird.f32 %v513_v46 }
 0x225   : > { %vm378_vm7 = vmor %vm376_vm6, %vm377_vm5 }
 0x226   : > { %v373_v48 = vsub.f32 1.0, %v372_v47 }
 0x228   : > { %v374_v50 = vmul.f32 %v513_v46, %v373_v48 }
 0x22a   : > { %v375_v52 = vadd.f32 %v513_v46, %v374_v50 }
 0x22c   : > { %v379_v54 = vsel %vm378_vm7, %v513_v46, %v375_v52 }
 0x22d   : > { %v384_v55 = vsel %vm381_vm8, %v383_v53, %v379_v54 }
 0x22e   : > { %387 = vrot.lane.b32.xlu1 %v384_v55, %s524_s23 }
 0x2a0   : > { %v388_v56 = vpop.permute.xlu1 %387 }
 0x2a1   : > { %v390_v57 = vmul.f32 %v388_v56, %v364_v41 }
 0x2a3   : > { %v391_v58 = vpack.c.bf16 %v390_v57, %v390_v57 }
 0x2a5   : > { %393 = vst.msk [vmem:[%s263_s26] sm:$0xf] %vm392_vm9, %v391_v58 }
 0x2a6 PF: > { %s16_s21 = sadd.s32 1, %s520_s21  }
 0x2a7   : > { %p13_p4 = scmp.ge.s32.totalorder %s16_s21, 6  }
 0x2a9   :  { %15 = sbr.rel (!%p13_p4) target bundleno = 1 (0x1), region = 77 }

// kernel: encoder_forward.34
= control target key start
LH: loop header
LB: loop body
LE: loop exit
PB: predicated region body
PF: predicated region fallthrough
CT: control target
= control target key end

     0   :  { %s579_s18 = smov 0   ;;  %s637_s0 = inlined_call_operand.vmem [shape: bf16[2,22,64], index: 0, kind: input, shape index: {}]   ;;  %s638_s1 = inlined_call_operand.vmem [shape: f32[7,64], index: 1, kind: input, shape index: {}]   ;;  %s639_s2 = inlined_call_operand.vmem [shape: f32[1,64], index: 2, kind: input, shape index: {}]   ;;  %s640_s3 = inlined_call_operand.vmem [shape: bf16[2,16,64], index: 3, kind: output, shape index: {0}]   ;;  %s641_s4 = inlined_call_operand.vmem [shape: f32[16,64], index: 4, kind: output, shape index: {1}]   ;;  %s642_s5 = inlined_call_operand.vmem [shape: f32[16,64], index: 5, kind: output, shape index: {2}]  }
   0x1 LB: > { %s514_s19 = sadd.s32 4294967295, %s547_s18   ;;  %p518_p0 = scmp.ge.s32.totalorder %s547_s18, 1  ;;  %s547_s18 = sphi %s579_s18, %s16_s18  }
   0x2   : > { %p192_p1 = scmp.lt.s32.totalorder %s547_s18, 3 }
   0x4   : > { %p193_p2 = pnand %p518_p0, %p192_p1 }
   0x5   : > { %p228_p3 = scmp.lt.s32.totalorder (!%p193_p2), %s514_s19, 1 }
   0x6   : > { %196 = sbr.rel (%p193_p2) target bundleno = 63 (0x3f), region = 32 }
   0xb   : > { %s644_s19 = smov (!%p228_p3, %s514_s19), 1  ;;  %v252_v0 = vld [vmem:[%s638_s1] sm:$0x7f]  ;;  %vm263_vm0 = vcmask 1046528   ;;  %vm280_vm1 = vcmask 1045504   ;;  %vm297_vm2 = vcmask 1044480  }
   0xc   : > { %s531_s22 = smul.u32 12, %s644_s19  ;;  %v253_v1 = vperm.slane %v252_v0, 0  ;;  %v256_v2 = vperm.slane %v252_v0, 1  ;;  %v273_v3 = vperm.slane %v252_v0, 2  ;;  %v290_v6 = vperm.slane %v252_v0, 3  ;;  %s609_s28 = sshll.u32 %s644_s19, 3 }
   0xd   : > { %v307_v7 = vperm.slane %v252_v0, 4  ;;  %vm314_vm3 = vcmask 1043456   ;;  %v324_v11 = vperm.slane %v252_v0, 5  ;;  %vm331_vm4 = vcmask 1042432   ;;  %v540_v63 = vld [vmem:[%s639_s2] ss:$0 sm:$0xff]  ;;  %s237_s6 = scalar_lea.vmem %s640_s3, %s609_s28  ;;  %s241_s9 = scalar_lea.vmem %s641_s4, %s609_s28 }
   0xe   : > { %s232_s25 = scalar_lea.vmem %s637_s0, %s531_s22  ;;  %v341_v12 = vperm.slane %v252_v0, 6  ;;  %vm348_vm5 = vcmask 1041408   ;;  %vm366_vm6 = vcmask 519168   ;;  %vm369_vm7 = vcmask 523264   ;;  %s245_s12 = scalar_lea.vmem %s642_s5, %s609_s28 }
   0xf   : > { %v528_v4 = vld [vmem:[%s232_s25] sm:$0xff]   ;;  %v248_v5 = vld [vmem:[%s232_s25 + $0x8] sm:$0x7] }
  0x10   : > { %v529_v8 = vunpack.c.l.bf16 %v528_v4  ;;  %v530_v9 = vunpack.c.h.bf16 %v528_v4  ;;  %v251_v10 = vunpack.c.l.bf16 %v248_v5 }
  0x12   : > { %v254_v13 = vmul.f32 %v529_v8, %v253_v1  ;;  %v257_v14 = vmul.f32 %v529_v8, %v256_v2  ;;  %v258_v15 = vmul.f32 %v530_v9, %v256_v2  ;;  %v274_v16 = vmul.f32 %v529_v8, %v273_v3 }
  0x13   : > { %v275_v17 = vmul.f32 %v530_v9, %v273_v3  ;;  %v291_v18 = vmul.f32 %v529_v8, %v290_v6  ;;  %v292_v19 = vmul.f32 %v530_v9, %v290_v6  ;;  %v308_v20 = vmul.f32 %v529_v8, %v307_v7 }
  0x14   : > { %v264_v21 = vrot.slane %v257_v14, 1  ;;  %v265_v22 = vrot.slane %v258_v15, 1  ;;  %v281_v23 = vrot.slane %v274_v16, 2  ;;  %v309_v24 = vmul.f32 %v530_v9, %v307_v7 }
  0x15   : > { %v282_v25 = vrot.slane %v275_v17, 2  ;;  %v298_v26 = vrot.slane %v291_v18, 3  ;;  %v299_v27 = vrot.slane %v292_v19, 3  ;;  %v315_v28 = vrot.slane %v308_v20, 4 }
  0x16   : > { %v266_v29 = vsel %vm263_vm0, %v264_v21, %v265_v22  ;;  %v316_v30 = vrot.slane %v309_v24, 4  ;;  %v325_v31 = vmul.f32 %v529_v8, %v324_v11  ;;  %v326_v32 = vmul.f32 %v530_v9, %v324_v11 }
  0x17   : > { %v271_v33 = vadd.f32 %v266_v29, %v254_v13  ;;  %v283_v34 = vsel %vm280_vm1, %v281_v23, %v282_v25  ;;  %v342_v35 = vmul.f32 %v529_v8, %v341_v12  ;;  %v300_v36 = vsel %vm297_vm2, %v298_v26, %v299_v27 }
  0x18   : > { %v332_v37 = vrot.slane %v325_v31, 5  ;;  %v333_v38 = vrot.slane %v326_v32, 5  ;;  %v343_v39 = vmul.f32 %v530_v9, %v341_v12  ;;  %v317_v41 = vsel %vm314_vm3, %v315_v28, %v316_v30 }
  0x19   : > { %v288_v40 = vadd.f32 %v283_v34, %v271_v33  ;;  %v349_v42 = vrot.slane %v342_v35, 6  ;;  %v259_v43 = vmul.f32 %v256_v2, %v251_v10  ;;  %v255_v45 = vmul.f32 %v530_v9, %v253_v1 }
  0x1a   : > { %v350_v44 = vrot.slane %v343_v39, 6  ;;  %v276_v46 = vmul.f32 %v273_v3, %v251_v10  ;;  %v293_v47 = vmul.f32 %v290_v6, %v251_v10  ;;  %v310_v50 = vmul.f32 %v307_v7, %v251_v10 }
  0x1b   : > { %v305_v48 = vadd.f32 %v300_v36, %v288_v40  ;;  %v267_v49 = vrot.slane %v259_v43, 1  ;;  %v327_v51 = vmul.f32 %v324_v11, %v251_v10  ;;  %v334_v52 = vsel %vm331_vm4, %v332_v37, %v333_v38 }
  0x1c   : > { %v284_v53 = vrot.slane %v276_v46, 2  ;;  %v301_v54 = vrot.slane %v293_v47, 3  ;;  %v318_v57 = vrot.slane %v310_v50, 4  ;;  %v344_v58 = vmul.f32 %v341_v12, %v251_v10 }
  0x1d   : > { %v322_v55 = vadd.f32 %v317_v41, %v305_v48  ;;  %v268_v56 = vsel %vm263_vm0, %v265_v22, %v267_v49  ;;  %v351_v59 = vsel %vm348_vm5, %v349_v42, %v350_v44  ;;  %v335_v1 = vrot.slane %v327_v51, 5 }
  0x1e   : > { %v272_v60 = vadd.f32 %v268_v56, %v255_v45  ;;  %v285_v61 = vsel %vm280_vm1, %v282_v25, %v284_v53  ;;  %v302_v0 = vsel %vm297_vm2, %v299_v27, %v301_v54  ;;  %v319_v4 = vsel %vm314_vm3, %v316_v30, %v318_v57 }
  0x1f   : > { %v339_v62 = vadd.f32 %v334_v52, %v322_v55  ;;  %v352_v5 = vrot.slane %v344_v58, 6  ;;  %v336_v8 = vsel %vm331_vm4, %v333_v38, %v335_v1  ;;  %v390_v25 = vlaneseq }
  0x20   : > { %v289_v2 = vadd.f32 %v285_v61, %v272_v60 }
  0x21   : > { %v356_v3 = vadd.f32 %v351_v59, %v339_v62  ;;  %v353_v11 = vsel %vm348_vm5, %v350_v44, %v352_v5  ;;  %v391_v30 = vshrl.u32 %v390_v25, 7 }
  0x22   : > { %v306_v6 = vadd.f32 %v302_v0, %v289_v2 }
  0x23   : > { %v362_v7 = vadd.f32 %v540_v63, %v356_v3  ;;  %vm392_vm8 = vcmp.eq.s32.totalorder %v391_v30, 0 }
  0x24   : > { %v323_v9 = vadd.f32 %v319_v4, %v306_v6 }
  0x25   : > { %v364_v10 = vpack.c.bf16 %v362_v7, %v362_v7  ;;  %v379_v14 = vmul.f32 %v362_v7, %v362_v7  ;;  %v370_v16 = vsel %vm369_vm7, %v362_v7, 0.0 }
  0x26   : > { %v340_v12 = vadd.f32 %v336_v8, %v323_v9 }
  0x27   : > { %367 = vst.msk [vmem:[%s237_s6] sm:$0xf] %vm366_vm6, %v364_v10  ;;  %v381_v20 = vsel %vm369_vm7, %v379_v14, 0.0 }
  0x28   : > { %v357_v13 = vadd.f32 %v353_v11, %v340_v12 }
  0x2a   : > { %v363_v15 = vadd.f32 %v540_v63, %v357_v13 }
  0x2c   : > { %v365_v17 = vpack.c.bf16 %v363_v15, %v363_v15  ;;  %v371_v18 = vsel %vm369_vm7, %v363_v15, 0.0  ;;  %v380_v19 = vmul.f32 %v363_v15, %v363_v15 }
  0x2d   : > { %v372_v21 = vadd.f32 %v371_v18, %v370_v16 }
  0x2e   : > { %368 = vst.msk [vmem:[%s237_s6 + $0x4] sm:$0xf] %vm366_vm6, %v365_v17  ;;  %v382_v22 = vsel %vm369_vm7, %v380_v19, 0.0 }
  0x2f   : > { %v373_v23 = vrot.slane %v372_v21, 4  ;;  %v383_v24 = vadd.f32 %v382_v22, %v381_v20 }
  0x31   : > { %v374_v26 = vadd.f32 %v373_v23, %v372_v21  ;;  %v384_v27 = vrot.slane %v383_v24, 4 }
  0x33   : > { %v375_v28 = vrot.slane %v374_v26, 2  ;;  %v385_v29 = vadd.f32 %v384_v27, %v383_v24 }
  0x35   : > { %v376_v31 = vadd.f32 %v375_v28, %v374_v26  ;;  %v386_v32 = vrot.slane %v385_v29, 2 }
  0x37   : > { %v377_v33 = vrot.slane %v376_v31, 1  ;;  %v387_v34 = vadd.f32 %v386_v32, %v385_v29 }
  0x39   : > { %v378_v35 = vadd.f32 %v377_v33, %v376_v31  ;;  %v388_v36 = vrot.slane %v387_v34, 1 }
  0x3b   : > { %v393_v37 = vsel %vm392_vm8, %v378_v35, 0.0  ;;  %v389_v38 = vadd.f32 %v388_v36, %v387_v34 }
  0x3c   : > { %394 = vst.msk [vmem:[%s241_s9] sm:$0xff] %vm369_vm7, %v393_v37 }
  0x3d   : > { %v395_v39 = vsel %vm392_vm8, %v389_v38, 0.0 }
  0x3e   : > { %396 = vst.msk [vmem:[%s245_s12] sm:$0xff] %vm369_vm7, %v395_v39 }
  0x3f PF: > { %s16_s18 = sadd.s32 1, %s547_s18  }
  0x40   : > { %p13_p4 = scmp.ge.s32.totalorder %s16_s18, 4  }
  0x42   :  { %15 = sbr.rel (!%p13_p4) target bundleno = 1 (0x1), region = 86 }

// kernel: encoder_forward.35
= control target key start
LH: loop header
LB: loop body
LE: loop exit
PB: predicated region body
PF: predicated region fallthrough
CT: control target
= control target key end

     0   :  { %s584_s24 = smov 0   ;;  %s633_s0 = inlined_call_operand.vmem [shape: bf16[32,64], index: 0, kind: input, shape index: {}]   ;;  %s634_s1 = inlined_call_operand.vmem [shape: f32[1,64], index: 1, kind: input, shape index: {}]   ;;  %s635_s2 = inlined_call_operand.vmem [shape: f32[1,64], index: 2, kind: input, shape index: {}]   ;;  %s636_s3 = inlined_call_operand.vmem [shape: bf16[64,64], index: 3, kind: input, shape index: {}]   ;;  %s637_s4 = inlined_call_operand.vmem [shape: f32[1,64], index: 4, kind: input, shape index: {}]   ;;  %s638_s5 = inlined_call_operand.vmem [shape: bf16[32,64], index: 5, kind: input, shape index: {}]   ;;  %s639_s6 = inlined_call_operand.vmem [shape: f32[32,1], index: 6, kind: input, shape index: {}]   ;;  %s640_s7 = inlined_call_operand.vmem [shape: bf16[32,64], index: 7, kind: output, shape index: {}]  }
   0x1 LB: > { %s485_s25 = sadd.s32 4294967295, %s541_s24   ;;  %p489_p0 = scmp.ge.s32.totalorder %s541_s24, 1  ;;  %s541_s24 = sphi %s584_s24, %s17_s24  }
   0x2   : > { %p254_p1 = scmp.lt.s32.totalorder %s541_s24, 5 }
   0x4   : > { %p255_p2 = pnand %p489_p0, %p254_p1 }
   0x5   : > { %p292_p3 = scmp.lt.s32.totalorder (!%p255_p2), %s485_s25, 3 }
   0x6   : > { %258 = sbr.rel (%p255_p2) target bundleno = 187 (0xbb), region = 48 }
   0xb   : > { %v517_v0 = vld [vmem:[%s636_s3 + $0x18] sm:$0xff]  ;;  %v516_v1 = vld [vmem:[%s636_s3 + $0x10] sm:$0xff]  ;;  %s642_s25 = smov (!%p292_p3, %s485_s25), 3  ;;  %v528_v2 = vld [vmem:[%s634_s1] ss:$0 sm:$0xff]  ;;  %v543_v12 = vmov 0  }
   0xc   : > { %395 = vmatpush.bf16.msra.mxu0 %v517_v0  ;;  %s598_s30 = sshll.u32 %s642_s25, 2  ;;  %v515_v3 = vld [vmem:[%s636_s3 + $0x8] sm:$0xff]  ;;  %v529_v6 = vld [vmem:[%s635_s2] ss:$0 sm:$0xff]  ;;  %s492_s17 = sshll.u32 %s642_s25, 3  ;;  %527 = vset.pattern.permute.xlu0 %v543_v12  ;;  %vm387_vm4 = vcmask 523264  }
   0xd   : > { %s295_s10 = scalar_lea.vmem %s633_s0, %s598_s30  ;;  %v514_v8 = vld [vmem:[%s636_s3] sm:$0xff]  ;;  %s303_s22 = scalar_lea.vmem %s639_s6, %s492_s17  ;;  %vm406_vm5 = vcmask 519168  }
   0xe   : > { %v309_v4 = vld [vmem:[%s295_s10] sm:$0xf]  ;;  %s299_s26 = scalar_lea.vmem %s638_s5, %s598_s30  ;;  %s307_s9 = scalar_lea.vmem %s640_s7, %s598_s30 }
   0xf   : > { %v310_v5 = vunpack.c.l.bf16 %v309_v4  ;;  %v352_v11 = vld [vmem:[%s303_s22] sm:$0xff] }
  0x10   : > { %396 = vmatpush.bf16.msra.mxu0 %v516_v1  ;;  %355 = vperm.xlu0 %527, %v352_v11   ;;  %v350_v27 = vld [vmem:[%s299_s26] sm:$0xf] }
  0x11   : > { %v315_v7 = vmul.f32 %v528_v2, %v310_v5  ;;  %v351_v28 = vunpack.c.l.bf16 %v350_v27  ;;  %v530_v30 = vld [vmem:[%s637_s4] ss:$0 sm:$0xff] }
  0x13   : > { %v320_v9 = vadd.f32 %v529_v6, %v315_v7 }
  0x14   : > { %397 = vmatpush.bf16.msra.mxu0 %v515_v3 }
  0x15   : > { %v494_v10 = vmul.f32 -1.442695, %v320_v9 }
  0x17   : > { %531 = vpow2.f32 %v494_v10 }
  0x18   : > { %398 = vmatpush.bf16.msra.mxu0 %v514_v8 }
  0x1d   : > { %v532_v13 = vpop.eup %531 }
  0x1e   : > { %v324_v14 = vadd.f32 1.0, %v532_v13 }
  0x20   : > { %533 = vrcp.f32 %v324_v14  ;;  %v336_v17 = vand.u32 2147483648, %v324_v14  ;;  %vm330_vm0 = vweird.f32 %v324_v14  ;;  %v334_v19 = vand.u32 2147483647, %v324_v14 }
  0x22   : > { %v337_v21 = vor.u32 1.1754944e-38, %v336_v17  ;;  %vm335_vm3 = vcmp.eq.f32.partialorder %v334_v19, 8.507059e+37 }
  0x26   : > { %v534_v15 = vpop.eup %533 }
  0x27   : > { %v326_v16 = vmul.f32 %v534_v15, %v324_v14  ;;  %vm331_vm1 = vweird.f32 %v534_v15 }
  0x28   : > { %vm332_vm2 = vmor %vm330_vm0, %vm331_vm1 }
  0x29   : > { %v327_v18 = vsub.f32 1.0, %v326_v16 }
  0x2b   : > { %v328_v20 = vmul.f32 %v534_v15, %v327_v18 }
  0x2d   : > { %v329_v22 = vadd.f32 %v534_v15, %v328_v20 }
  0x2f   : > { %v333_v23 = vsel %vm332_vm2, %v534_v15, %v329_v22 }
  0x30   : > { %v338_v24 = vsel %vm335_vm3, %v337_v21, %v333_v23 }
  0x31   : > { %v340_v25 = vmul.f32 %v338_v24, %v320_v9 }
  0x33   : > { %v341_v26 = vpack.c.bf16 %v340_v25, %v340_v25 }
  0x35   : > { %511 = vmatmul.msk.bf16.vlgmr.msra.gmra.mxu0 %vm387_vm4, %v341_v26 }
  0x82   : > { %v356_v29 = vpop.permute.xlu0 %355 }
  0x83   : > { %v358_v31 = vmul.f32 %v356_v29, %v351_v28 }
  0xb2   : > { %v400_v32 = vpop.f32.mrf.mxu0 }
  0xb3   : > { %v401_v33 = vadd.f32 %v530_v30, %v400_v32 }
  0xb5   : > { %v404_v34 = vadd.f32 %v401_v33, %v358_v31 }
  0xb7   : > { %v405_v35 = vpack.c.bf16 %v404_v34, %v404_v34 }
  0xb9   : > { %407 = vst.msk [vmem:[%s307_s9] sm:$0xf] %vm406_vm5, %v405_v35 }
  0xba   : > { %v402_v36 = vpop.f32.mrf.mxu0 }
  0xbb PF: > { %s17_s24 = sadd.s32 1, %s541_s24  }
  0xbc   : > { %p14_p4 = scmp.ge.s32.totalorder %s17_s24, 6  }
  0xbe   :  { %16 = sbr.rel (!%p14_p4) target bundleno = 1 (0x1), region = 84 }

// kernel: encoder_forward.37
= control target key start
LH: loop header
LB: loop body
LE: loop exit
PB: predicated region body
PF: predicated region fallthrough
CT: control target
= control target key end

     0   :  { %s524_s21 = smov 0   ;;  %s573_s0 = inlined_call_operand.vmem [shape: bf16[32,64], index: 0, kind: input, shape index: {}]   ;;  %s574_s1 = inlined_call_operand.vmem [shape: bf16[32,64], index: 1, kind: input, shape index: {}]   ;;  %s575_s2 = inlined_call_operand.vmem [shape: bf16[64,64], index: 2, kind: input, shape index: {}]   ;;  %s576_s3 = inlined_call_operand.vmem [shape: f32[1,64], index: 3, kind: input, shape index: {}]   ;;  %s577_s4 = inlined_call_operand.vmem [shape: f32[1,64], index: 4, kind: input, shape index: {}]   ;;  %s578_s5 = inlined_call_operand.vmem [shape: f32[1,64], index: 5, kind: input, shape index: {}]   ;;  %s579_s6 = inlined_call_operand.vmem [shape: bf16[32,64], index: 6, kind: output, shape index: {}]  }
   0x1 LB: > { %s433_s22 = sadd.s32 4294967295, %s486_s21   ;;  %p437_p0 = scmp.ge.s32.totalorder %s486_s21, 1  ;;  %s486_s21 = sphi %s524_s21, %s16_s21  }
   0x2   : > { %p220_p1 = scmp.lt.s32.totalorder %s486_s21, 5 }
   0x4   : > { %p221_p2 = pnand %p437_p0, %p220_p1 }
   0x5   : > { %p252_p3 = scmp.lt.s32.totalorder (!%p221_p2), %s433_s22, 3 }
   0x6   : > { %224 = sbr.rel (%p221_p2) target bundleno = 430 (0x1ae), region = 44 }
   0xb   : > { %v463_v0 = vld [vmem:[%s575_s2 + $0x18] sm:$0xff]  ;;  %v462_v1 = vld [vmem:[%s575_s2 + $0x10] sm:$0xff]  ;;  %s581_s22 = smov (!%p252_p3, %s433_s22), 3  ;;  %v461_v2 = vld [vmem:[%s575_s2 + $0x8] sm:$0xff]  ;;  %vm307_vm0 = vcmask 523264   ;;  %v488_v17 = vmov 64.0  }
   0xc   : > { %315 = vmatpush.bf16.msra.mxu0 %v463_v0  ;;  %s538_s27 = sshll.u32 %s581_s22, 2  ;;  %v460_v8 = vld [vmem:[%s575_s2] sm:$0xff]  ;;  %476 = vrcp.f32 %v488_v17  ;;  %vm366_vm5 = vcmask 519168  }
   0xd   : > { %s255_s30 = scalar_lea.vmem %s573_s0, %s538_s27  ;;  %s259_s9 = scalar_lea.vmem %s574_s1, %s538_s27  ;;  %v473_v10 = vld [vmem:[%s576_s3] ss:$0 sm:$0xff] }
   0xe   : > { %v265_v3 = vld [vmem:[%s255_s30] sm:$0xf]  ;;  %s263_s23 = scalar_lea.vmem %s579_s6, %s538_s27 }
   0xf   : > { %v267_v4 = vld [vmem:[%s259_s9] sm:$0xf]  ;;  %v266_v5 = vunpack.c.l.bf16 %v265_v3 }
  0x10   : > { %316 = vmatpush.bf16.msra.mxu0 %v462_v1  ;;  %v268_v6 = vunpack.c.l.bf16 %v267_v4  ;;  %v474_v38 = vld [vmem:[%s577_s4] ss:$0 sm:$0xff] }
  0x11   : > { %v475_v40 = vld [vmem:[%s578_s5] ss:$0 sm:$0xff] }
  0x12   : > { %v269_v7 = vadd.f32 %v268_v6, %v266_v5  ;;  %v477_v18 = vpop.eup %476 }
  0x13   : > { %v330_v19 = vmul.f32 64.0, %v477_v18  ;;  %vm334_vm1 = vweird.f32 %v477_v18 }
  0x14   : > { %317 = vmatpush.bf16.msra.mxu0 %v461_v2  ;;  %v270_v9 = vpack.c.bf16 %v269_v7, %v269_v7 }
  0x15   : > { %v331_v20 = vsub.f32 1.0, %v330_v19 }
  0x17   : > { %v332_v21 = vmul.f32 %v477_v18, %v331_v20 }
  0x18   : > { %318 = vmatpush.bf16.msra.mxu0 %v460_v8 }
  0x19   : > { %v333_v22 = vadd.f32 %v477_v18, %v332_v21 }
  0x1b   : > { %457 = vmatmul.msk.bf16.vlgmr.msra.gmra.mxu0 %vm307_vm0, %v270_v9  ;;  %v335_v23 = vsel %vm334_vm1, %v477_v18, %v333_v22 }
  0x98   : > { %v320_v11 = vpop.f32.mrf.mxu0 }
  0x99   : > { %v321_v12 = vadd.f32 %v473_v10, %v320_v11 }
  0x9b   : > { %v324_v13 = vmax.f32 %v321_v12, 0.0 }
  0x9d   : > { %v325_v14 = vadd.f32 %v324_v13, %v266_v5 }
  0x9f   : > { %v326_v15 = vsel %vm307_vm0, %v325_v14, 0.0 }
  0xa0   : > { %v322_v16 = vpop.f32.mrf.mxu0  ;;  %327 = vadd.xlane.f32.xlu0 %v326_v15 }
 0x113   : > { %v328_v24 = vpop.xlane.xlu0 %327 }
 0x114   : > { %v336_v25 = vmul.f32 %v335_v23, %v328_v24 }
 0x116   : > { %v337_v26 = vsub.f32 %v325_v14, %v336_v25 }
 0x118   : > { %v338_v27 = vmul.f32 %v337_v26, %v337_v26 }
 0x11a   : > { %v339_v28 = vsel %vm307_vm0, %v338_v27, 0.0 }
 0x11b   : > { %340 = vadd.xlane.f32.xlu0 %v339_v28 }
 0x18e   : > { %v341_v29 = vpop.xlane.xlu0 %340 }
 0x18f   : > { %v342_v30 = vmul.f32 %v341_v29, %v335_v23 }
 0x191   : > { %v343_v31 = vadd.f32 1e-05, %v342_v30 }
 0x193   : > { %478 = vrsqrt.f32 %v343_v31  ;;  %vm350_vm3 = vweird.f32 %v343_v31 }
 0x199   : > { %v479_v32 = vpop.eup %478 }
 0x19a   : > { %v345_v33 = vmul.f32 %v479_v32, %v343_v31  ;;  %vm351_vm2 = vweird.f32 %v479_v32 }
 0x19b   : > { %vm352_vm4 = vmor %vm350_vm3, %vm351_vm2 }
 0x19c   : > { %v346_v34 = vmul.f32 %v479_v32, %v345_v33 }
 0x19e   : > { %v347_v35 = vmul.f32 0.5, %v346_v34 }
 0x1a0   : > { %v348_v36 = vsub.f32 1.5, %v347_v35 }
 0x1a2   : > { %v349_v37 = vmul.f32 %v479_v32, %v348_v36 }
 0x1a4   : > { %v353_v39 = vsel %vm352_vm4, %v479_v32, %v349_v37 }
 0x1a5   : > { %v354_v41 = vmul.f32 %v353_v39, %v337_v26 }
 0x1a7   : > { %v359_v42 = vmul.f32 %v474_v38, %v354_v41 }
 0x1a9   : > { %v364_v43 = vadd.f32 %v475_v40, %v359_v42 }
 0x1ab   : > { %v365_v44 = vpack.c.bf16 %v364_v43, %v364_v43 }
 0x1ad   : > { %367 = vst.msk [vmem:[%s263_s23] sm:$0xf] %vm366_vm5, %v365_v44 }
 0x1ae PF: > { %s16_s21 = sadd.s32 1, %s486_s21  }
 0x1af   : > { %p13_p4 = scmp.ge.s32.totalorder %s16_s21, 6  }
 0x1b1   :  { %15 = sbr.rel (!%p13_p4) target bundleno = 1 (0x1), region = 77 }

// kernel: encoder_forward.36
= control target key start
LH: loop header
LB: loop body
LE: loop exit
PB: predicated region body
PF: predicated region fallthrough
CT: control target
= control target key end

     0   :  { %s950_s30 = smov 0   ;;  %s952_s10 = smov 0   ;;  %s1063_s0 = inlined_call_operand.vmem [shape: bf16[32,64], index: 0, kind: input, shape index: {}]   ;;  %s1064_s1 = inlined_call_operand.vmem [shape: f32[1,64], index: 1, kind: input, shape index: {}]   ;;  %s1065_s2 = inlined_call_operand.vmem [shape: f32[1,64], index: 2, kind: input, shape index: {}]   ;;  %s1066_s3 = inlined_call_operand.vmem [shape: bf16[64,128], index: 3, kind: input, shape index: {}]   ;;  %s1067_s4 = inlined_call_operand.vmem [shape: f32[1,128], index: 4, kind: input, shape index: {}]   ;;  %s1068_s5 = inlined_call_operand.vmem [shape: bf16[128,64], index: 5, kind: input, shape index: {}]   ;;  %s1069_s6 = inlined_call_operand.vmem [shape: f32[1,64], index: 6, kind: input, shape index: {}]   ;;  %s1070_s7 = inlined_call_operand.vmem [shape: f32[1,64], index: 7, kind: input, shape index: {}]   ;;  %s1071_s8 = inlined_call_operand.vmem [shape: f32[1,64], index: 8, kind: input, shape index: {}]   ;;  %s1072_s9 = inlined_call_operand.vmem [shape: bf16[32,64], index: 9, kind: output, shape index: {}]  }
   0x1   :  { %s954_s11 = smov 0  }
   0x2 LB: > { %s31_s12 = sadd.s32 1, %s892_s10  ;;  %p765_p0 = scmp.ge.s32.totalorder %s896_s11, 1  ;;  %s896_s11 = sphi %s954_s11, %s19_s11   ;;  %s892_s10 = sphi %s952_s10, %s1074_s10   ;;  %s888_s30 = sphi %s950_s30, %s1073_s30  }
   0x3   : > { %p33_p1 = scmp.ge.s32.totalorder %s31_s12, 4  ;;  %p326_p2 = scmp.lt.s32.totalorder %s896_s11, 5 }
   0x5   : > { %s1076_s12 = smov (%p33_p1, %s31_s12), 0  ;;  %p327_p3 = pnand %p765_p0, %p326_p2 }
   0x6   : > { %p372_p4 = scmp.lt.s32.totalorder (!%p327_p3), %s888_s30, 3 }
   0x7   : > { %330 = sbr.rel (%p327_p3) target bundleno = 869 (0x365), region = 56 }
   0xc   : > { %s1078_s30 = smov (!%p372_p4, %s888_s30), 3  ;;  %vm400_vm0 = vcmask 523264   ;;  %v898_v3 = vmov 64.0   ;;  %v823_v15 = vld [vmem:[%s1066_s3 + $0x18] sm:$0xff]  ;;  %v822_v16 = vld [vmem:[%s1066_s3 + $0x10] sm:$0xff]  ;;  %v821_v17 = vld [vmem:[%s1066_s3 + $0x8] sm:$0xff] }
   0xd   : > { %s766_s13 = sshll.u32 %s1078_s30, 2  ;;  %864 = vrcp.f32 %v898_v3  ;;  %489 = vmatpush.bf16.msra.mxu0 %v823_v15  ;;  %v820_v19 = vld [vmem:[%s1066_s3] sm:$0xff]  ;;  %vm441_vm5 = vcmask 519168   ;;  %v831_v36 = vld [vmem:[%s1068_s5 + $0x38] sm:$0xff]  ;;  %v830_v37 = vld [vmem:[%s1068_s5 + $0x30] sm:$0xff]  ;;  %v899_v48 = vmov 0.0  }
   0xe   : > { %s976_s16 = scalar_lea.vmem %s1063_s0, %s766_s13  ;;  %v858_v28 = vld [vmem:[%s1064_s1] ss:$0 sm:$0xff]  ;;  %584 = vmatpush.bf16.msra.mxu1 %v831_v36  ;;  %v829_v38 = vld [vmem:[%s1068_s5 + $0x28] sm:$0xff]  ;;  %v827_v40 = vld [vmem:[%s1068_s5 + $0x18] sm:$0xff]  ;;  %443 = vst.msk [vmem:[#allocation3] sm:$0xff] %vm400_vm0, %v899_v48  ;;  %s392_s24 = scalar_lea.vmem %s1072_s9, %s766_s13 }
   0xf   : > { %v398_v0 = vld [vmem:[%s976_s16] sm:$0xf]  ;;  %v826_v41 = vld [vmem:[%s1068_s5 + $0x10] sm:$0xff]  ;;  %v825_v42 = vld [vmem:[%s1068_s5 + $0x8] sm:$0xff] }
  0x10   : > { %v399_v1 = vunpack.c.l.bf16 %v398_v0  ;;  %v859_v30 = vld [vmem:[%s1065_s2] ss:$0 sm:$0xff] }
  0x11   : > { %490 = vmatpush.bf16.msra.mxu0 %v822_v16  ;;  %v828_v39 = vld [vmem:[%s1068_s5 + $0x20] sm:$0xff] }
  0x12   : > { %v401_v2 = vsel %vm400_vm0, %v399_v1, 0.0  ;;  %585 = vmatpush.bf16.msra.mxu1 %v830_v37  ;;  %v824_v43 = vld [vmem:[%s1068_s5] sm:$0xff] }
  0x13   : > { %402 = vadd.xlane.f32.xlu0 %v401_v2  ;;  %v865_v4 = vpop.eup %864  ;;  %v860_v44 = vld [vmem:[%s1067_s4] ss:$0 sm:$0xff] }
  0x14   : > { %v405_v5 = vmul.f32 64.0, %v865_v4  ;;  %vm409_vm1 = vweird.f32 %v865_v4  ;;  %v861_v3 = vld [vmem:[%s1069_s6] ss:$0 sm:$0xff] }
  0x15   : > { %491 = vmatpush.bf16.msra.mxu0 %v821_v17  ;;  %v518_v0 = vld [vmem:[#allocation3] sm:$0xff] }
  0x16   : > { %v406_v6 = vsub.f32 1.0, %v405_v5  ;;  %586 = vmatpush.bf16.msra.mxu1 %v829_v38  ;;  %v609_v5 = vld [vmem:[%s976_s16] sm:$0xf] }
  0x18   : > { %v407_v7 = vmul.f32 %v865_v4, %v406_v6 }
  0x19   : > { %492 = vmatpush.bf16.msra.mxu0 %v820_v19 }
  0x1a   : > { %v408_v8 = vadd.f32 %v865_v4, %v407_v7  ;;  %587 = vmatpush.bf16.msra.mxu1 %v828_v39 }
  0x1c   : > { %v980_v9 = vsel %vm409_vm1, %v865_v4, %v408_v8  ;;  %v610_v8 = vunpack.c.l.bf16 %v609_v5 }
  0x1e   : > { %588 = vmatpush.bf16.msra.mxu1 %v827_v40 }
  0x22   : > { %589 = vmatpush.bf16.msra.mxu1 %v826_v41 }
  0x26   : > { %590 = vmatpush.bf16.msra.mxu1 %v825_v42 }
  0x2a   : > { %591 = vmatpush.bf16.msra.mxu1 %v824_v43 }
  0x86   : > { %v403_v10 = vpop.xlane.xlu0 %402 }
  0x87   : > { %v411_v11 = vmul.f32 %v980_v9, %v403_v10 }
  0x89   : > { %v412_v12 = vsub.f32 %v399_v1, %v411_v11 }
  0x8b   : > { %v413_v13 = vmul.f32 %v412_v12, %v412_v12 }
  0x8d   : > { %v414_v14 = vsel %vm400_vm0, %v413_v13, 0.0 }
  0x8e   : > { %415 = vadd.xlane.f32.xlu0 %v414_v14 }
 0x101   : > { %v416_v18 = vpop.xlane.xlu0 %415 }
 0x102   : > { %v417_v20 = vmul.f32 %v416_v18, %v980_v9 }
 0x104   : > { %v418_v21 = vadd.f32 1e-05, %v417_v20 }
 0x106   : > { %866 = vrsqrt.f32 %v418_v21  ;;  %vm425_vm3 = vweird.f32 %v418_v21 }
 0x10c   : > { %v867_v22 = vpop.eup %866 }
 0x10d   : > { %v420_v23 = vmul.f32 %v867_v22, %v418_v21  ;;  %vm426_vm2 = vweird.f32 %v867_v22 }
 0x10e   : > { %vm427_vm4 = vmor %vm425_vm3, %vm426_vm2 }
 0x10f   : > { %v421_v24 = vmul.f32 %v867_v22, %v420_v23 }
 0x111   : > { %v422_v25 = vmul.f32 0.5, %v421_v24 }
 0x113   : > { %v423_v26 = vsub.f32 1.5, %v422_v25 }
 0x115   : > { %v424_v27 = vmul.f32 %v867_v22, %v423_v26 }
 0x117   : > { %v428_v29 = vsel %vm427_vm4, %v867_v22, %v424_v27  ;;  %v862_v27 = vld [vmem:[%s1070_s7] ss:$0 sm:$0xff] }
 0x118   : > { %v429_v31 = vmul.f32 %v428_v29, %v412_v12 }
 0x11a   : > { %v434_v32 = vmul.f32 %v858_v28, %v429_v31 }
 0x11c   : > { %v439_v33 = vadd.f32 %v859_v30, %v434_v32 }
 0x11e   : > { %v440_v34 = vpack.c.bf16 %v439_v33, %v439_v33 }
 0x120   : > { %442 = vst.msk [vmem:[#allocation2] sm:$0xf] %vm441_vm5, %v440_v34 }
 0x127   : > { %v444_v35 = vld [vmem:[#allocation2] sm:$0xf] }
 0x128   : > { %784 = vmatmul.msk.bf16.vlgmr.msra.gmra.mxu0 %vm400_vm0, %v444_v35 }
 0x1a5   : > { %v494_v45 = vpop.f32.mrf.mxu0 }
 0x1a6   : > { %v495_v46 = vadd.f32 %v860_v44, %v494_v45 }
 0x1a8   : > { %v785_v47 = vmul.f32 -1.442695, %v495_v46 }
 0x1aa   : > { %868 = vpow2.f32 %v785_v47 }
 0x1ad   : > { %v496_v49 = vpop.f32.mrf.mxu0 }
 0x1b0   : > { %v869_v50 = vpop.eup %868 }
 0x1b1   : > { %v501_v51 = vadd.f32 1.0, %v869_v50 }
 0x1b3   : > { %870 = vrcp.f32 %v501_v51  ;;  %v513_v55 = vand.u32 2147483648, %v501_v51  ;;  %v511_v57 = vand.u32 2147483647, %v501_v51  ;;  %vm507_vm7 = vweird.f32 %v501_v51 }
 0x1b5   : > { %v514_v59 = vor.u32 1.1754944e-38, %v513_v55  ;;  %vm512_vm9 = vcmp.eq.f32.partialorder %v511_v57, 8.507059e+37 }
 0x1b9   : > { %v871_v52 = vpop.eup %870 }
 0x1ba   : > { %v503_v53 = vmul.f32 %v871_v52, %v501_v51  ;;  %vm508_vm6 = vweird.f32 %v871_v52 }
 0x1bb   : > { %vm509_vm8 = vmor %vm507_vm7, %vm508_vm6 }
 0x1bc   : > { %v504_v54 = vsub.f32 1.0, %v503_v53 }
 0x1be   : > { %v505_v56 = vmul.f32 %v871_v52, %v504_v54 }
 0x1c0   : > { %v506_v58 = vadd.f32 %v871_v52, %v505_v56 }
 0x1c2   : > { %v510_v60 = vsel %vm509_vm8, %v871_v52, %v506_v58 }
 0x1c3   : > { %v515_v61 = vsel %vm512_vm9, %v514_v59, %v510_v60 }
 0x1c4   : > { %v517_v62 = vmul.f32 %v515_v61, %v495_v46 }
 0x1c6   : > { %v519_v63 = vpack.c.bf16 %v517_v62, %v517_v62 }
 0x1c8   : > { %592 = vmatmul.bf16.vlgmr.msra.gmra.mxu1 %v519_v63 }
 0x245   : > { %v593_v1 = vpop.f32.mrf.mxu1 }
 0x246   : > { %v597_v2 = vadd.f32 %v593_v1, %v518_v0 }
 0x248   : > { %598 = vst.msk [vmem:[#allocation3] sm:$0xff] %vm400_vm0, %v597_v2 }
 0x24d   : > { %v595_v4 = vpop.f32.mrf.mxu1 }
 0x24f   : > { %v602_v6 = vld [vmem:[#allocation3] sm:$0xff] }
 0x250   : > { %v607_v7 = vadd.f32 %v861_v3, %v602_v6 }
 0x252   : > { %v608_v10 = vmul.f32 0.5, %v607_v7 }
 0x254   : > { %v611_v11 = vadd.f32 %v610_v8, %v608_v10 }
 0x256   : > { %v612_v12 = vsel %vm400_vm0, %v611_v11, 0.0 }
 0x257   : > { %613 = vadd.xlane.f32.xlu1 %v612_v12 }
 0x2ca   : > { %v614_v13 = vpop.xlane.xlu1 %613 }
 0x2cb   : > { %v622_v14 = vmul.f32 %v614_v13, %v980_v9 }
 0x2cd   : > { %v623_v15 = vsub.f32 %v611_v11, %v622_v14 }
 0x2cf   : > { %v624_v16 = vmul.f32 %v623_v15, %v623_v15 }
 0x2d1   : > { %v625_v17 = vsel %vm400_vm0, %v624_v16, 0.0 }
 0x2d2   : > { %626 = vadd.xlane.f32.xlu1 %v625_v17 }
 0x345   : > { %v627_v18 = vpop.xlane.xlu1 %626 }
 0x346   : > { %v628_v19 = vmul.f32 %v627_v18, %v980_v9  ;;  %v863_v9 = vld [vmem:[%s1071_s8] ss:$0 sm:$0xff] }
 0x348   : > { %v629_v20 = vadd.f32 1e-05, %v628_v19 }
 0x34a   : > { %872 = vrsqrt.f32 %v629_v20  ;;  %vm636_vm11 = vweird.f32 %v629_v20 }
 0x350   : > { %v873_v21 = vpop.eup %872 }
 0x351   : > { %v631_v22 = vmul.f32 %v873_v21, %v629_v20  ;;  %vm637_vm10 = vweird.f32 %v873_v21 }
 0x352   : > { %vm638_vm12 = vmor %vm636_vm11, %vm637_vm10 }
 0x353   : > { %v632_v23 = vmul.f32 %v873_v21, %v631_v22 }
 0x355   : > { %v633_v24 = vmul.f32 0.5, %v632_v23 }
 0x357   : > { %v634_v25 = vsub.f32 1.5, %v633_v24 }
 0x359   : > { %v635_v26 = vmul.f32 %v873_v21, %v634_v25 }
 0x35b   : > { %v639_v28 = vsel %vm638_vm12, %v873_v21, %v635_v26 }
 0x35c   : > { %v640_v29 = vmul.f32 %v639_v28, %v623_v15 }
 0x35e   : > { %v645_v30 = vmul.f32 %v862_v27, %v640_v29 }
 0x360   : > { %v650_v31 = vadd.f32 %v863_v9, %v645_v30 }
 0x362   : > { %v651_v32 = vpack.c.bf16 %v650_v31, %v650_v31 }
 0x364   : > { %653 = vst.msk [vmem:[%s392_s24] sm:$0xf] %vm441_vm5, %v651_v32 }
 0x365 PF: > { %s19_s11 = sadd.s32 1, %s896_s11   ;;  %s1073_s30 = smov %s892_s10 }
 0x366   : > { %p16_p5 = scmp.ge.s32.totalorder %s19_s11, 6   ;;  %s1074_s10 = smov %s1076_s12 }
 0x368   :  { %18 = sbr.rel (!%p16_p5) target bundleno = 2 (0x2), region = 103 }

</bundles_post_ra>
